<compile_context>
chip_gen: v5e
topology: v5e:2x2
jax: 0.10.0
libtpu: 0.0.40
codegen_flags: <defaults>
</compile_context>

<pallas_src>
import functools
import numpy as np
import jax
import jax.numpy as jnp
from jax import lax
from jax.experimental import pallas as pl
from jax.experimental.pallas import tpu as pltpu


K1, P1 = 7, 3
K2, P2 = 5, 2
K3, P3 = 3, 1


def hybrid_cnn_kernel(x_ref, w1_ref, b1_ref, w2_ref, b2_ref,
                      w3_ref, b3_ref, w4_ref, b4_ref, o_ref, *, seq_len):
    N = x_ref.shape[2]           # block_b * seq_len, flat lane axis
    L = seq_len

    x = x_ref[0].astype(jnp.float32)   # (1, N): block_b sequences along lanes
    w1 = w1_ref[...]                   # (32, 7)   conv1 taps
    b1 = b1_ref[...]                   # (32, 1)
    w2 = w2_ref[...]                   # (64, 160) (C_out, K*C_in) fused taps
    b2 = b2_ref[...]                   # (64, 1)
    w3 = w3_ref[...]                   # (32, 192)
    b3 = b3_ref[...]                   # (32, 1)
    w4 = w4_ref[...]                   # (32, 1)   1x1 conv as a column
    b4 = b4_ref[...]                   # (1, 1)

    # Boundary masks, built once per grid step.  A tap offset d reads position
    # (n % L) + d within its own sequence; zero when outside [0, L).  Every
    # flat-roll wrap that would mix sequences (or batch elements) lands exactly
    # on masked positions, so one roll over the whole lane axis is safe.
    pos = lax.broadcasted_iota(jnp.int32, (1, N), 1) % L
    maskf = {d: jnp.logical_and(pos + d >= 0, pos + d < L).astype(jnp.float32)
             for d in range(-P1, P1 + 1) if d != 0}

    def shifted(a, d):
        # result[:, n] = a[:, n + d] within each length-L sequence, else 0.
        if d == 0:
            return a
        return pltpu.roll(a, shift=(-d) % N, axis=1) * maskf[d]

    # conv1 (1 -> 32, K=7): contraction depth 1 -> VPU outer-product FMAs
    # (a degenerate MXU contraction would waste the systolic array).
    c1 = w1.shape[0]
    h1 = jnp.zeros((c1, N), jnp.float32)
    for k in range(K1):
        h1 = h1 + w1[:, k:k + 1] * shifted(x, k - P1)      # (32,1)*(1,N)
    h1 = jnp.maximum(h1 + b1, 0.0)                          # (32, N)

    # conv2 (32 -> 64, K=5): fused-tap slab, one wide deep MXU matmul.
    slab2 = jnp.concatenate([shifted(h1, k - P2) for k in range(K2)],
                            axis=0)                         # (160, N)
    h2 = jnp.maximum(
        jnp.dot(w2, slab2, preferred_element_type=jnp.float32) + b2,
        0.0)                                                # (64, N)

    # conv3 (64 -> 32, K=3): fused-tap slab, one wide deep MXU matmul.
    slab3 = jnp.concatenate([shifted(h2, k - P3) for k in range(K3)],
                            axis=0)                         # (192, N)
    h3 = jnp.maximum(
        jnp.dot(w3, slab3, preferred_element_type=jnp.float32) + b3,
        0.0)                                                # (32, N)

    # conv4 (1x1, 32 -> 1): VPU multiply + sublane reduce -> lane-dense row,
    # stored once per grid step.
    y = jnp.sum(h3 * w4, axis=0, keepdims=True) + b4        # (1, N)
    o_ref[0] = y.astype(o_ref.dtype)


def hybrid_cnn_forward(x_ncl, params, block_b=64):
    """x_ncl: (B, 1, L) float32 (PyTorch NCL layout).  Returns (B, L)."""
    w1, b1, w2, b2, w3, b3, w4, b4 = params
    B, _, L = x_ncl.shape

    # Cap block_b so the grid has >= 2 "parallel" steps whenever B >= 2
    # (v7x has 2 TensorCores); pad the batch instead of collapsing the grid.
    if B >= 2:
        block_b = max(1, min(block_b, -(-B // 2)))
    else:
        block_b = 1
    num_blocks = -(-B // block_b)
    B_pad = num_blocks * block_b
    if B_pad != B:
        x_ncl = jnp.pad(x_ncl, ((0, B_pad - B), (0, 0), (0, 0)))

    N = block_b * L
    # (B_pad, 1, L) -> (num_blocks, 1, block_b*L): each grid row is block_b
    # consecutive sequences concatenated along lanes (free row-major reshape).
    x_flat = x_ncl.reshape(num_blocks, 1, N)

    consts = (w1, b1, w2, b2, w3, b3, w4, b4)
    const_specs = [pl.BlockSpec(p.shape, lambda b: (0, 0)) for p in consts]

    kernel = functools.partial(hybrid_cnn_kernel, seq_len=L)

    out = pl.pallas_call(
        kernel,
        out_shape=jax.ShapeDtypeStruct((num_blocks, 1, N), jnp.float32),
        grid_spec=pltpu.PrefetchScalarGridSpec(
            num_scalar_prefetch=0,
            grid=(num_blocks,),
            in_specs=[pl.BlockSpec((1, 1, N), lambda b: (b, 0, 0))]
                     + const_specs,
            out_specs=pl.BlockSpec((1, 1, N), lambda b: (b, 0, 0)),
        ),
        compiler_params=pltpu.CompilerParams(
            dimension_semantics=("parallel",),
            vmem_limit_bytes=48 * 1024 * 1024),
    )(x_flat, *consts)

    return out.reshape(B_pad, L)[:B]


def xavier_uniform_conv1d(key, c_out, c_in, k):
    """Matches torch.nn.init.xavier_uniform_ for a Conv1d weight (O, I, K)."""
    fan_in = c_in * k
    fan_out = c_out * k
    bound = float(np.sqrt(6.0 / (fan_in + fan_out)))
    return jax.random.uniform(key, (c_out, c_in, k), jnp.float32, -bound, bound)


def make_params(key):
    ks = jax.random.split(key, 4)
    # PyTorch layout (C_out, C_in, K); module zero-inits biases
    # (init.constant_(m.bias, 0)), so zero biases match the spec exactly.
    w1_t = xavier_uniform_conv1d(ks[0], 32, 1, 7)
    w2_t = xavier_uniform_conv1d(ks[1], 64, 32, 5)
    w3_t = xavier_uniform_conv1d(ks[2], 32, 64, 3)
    w4_t = xavier_uniform_conv1d(ks[3], 1, 32, 1)
    torch_w = (w1_t, w2_t, w3_t, w4_t)
    # Kernel layout:
    #   conv1: (C_out, K); conv2/3: (C_out, K*C_in) with rows ordered
    #   [tap0 ch0..C_in-1, tap1 ...]; conv4: (C_in, 1) column; biases (C_out, 1).
    kern_params = (
        w1_t[:, 0, :],                                        # (32, 7)
        jnp.zeros((32, 1), jnp.float32),
        jnp.transpose(w2_t, (0, 2, 1)).reshape(64, 5 * 32),   # (64, 160)
        jnp.zeros((64, 1), jnp.float32),
        jnp.transpose(w3_t, (0, 2, 1)).reshape(32, 3 * 64),   # (32, 192)
        jnp.zeros((32, 1), jnp.float32),
        w4_t[0],                                              # (32, 1)
        jnp.zeros((1, 1), jnp.float32),
    )
    return torch_w, kern_params


def reference_forward(x_ncl, torch_w):
    """Pure-JAX reference mirroring the PyTorch module (NCL layout, zero bias)."""
    def conv(h, w, pad):
        return lax.conv_general_dilated(
            h, w, window_strides=(1,), padding=[(pad, pad)],
            dimension_numbers=('NCH', 'OIH', 'NCH'),
            precision=lax.Precision.HIGHEST)
    w1, w2, w3, w4 = torch_w
    h = jax.nn.relu(conv(x_ncl, w1, 3))
    h = jax.nn.relu(conv(h, w2, 2))
    h = jax.nn.relu(conv(h, w3, 1))
    y = conv(h, w4, 0)
    return y[:, 0, :]   # squeeze(1)


if __name__ == "__main__":
    key = jax.random.PRNGKey(0)
    k_x, k_p = jax.random.split(key)

    B, L = 16, 128          # small demo: 2 grid steps of 8 batch-fused sequences
    x_ncl = jax.random.normal(k_x, (B, 1, L), dtype=jnp.float32)

    torch_w, kern_params = make_params(k_p)

    y = hybrid_cnn_forward(x_ncl, kern_params)
    y = jax.block_until_ready(y)

    y_ref = reference_forward(x_ncl, torch_w)
    np.testing.assert_allclose(np.asarray(y), np.asarray(y_ref),
                               rtol=5e-3, atol=5e-3)
    assert y.shape == (B, L)
    print("KERNEL_OK")
</pallas_src>

<mosaic_0001>
module attributes {stable_mosaic.version = 11 : i64} {
  func.func @hybrid_cnn_kernel(%arg0: i32, %arg1: memref<1x1x1024xf32, #tpu.memory_space<vmem>>, %arg2: memref<32x7xf32, #tpu.memory_space<vmem>>, %arg3: memref<32x1xf32, #tpu.memory_space<vmem>>, %arg4: memref<64x160xf32, #tpu.memory_space<vmem>>, %arg5: memref<64x1xf32, #tpu.memory_space<vmem>>, %arg6: memref<32x192xf32, #tpu.memory_space<vmem>>, %arg7: memref<32x1xf32, #tpu.memory_space<vmem>>, %arg8: memref<32x1xf32, #tpu.memory_space<vmem>>, %arg9: memref<1x1xf32, #tpu.memory_space<vmem>>, %arg10: memref<1x1x1024xf32, #tpu.memory_space<vmem>>) attributes {dimension_semantics = [#tpu.dimension_semantics<parallel>], iteration_bounds = array<i64: 2>, scalar_prefetch = 0 : i64, scratch_operands = 0 : i64, tpu.core_type = #tpu.core_type<tc>, window_params = [{transform_indices = @transform_0, window_bounds = array<i64: 1, 1, 1024>}, {pipeline_mode = #tpu.pipeline_mode<synchronous>, transform_indices = @transform_1, window_bounds = array<i64: 32, 7>}, {pipeline_mode = #tpu.pipeline_mode<synchronous>, transform_indices = @transform_2, window_bounds = array<i64: 32, 1>}, {pipeline_mode = #tpu.pipeline_mode<synchronous>, transform_indices = @transform_3, window_bounds = array<i64: 64, 160>}, {pipeline_mode = #tpu.pipeline_mode<synchronous>, transform_indices = @transform_4, window_bounds = array<i64: 64, 1>}, {pipeline_mode = #tpu.pipeline_mode<synchronous>, transform_indices = @transform_5, window_bounds = array<i64: 32, 192>}, {pipeline_mode = #tpu.pipeline_mode<synchronous>, transform_indices = @transform_6, window_bounds = array<i64: 32, 1>}, {pipeline_mode = #tpu.pipeline_mode<synchronous>, transform_indices = @transform_7, window_bounds = array<i64: 32, 1>}, {pipeline_mode = #tpu.pipeline_mode<synchronous>, transform_indices = @transform_8, window_bounds = array<i64: 1, 1>}, {transform_indices = @transform_9, window_bounds = array<i64: 1, 1, 1024>}]} {
    %c0 = arith.constant 0 : index
    %c0_0 = arith.constant 0 : index
    %c0_1 = arith.constant 0 : index
    %0 = vector.load %arg1[%c0, %c0_0, %c0_1] : memref<1x1x1024xf32, #tpu.memory_space<vmem>>, vector<1x1x1024xf32>
    %1 = vector.shape_cast %0 : vector<1x1x1024xf32> to vector<1x1024xf32>
    %c0_2 = arith.constant 0 : index
    %c0_3 = arith.constant 0 : index
    %2 = vector.load %arg2[%c0_2, %c0_3] : memref<32x7xf32, #tpu.memory_space<vmem>>, vector<32x7xf32>
    %c0_4 = arith.constant 0 : index
    %c0_5 = arith.constant 0 : index
    %3 = vector.load %arg3[%c0_4, %c0_5] : memref<32x1xf32, #tpu.memory_space<vmem>>, vector<32x1xf32>
    %c0_6 = arith.constant 0 : index
    %c0_7 = arith.constant 0 : index
    %4 = vector.load %arg4[%c0_6, %c0_7] : memref<64x160xf32, #tpu.memory_space<vmem>>, vector<64x160xf32>
    %c0_8 = arith.constant 0 : index
    %c0_9 = arith.constant 0 : index
    %5 = vector.load %arg5[%c0_8, %c0_9] : memref<64x1xf32, #tpu.memory_space<vmem>>, vector<64x1xf32>
    %c0_10 = arith.constant 0 : index
    %c0_11 = arith.constant 0 : index
    %6 = vector.load %arg6[%c0_10, %c0_11] : memref<32x192xf32, #tpu.memory_space<vmem>>, vector<32x192xf32>
    %c0_12 = arith.constant 0 : index
    %c0_13 = arith.constant 0 : index
    %7 = vector.load %arg7[%c0_12, %c0_13] : memref<32x1xf32, #tpu.memory_space<vmem>>, vector<32x1xf32>
    %c0_14 = arith.constant 0 : index
    %c0_15 = arith.constant 0 : index
    %8 = vector.load %arg8[%c0_14, %c0_15] : memref<32x1xf32, #tpu.memory_space<vmem>>, vector<32x1xf32>
    %c0_16 = arith.constant 0 : index
    %c0_17 = arith.constant 0 : index
    %9 = vector.load %arg9[%c0_16, %c0_17] : memref<1x1xf32, #tpu.memory_space<vmem>>, vector<1x1xf32>
    %10 = tpu.iota {dimensions = array<i32: 1>} : vector<1x1024xi32>
    %c128_i32 = arith.constant 128 : i32
    %c0_i32 = arith.constant 0 : i32
    %11 = arith.cmpi eq, %c128_i32, %c0_i32 : i32
    %c1_i32 = arith.constant 1 : i32
    %12 = arith.select %11, %c1_i32, %c128_i32 : i32
    %13 = vector.broadcast %12 : i32 to vector<1x1024xi32>
    %14 = arith.remsi %10, %13 : vector<1x1024xi32>
    %c0_i32_18 = arith.constant 0 : i32
    %15 = vector.broadcast %c0_i32_18 : i32 to vector<1x1024xi32>
    %16 = arith.cmpi ne, %14, %15 : vector<1x1024xi32>
    %c0_i32_19 = arith.constant 0 : i32
    %17 = vector.broadcast %c0_i32_19 : i32 to vector<1x1024xi32>
    %18 = arith.cmpi slt, %14, %17 : vector<1x1024xi32>
    %c0_i32_20 = arith.constant 0 : i32
    %19 = arith.cmpi slt, %12, %c0_i32_20 : i32
    %20 = vector.broadcast %19 : i1 to vector<1x1024xi1>
    %21 = vector.broadcast %20 : vector<1x1024xi1> to vector<1x1024xi1>
    %22 = arith.xori %18, %21 : vector<1x1024xi1>
    %23 = arith.andi %22, %16 : vector<1x1024xi1>
    %24 = vector.broadcast %12 : i32 to vector<1x1024xi32>
    %25 = arith.addi %14, %24 : vector<1x1024xi32>
    %26 = arith.select %23, %25, %14 : vector<1x1024xi1>, vector<1x1024xi32>
    %c-3_i32 = arith.constant -3 : i32
    %27 = vector.broadcast %c-3_i32 : i32 to vector<1x1024xi32>
    %28 = arith.addi %26, %27 : vector<1x1024xi32>
    %c0_i32_21 = arith.constant 0 : i32
    %29 = vector.broadcast %c0_i32_21 : i32 to vector<1x1024xi32>
    %30 = arith.cmpi sge, %28, %29 : vector<1x1024xi32>
    %c-3_i32_22 = arith.constant -3 : i32
    %31 = vector.broadcast %c-3_i32_22 : i32 to vector<1x1024xi32>
    %32 = arith.addi %26, %31 : vector<1x1024xi32>
    %c128_i32_23 = arith.constant 128 : i32
    %33 = vector.broadcast %c128_i32_23 : i32 to vector<1x1024xi32>
    %34 = arith.cmpi slt, %32, %33 : vector<1x1024xi32>
    %35 = arith.andi %30, %34 : vector<1x1024xi1>
    %36 = arith.extui %35 : vector<1x1024xi1> to vector<1x1024xi32>
    %37 = arith.sitofp %36 : vector<1x1024xi32> to vector<1x1024xf32>
    %c-2_i32 = arith.constant -2 : i32
    %38 = vector.broadcast %c-2_i32 : i32 to vector<1x1024xi32>
    %39 = arith.addi %26, %38 : vector<1x1024xi32>
    %c0_i32_24 = arith.constant 0 : i32
    %40 = vector.broadcast %c0_i32_24 : i32 to vector<1x1024xi32>
    %41 = arith.cmpi sge, %39, %40 : vector<1x1024xi32>
    %c-2_i32_25 = arith.constant -2 : i32
    %42 = vector.broadcast %c-2_i32_25 : i32 to vector<1x1024xi32>
    %43 = arith.addi %26, %42 : vector<1x1024xi32>
    %c128_i32_26 = arith.constant 128 : i32
    %44 = vector.broadcast %c128_i32_26 : i32 to vector<1x1024xi32>
    %45 = arith.cmpi slt, %43, %44 : vector<1x1024xi32>
    %46 = arith.andi %41, %45 : vector<1x1024xi1>
    %47 = arith.extui %46 : vector<1x1024xi1> to vector<1x1024xi32>
    %48 = arith.sitofp %47 : vector<1x1024xi32> to vector<1x1024xf32>
    %c-1_i32 = arith.constant -1 : i32
    %49 = vector.broadcast %c-1_i32 : i32 to vector<1x1024xi32>
    %50 = arith.addi %26, %49 : vector<1x1024xi32>
    %c0_i32_27 = arith.constant 0 : i32
    %51 = vector.broadcast %c0_i32_27 : i32 to vector<1x1024xi32>
    %52 = arith.cmpi sge, %50, %51 : vector<1x1024xi32>
    %c-1_i32_28 = arith.constant -1 : i32
    %53 = vector.broadcast %c-1_i32_28 : i32 to vector<1x1024xi32>
    %54 = arith.addi %26, %53 : vector<1x1024xi32>
    %c128_i32_29 = arith.constant 128 : i32
    %55 = vector.broadcast %c128_i32_29 : i32 to vector<1x1024xi32>
    %56 = arith.cmpi slt, %54, %55 : vector<1x1024xi32>
    %57 = arith.andi %52, %56 : vector<1x1024xi1>
    %58 = arith.extui %57 : vector<1x1024xi1> to vector<1x1024xi32>
    %59 = arith.sitofp %58 : vector<1x1024xi32> to vector<1x1024xf32>
    %c1_i32_30 = arith.constant 1 : i32
    %60 = vector.broadcast %c1_i32_30 : i32 to vector<1x1024xi32>
    %61 = arith.addi %26, %60 : vector<1x1024xi32>
    %c0_i32_31 = arith.constant 0 : i32
    %62 = vector.broadcast %c0_i32_31 : i32 to vector<1x1024xi32>
    %63 = arith.cmpi sge, %61, %62 : vector<1x1024xi32>
    %c1_i32_32 = arith.constant 1 : i32
    %64 = vector.broadcast %c1_i32_32 : i32 to vector<1x1024xi32>
    %65 = arith.addi %26, %64 : vector<1x1024xi32>
    %c128_i32_33 = arith.constant 128 : i32
    %66 = vector.broadcast %c128_i32_33 : i32 to vector<1x1024xi32>
    %67 = arith.cmpi slt, %65, %66 : vector<1x1024xi32>
    %68 = arith.andi %63, %67 : vector<1x1024xi1>
    %69 = arith.extui %68 : vector<1x1024xi1> to vector<1x1024xi32>
    %70 = arith.sitofp %69 : vector<1x1024xi32> to vector<1x1024xf32>
    %c2_i32 = arith.constant 2 : i32
    %71 = vector.broadcast %c2_i32 : i32 to vector<1x1024xi32>
    %72 = arith.addi %26, %71 : vector<1x1024xi32>
    %c0_i32_34 = arith.constant 0 : i32
    %73 = vector.broadcast %c0_i32_34 : i32 to vector<1x1024xi32>
    %74 = arith.cmpi sge, %72, %73 : vector<1x1024xi32>
    %c2_i32_35 = arith.constant 2 : i32
    %75 = vector.broadcast %c2_i32_35 : i32 to vector<1x1024xi32>
    %76 = arith.addi %26, %75 : vector<1x1024xi32>
    %c128_i32_36 = arith.constant 128 : i32
    %77 = vector.broadcast %c128_i32_36 : i32 to vector<1x1024xi32>
    %78 = arith.cmpi slt, %76, %77 : vector<1x1024xi32>
    %79 = arith.andi %74, %78 : vector<1x1024xi1>
    %80 = arith.extui %79 : vector<1x1024xi1> to vector<1x1024xi32>
    %81 = arith.sitofp %80 : vector<1x1024xi32> to vector<1x1024xf32>
    %c3_i32 = arith.constant 3 : i32
    %82 = vector.broadcast %c3_i32 : i32 to vector<1x1024xi32>
    %83 = arith.addi %26, %82 : vector<1x1024xi32>
    %c0_i32_37 = arith.constant 0 : i32
    %84 = vector.broadcast %c0_i32_37 : i32 to vector<1x1024xi32>
    %85 = arith.cmpi sge, %83, %84 : vector<1x1024xi32>
    %c3_i32_38 = arith.constant 3 : i32
    %86 = vector.broadcast %c3_i32_38 : i32 to vector<1x1024xi32>
    %87 = arith.addi %26, %86 : vector<1x1024xi32>
    %c128_i32_39 = arith.constant 128 : i32
    %88 = vector.broadcast %c128_i32_39 : i32 to vector<1x1024xi32>
    %89 = arith.cmpi slt, %87, %88 : vector<1x1024xi32>
    %90 = arith.andi %85, %89 : vector<1x1024xi1>
    %91 = arith.extui %90 : vector<1x1024xi1> to vector<1x1024xi32>
    %92 = arith.sitofp %91 : vector<1x1024xi32> to vector<1x1024xf32>
    %cst = arith.constant 0.000000e+00 : f32
    %93 = vector.broadcast %cst : f32 to vector<32x1024xf32>
    %94 = vector.extract_strided_slice %2 {offsets = [0, 0], sizes = [32, 1], strides = [1, 1]} : vector<32x7xf32> to vector<32x1xf32>
    %c3_i32_40 = arith.constant 3 : i32
    %95 = tpu.dynamic_rotate %1 by %c3_i32_40 dim 1 : vector<1x1024xf32>, i32 -> vector<1x1024xf32>
    %96 = arith.mulf %95, %37 : vector<1x1024xf32>
    %97 = vector.broadcast %94 : vector<32x1xf32> to vector<32x1024xf32>
    %98 = vector.broadcast %96 : vector<1x1024xf32> to vector<32x1024xf32>
    %99 = arith.mulf %97, %98 : vector<32x1024xf32>
    %100 = arith.addf %93, %99 : vector<32x1024xf32>
    %101 = vector.extract_strided_slice %2 {offsets = [0, 1], sizes = [32, 1], strides = [1, 1]} : vector<32x7xf32> to vector<32x1xf32>
    %c2_i32_41 = arith.constant 2 : i32
    %102 = tpu.dynamic_rotate %1 by %c2_i32_41 dim 1 : vector<1x1024xf32>, i32 -> vector<1x1024xf32>
    %103 = arith.mulf %102, %48 : vector<1x1024xf32>
    %104 = vector.broadcast %101 : vector<32x1xf32> to vector<32x1024xf32>
    %105 = vector.broadcast %103 : vector<1x1024xf32> to vector<32x1024xf32>
    %106 = arith.mulf %104, %105 : vector<32x1024xf32>
    %107 = arith.addf %100, %106 : vector<32x1024xf32>
    %108 = vector.extract_strided_slice %2 {offsets = [0, 2], sizes = [32, 1], strides = [1, 1]} : vector<32x7xf32> to vector<32x1xf32>
    %c1_i32_42 = arith.constant 1 : i32
    %109 = tpu.dynamic_rotate %1 by %c1_i32_42 dim 1 : vector<1x1024xf32>, i32 -> vector<1x1024xf32>
    %110 = arith.mulf %109, %59 : vector<1x1024xf32>
    %111 = vector.broadcast %108 : vector<32x1xf32> to vector<32x1024xf32>
    %112 = vector.broadcast %110 : vector<1x1024xf32> to vector<32x1024xf32>
    %113 = arith.mulf %111, %112 : vector<32x1024xf32>
    %114 = arith.addf %107, %113 : vector<32x1024xf32>
    %115 = vector.extract_strided_slice %2 {offsets = [0, 3], sizes = [32, 1], strides = [1, 1]} : vector<32x7xf32> to vector<32x1xf32>
    %116 = vector.broadcast %115 : vector<32x1xf32> to vector<32x1024xf32>
    %117 = vector.broadcast %1 : vector<1x1024xf32> to vector<32x1024xf32>
    %118 = arith.mulf %116, %117 : vector<32x1024xf32>
    %119 = arith.addf %114, %118 : vector<32x1024xf32>
    %120 = vector.extract_strided_slice %2 {offsets = [0, 4], sizes = [32, 1], strides = [1, 1]} : vector<32x7xf32> to vector<32x1xf32>
    %c1023_i32 = arith.constant 1023 : i32
    %121 = tpu.dynamic_rotate %1 by %c1023_i32 dim 1 : vector<1x1024xf32>, i32 -> vector<1x1024xf32>
    %122 = arith.mulf %121, %70 : vector<1x1024xf32>
    %123 = vector.broadcast %120 : vector<32x1xf32> to vector<32x1024xf32>
    %124 = vector.broadcast %122 : vector<1x1024xf32> to vector<32x1024xf32>
    %125 = arith.mulf %123, %124 : vector<32x1024xf32>
    %126 = arith.addf %119, %125 : vector<32x1024xf32>
    %127 = vector.extract_strided_slice %2 {offsets = [0, 5], sizes = [32, 1], strides = [1, 1]} : vector<32x7xf32> to vector<32x1xf32>
    %c1022_i32 = arith.constant 1022 : i32
    %128 = tpu.dynamic_rotate %1 by %c1022_i32 dim 1 : vector<1x1024xf32>, i32 -> vector<1x1024xf32>
    %129 = arith.mulf %128, %81 : vector<1x1024xf32>
    %130 = vector.broadcast %127 : vector<32x1xf32> to vector<32x1024xf32>
    %131 = vector.broadcast %129 : vector<1x1024xf32> to vector<32x1024xf32>
    %132 = arith.mulf %130, %131 : vector<32x1024xf32>
    %133 = arith.addf %126, %132 : vector<32x1024xf32>
    %134 = vector.extract_strided_slice %2 {offsets = [0, 6], sizes = [32, 1], strides = [1, 1]} : vector<32x7xf32> to vector<32x1xf32>
    %c1021_i32 = arith.constant 1021 : i32
    %135 = tpu.dynamic_rotate %1 by %c1021_i32 dim 1 : vector<1x1024xf32>, i32 -> vector<1x1024xf32>
    %136 = arith.mulf %135, %92 : vector<1x1024xf32>
    %137 = vector.broadcast %134 : vector<32x1xf32> to vector<32x1024xf32>
    %138 = vector.broadcast %136 : vector<1x1024xf32> to vector<32x1024xf32>
    %139 = arith.mulf %137, %138 : vector<32x1024xf32>
    %140 = arith.addf %133, %139 : vector<32x1024xf32>
    %141 = vector.broadcast %3 : vector<32x1xf32> to vector<32x1024xf32>
    %142 = arith.addf %140, %141 : vector<32x1024xf32>
    %cst_43 = arith.constant 0.000000e+00 : f32
    %143 = vector.broadcast %cst_43 : f32 to vector<32x1024xf32>
    %144 = arith.maximumf %142, %143 : vector<32x1024xf32>
    %c2_i32_44 = arith.constant 2 : i32
    %145 = tpu.dynamic_rotate %144 by %c2_i32_44 dim 1 : vector<32x1024xf32>, i32 -> vector<32x1024xf32>
    %146 = vector.broadcast %48 : vector<1x1024xf32> to vector<32x1024xf32>
    %147 = arith.mulf %145, %146 : vector<32x1024xf32>
    %c1_i32_45 = arith.constant 1 : i32
    %148 = tpu.dynamic_rotate %144 by %c1_i32_45 dim 1 : vector<32x1024xf32>, i32 -> vector<32x1024xf32>
    %149 = vector.broadcast %59 : vector<1x1024xf32> to vector<32x1024xf32>
    %150 = arith.mulf %148, %149 : vector<32x1024xf32>
    %c1023_i32_46 = arith.constant 1023 : i32
    %151 = tpu.dynamic_rotate %144 by %c1023_i32_46 dim 1 : vector<32x1024xf32>, i32 -> vector<32x1024xf32>
    %152 = vector.broadcast %70 : vector<1x1024xf32> to vector<32x1024xf32>
    %153 = arith.mulf %151, %152 : vector<32x1024xf32>
    %c1022_i32_47 = arith.constant 1022 : i32
    %154 = tpu.dynamic_rotate %144 by %c1022_i32_47 dim 1 : vector<32x1024xf32>, i32 -> vector<32x1024xf32>
    %155 = vector.broadcast %81 : vector<1x1024xf32> to vector<32x1024xf32>
    %156 = arith.mulf %154, %155 : vector<32x1024xf32>
    %157 = tpu.concatenate %147, %150, %144, %153, %156 in 0 : vector<32x1024xf32>, vector<32x1024xf32>, vector<32x1024xf32>, vector<32x1024xf32>, vector<32x1024xf32> -> vector<160x1024xf32>
    %cst_48 = arith.constant dense<0.000000e+00> : vector<64x1024xf32>
    %158 = tpu.matmul %4, %157, %cst_48 {dimension_numbers = #tpu.dot_dimension_numbers<[1], [0], [0], [1], [0, 0, 1, 1], [], []>} : vector<64x160xf32>, vector<160x1024xf32>, vector<64x1024xf32> -> vector<64x1024xf32>
    %159 = vector.broadcast %5 : vector<64x1xf32> to vector<64x1024xf32>
    %160 = arith.addf %158, %159 : vector<64x1024xf32>
    %cst_49 = arith.constant 0.000000e+00 : f32
    %161 = vector.broadcast %cst_49 : f32 to vector<64x1024xf32>
    %162 = arith.maximumf %160, %161 : vector<64x1024xf32>
    %c1_i32_50 = arith.constant 1 : i32
    %163 = tpu.dynamic_rotate %162 by %c1_i32_50 dim 1 : vector<64x1024xf32>, i32 -> vector<64x1024xf32>
    %164 = vector.broadcast %59 : vector<1x1024xf32> to vector<64x1024xf32>
    %165 = arith.mulf %163, %164 : vector<64x1024xf32>
    %c1023_i32_51 = arith.constant 1023 : i32
    %166 = tpu.dynamic_rotate %162 by %c1023_i32_51 dim 1 : vector<64x1024xf32>, i32 -> vector<64x1024xf32>
    %167 = vector.broadcast %70 : vector<1x1024xf32> to vector<64x1024xf32>
    %168 = arith.mulf %166, %167 : vector<64x1024xf32>
    %169 = tpu.concatenate %165, %162, %168 in 0 : vector<64x1024xf32>, vector<64x1024xf32>, vector<64x1024xf32> -> vector<192x1024xf32>
    %cst_52 = arith.constant dense<0.000000e+00> : vector<32x1024xf32>
    %170 = tpu.matmul %6, %169, %cst_52 {dimension_numbers = #tpu.dot_dimension_numbers<[1], [0], [0], [1], [0, 0, 1, 1], [], []>} : vector<32x192xf32>, vector<192x1024xf32>, vector<32x1024xf32> -> vector<32x1024xf32>
    %171 = vector.broadcast %7 : vector<32x1xf32> to vector<32x1024xf32>
    %172 = arith.addf %170, %171 : vector<32x1024xf32>
    %cst_53 = arith.constant 0.000000e+00 : f32
    %173 = vector.broadcast %cst_53 : f32 to vector<32x1024xf32>
    %174 = arith.maximumf %172, %173 : vector<32x1024xf32>
    %175 = vector.broadcast %8 : vector<32x1xf32> to vector<32x1024xf32>
    %176 = arith.mulf %174, %175 : vector<32x1024xf32>
    %cst_54 = arith.constant dense<0.000000e+00> : vector<1024xf32>
    %177 = vector.multi_reduction <add>, %176, %cst_54 [0] : vector<32x1024xf32> to vector<1024xf32>
    %178 = vector.shape_cast %177 : vector<1024xf32> to vector<1x1024xf32>
    %179 = vector.broadcast %9 : vector<1x1xf32> to vector<1x1024xf32>
    %180 = arith.addf %178, %179 : vector<1x1024xf32>
    %c0_55 = arith.constant 0 : index
    %c0_56 = arith.constant 0 : index
    %c0_57 = arith.constant 0 : index
    %181 = vector.load %arg10[%c0_55, %c0_56, %c0_57] : memref<1x1x1024xf32, #tpu.memory_space<vmem>>, vector<1x1x1024xf32>
    %182 = vector.shape_cast %181 : vector<1x1x1024xf32> to vector<1x1024xf32>
    %183 = vector.shape_cast %180 : vector<1x1024xf32> to vector<1x1x1024xf32>
    tpu.vector_store %arg10[%c0_55, %c0_56, %c0_57], %183 {strides = array<i32>} : memref<1x1x1024xf32, #tpu.memory_space<vmem>>, vector<1x1x1024xf32>,
    return
  }
  func.func @transform_0(%arg0: i32) -> (i32, i32, i32) {
    %c0_i32 = arith.constant 0 : i32
    %c0_i32_0 = arith.constant 0 : i32
    %c0_i32_1 = arith.constant 0 : i32
    return %arg0, %c0_i32, %c0_i32_0 : i32, i32, i32
  }
  func.func @transform_1(%arg0: i32) -> (i32, i32) {
    %c0_i32 = arith.constant 0 : i32
    %c0_i32_0 = arith.constant 0 : i32
    %c0_i32_1 = arith.constant 0 : i32
    return %c0_i32, %c0_i32_0 : i32, i32
  }
  func.func @transform_2(%arg0: i32) -> (i32, i32) {
    %c0_i32 = arith.constant 0 : i32
    %c0_i32_0 = arith.constant 0 : i32
    %c0_i32_1 = arith.constant 0 : i32
    return %c0_i32, %c0_i32_0 : i32, i32
  }
  func.func @transform_3(%arg0: i32) -> (i32, i32) {
    %c0_i32 = arith.constant 0 : i32
    %c0_i32_0 = arith.constant 0 : i32
    %c0_i32_1 = arith.constant 0 : i32
    return %c0_i32, %c0_i32_0 : i32, i32
  }
  func.func @transform_4(%arg0: i32) -> (i32, i32) {
    %c0_i32 = arith.constant 0 : i32
    %c0_i32_0 = arith.constant 0 : i32
    %c0_i32_1 = arith.constant 0 : i32
    return %c0_i32, %c0_i32_0 : i32, i32
  }
  func.func @transform_5(%arg0: i32) -> (i32, i32) {
    %c0_i32 = arith.constant 0 : i32
    %c0_i32_0 = arith.constant 0 : i32
    %c0_i32_1 = arith.constant 0 : i32
    return %c0_i32, %c0_i32_0 : i32, i32
  }
  func.func @transform_6(%arg0: i32) -> (i32, i32) {
    %c0_i32 = arith.constant 0 : i32
    %c0_i32_0 = arith.constant 0 : i32
    %c0_i32_1 = arith.constant 0 : i32
    return %c0_i32, %c0_i32_0 : i32, i32
  }
  func.func @transform_7(%arg0: i32) -> (i32, i32) {
    %c0_i32 = arith.constant 0 : i32
    %c0_i32_0 = arith.constant 0 : i32
    %c0_i32_1 = arith.constant 0 : i32
    return %c0_i32, %c0_i32_0 : i32, i32
  }
  func.func @transform_8(%arg0: i32) -> (i32, i32) {
    %c0_i32 = arith.constant 0 : i32
    %c0_i32_0 = arith.constant 0 : i32
    %c0_i32_1 = arith.constant 0 : i32
    return %c0_i32, %c0_i32_0 : i32, i32
  }
  func.func @transform_9(%arg0: i32) -> (i32, i32, i32) {
    %c0_i32 = arith.constant 0 : i32
    %c0_i32_0 = arith.constant 0 : i32
    %c0_i32_1 = arith.constant 0 : i32
    return %arg0, %c0_i32, %c0_i32_0 : i32, i32, i32
  }
}

</mosaic_0001>

<bundles_post_ra>
// kernel: tpu_custom_call.1
= control target key start
LH: loop header
LB: loop body
LE: loop exit
PB: predicated region body
PF: predicated region fallthrough
CT: control target
= control target key end

     0   :  { %s9752_s0 = inlined_call_operand.vmem [shape: f32[2,1,1024], index: 0, kind: input, shape index: {}]   ;;  %s9753_s1 = inlined_call_operand.vmem [shape: f32[32,7], index: 1, kind: input, shape index: {}]   ;;  %s9754_s2 = inlined_call_operand.vmem [shape: f32[32,1], index: 2, kind: input, shape index: {}]   ;;  %s9755_s3 = inlined_call_operand.hbm [shape: f32[64,160], index: 3, kind: input, shape index: {}]   ;;  %s9756_s4 = inlined_call_operand.vmem [shape: f32[64,1], index: 4, kind: input, shape index: {}]   ;;  %s9757_s5 = inlined_call_operand.vmem [shape: f32[32,192], index: 5, kind: input, shape index: {}]   ;;  %s9758_s6 = inlined_call_operand.vmem [shape: f32[32,1], index: 6, kind: input, shape index: {}]   ;;  %s9759_s7 = inlined_call_operand.vmem [shape: f32[32,1], index: 7, kind: input, shape index: {}]   ;;  %s9760_s8 = inlined_call_operand.<no memory space> [shape: f32[1,1], index: 8, kind: input, shape index: {}]   ;;  %s9761_s9 = inlined_call_operand.hbm [shape: f32[2,1,1024], index: 9, kind: output, shape index: {}]  }
   0x1   :  { %v14_v0 = vstv %s9760_s8 }
   0x2   :  { %15 = vst [vmem:[#allocation2] sm:$0x1] %v14_v0 }
   0x3   :  { %16 = vsyncpa [#allocation4], 0 }
   0x4   :  { %17 = vsyncpa [#allocation5], 0 }
   0x5   :  { %19 = vsyncpa [#allocation5 + $0x1], 0  ;;  %s4745_s11 = smov 0   ;;  %s4747_s12 = smov 0  }
   0x6   :  { %s4749_s13 = smov 0   ;;  %s4751_s14 = smov 0  }
   0x7 LB: > { %s4766_s8 = sadd.s32 4294967295, %s4673_s14   ;;  %s4295_s15 = sadd.s32 4294967294, %s4673_s14   ;;  %s4673_s14 = sphi %s4751_s14, %s10653_s14   ;;  %s4669_s13 = sphi %s4749_s13, %s10652_s13   ;;  %s4665_s12 = sphi %s4747_s12, %s10651_s12   ;;  %s4661_s11 = sphi %s4745_s11, %s10650_s11  }
   0x8   : > { %s4770_s16 = sadd.s32 1, %s4673_s14   ;;  %s226_s17 = sadd.s32 1, %s4669_s13 }
   0x9   : > { %s223_s18 = ssub.s32 %s4673_s14, %s4770_s16  ;;  %p236_p0 = scmp.ne.s32.totalorder %s4669_s13, %s4665_s12 }
   0xa   : > { %p224_p1 = scmp.eq.s32.totalorder %s223_s18, 0  ;;  %p237_p2 = scmp.eq.s32.totalorder %s4766_s8, 1 }
   0xb   : > { %p242_p3 = scmp.ne.s32.totalorder %s4665_s12, %s4661_s11  ;;  %p243_p4 = scmp.eq.s32.totalorder %s4295_s15, 1 }
   0xc   : > { %s4781_s19 = scalar_select %p224_p1, %s4669_s13, %s226_s17  }
   0xd   : > { %p4783_p5 = por %p237_p2, %p236_p0  ;;  %p4787_p6 = por %p243_p4, %p242_p3 }
   0xe   : > { %p4296_p7 = scmp.ge.s32.totalorder %s4673_s14, 1  ;;  %p250_p8 = scmp.lt.s32.totalorder %s4673_s14, 3 }
   0xf   : > { %p4485_p9 = scmp.eq.s32.totalorder %s4766_s8, 0  ;;  %s267_s24 = sshll.u32 %s9755_s3, 4  ;;  %s268_s24 = int_to_ptr.hbm [resolvable:$true] %s267_s24 }
  0x10   : > { %p251_p10 = pnand %p4296_p7, %p250_p8  ;;  %s4675_s25 = smov [#allocation3]  }
  0x11   : > { %s269_s26 = sshll.u32 %s4675_s25, 4  ;;  %s4676_s27 = smov 256   ;;  %s270_s26 = int_to_ptr.vmem [resolvable:$true] %s269_s26 }
  0x12   : > { %p4477_p11 = pneg %p251_p10  ;;  %s4677_s28 = smov 16  }
  0x13   : > { %307 = sbr.rel (%p251_p10) target bundleno = 1605 (0x645), region = 56 }
  0x14   : > { %p4478_p12 = pnand %p4485_p9, %p4477_p11 }
  0x16   : > { %4480 = dma.hbm_to_vmem [thread:$0]  (!%p4478_p12), %s268_s24, 2048, %s270_s26, [#allocation4], %s4676_s27, %s4676_s27, %s4677_s28  }
  0x18   : > { %4652 = dma.done.wait (%p4485_p9), [#allocation4], 2048  }
  0x19   : > { %4654 = vsyncadd (%p4485_p9), [#allocation4], 4294965248  ;;  %p343_p13 = scmp.lt.s32.totalorder %s4766_s8, 1  ;;  %v9762_v1 = vmov 0   ;;  %s4679_s18 = smov 3   ;;  %v4680_v6 = vmov 1   ;;  %v397_v45 = vlaneseq }
  0x1a   : > { %4537 = vset.pattern.permute.xlu2 %v9762_v1  ;;  %4538 = vset.pattern.permute.xlu1 %v9762_v1  ;;  %v4833_v11 = vld [vmem:[%s9753_s1] sm:$0xff]  ;;  %v4843_v13 = vld [vmem:[%s9753_s1 + $0x18] sm:$0xff]  ;;  %v4848_v14 = vld [vmem:[%s9753_s1 + $0x10] sm:$0xff]  ;;  %s4681_s28 = smov 2   ;;  %v4683_v15 = vmov 2   ;;  %v4684_v17 = vmov 3  }
  0x1b   : > { %s344_s29 = scalar_select %p343_p13, %s4766_s8, 1  ;;  %4539 = vset.pattern.permute.xlu0 %v4680_v6  ;;  %v4874_v16 = vld [vmem:[%s9753_s1 + $0x8] sm:$0xff]  ;;  %v4686_v19 = vmov 4   ;;  %v4688_v25 = vmov 5   ;;  %v4690_v35 = vmov 6   ;;  %v4992_v46 = vand.u32 127, %v397_v45 }
  0x1c   : > { %s4685_s15 = smov 127   ;;  %v353_v57 = vld [vmem:[%s9754_s2 + $0x8] sm:$0xff]  ;;  %v9764_v59 = vmov 0.0   ;;  %s340_s27 = sand.u32 1, %s4665_s12  }
  0x1d   : > { %s4302_s30 = sshll.u32 %s344_s29, 3  ;;  %s4682_s29 = smov 1   ;;  %10060 = vst [vmem:[#allocation18_spill] sm:$0xff] %v4992_v46  ;;  %v404_v50 = vadd.s32 768, %v4992_v46  ;;  %vm948_vm1 = vcmp.lt.s32.totalorder %v4992_v46, 2  ;;  %v403_v58 = vadd.s32 640, %v4992_v46 }
  0x1e   : > { %s346_s17 = scalar_lea.vmem %s9752_s0, %s4302_s30  ;;  %vm823_vm3 = vcmp.lt.s32.totalorder %v4992_v46, 3  ;;  %vm1069_vm5 = vcmp.lt.s32.totalorder %v4992_v46, 1  ;;  %s4301_s30 = sshll.u32 %s340_s27, 3 }
  0x1f   : > { %v347_v2 = vld [vmem:[%s346_s17] sm:$0xff]  ;;  %s4687_s17 = smov 126   ;;  %v5003_v51 = vand.u32 127, %v404_v50  ;;  %s4448_s10 = sshll.u32 %s4766_s8, 3 }
  0x20   : > { %v4810_v3 = vperm.slane %v347_v2, 4  ;;  %v4812_v4 = vperm.slane %v347_v2, 2  ;;  %v4814_v5 = vperm.slane %v347_v2, 0  ;;  %v4819_v7 = vperm.slane %v347_v2, 5  ;;  %s342_s8 = scalar_lea.vmem [#allocation6], %s4301_s30  ;;  %s4627_s30 = scalar_lea.hbm %s9761_s9, 16 }
  0x21   : > { %v4821_v8 = vperm.slane %v347_v2, 3  ;;  %v4823_v9 = vperm.slane %v347_v2, 1  ;;  %v4828_v10 = vperm.slane %v347_v2, 7  ;;  %v4835_v12 = vperm.slane %v347_v2, 6  ;;  %10062 = vst [vmem:[#allocation20_spill] sm:$0xff] %v5003_v51  ;;  %s4221_s22 = sshll.u32 %s342_s8, 4  ;;  %s4222_s22 = int_to_ptr.vmem [resolvable:$true] %s4221_s22 }
  0x22   : > { %10051 = vst [vmem:[#allocation9_spill] sm:$0xff] %v4810_v3  ;;  %815 = vrot.lane.b32.xlu2 %v4810_v3, %s4679_s18  ;;  %811 = vrot.lane.b32.xlu1 %v4812_v4, %s4679_s18  ;;  %v556_v52 = vadd.s32 4294967294, %v5003_v51  ;;  %v508_v56 = vadd.s32 4294967293, %v5003_v51  ;;  %v604_v62 = vadd.s32 4294967295, %v5003_v51 }
  0x23   : > { %10052 = vst [vmem:[#allocation10_spill] sm:$0xff] %v4812_v4  ;;  %807 = vrot.lane.b32.xlu0 %v4814_v5, %s4679_s18 }
  0x24   : > { %10053 = vst [vmem:[#allocation11_spill] sm:$0xff] %v4814_v5  ;;  %vm564_vm0 = vcmp.ge.s32.totalorder %v556_v52, 0  ;;  %vm516_vm2 = vcmp.ge.s32.totalorder %v508_v56, 0  ;;  %vm612_vm4 = vcmp.ge.s32.totalorder %v604_v62, 0 }
  0x25   : > { %10054 = vst [vmem:[#allocation12_spill] sm:$0xff] %v4819_v7  ;;  %v5021_v60 = vsel %vm564_vm0, 1.0, %v9764_v59 }
  0x26   : > { %10055 = vst [vmem:[#allocation13_spill] sm:$0xff] %v4821_v8 }
  0x27   : > { %10056 = vst [vmem:[#allocation14_spill] sm:$0xff] %v4823_v9 }
  0x28   : > { %10057 = vst [vmem:[#allocation15_spill] sm:$0xff] %v4828_v10 }
  0x29   : > { %10058 = vst [vmem:[#allocation16_spill] sm:$0xff] %v4835_v12 }
  0x2a   : > { %817 = vrot.lane.b32.xlu2 %v4819_v7, %s4679_s18  ;;  %813 = vrot.lane.b32.xlu1 %v4821_v8, %s4679_s18  ;;  %10065 = vst [vmem:[#allocation23_spill] sm:$0xff] %v5021_v60 }
  0x2b   : > { %809 = vrot.lane.b32.xlu0 %v4823_v9, %s4679_s18 }
  0x32   : > { %842 = vperm.xlu2 %4537, %v4833_v11   ;;  %821 = vrot.lane.b32.xlu1 %v4828_v10, %s4679_s18 }
  0x33   : > { %819 = vrot.lane.b32.xlu0 %v4835_v12, %s4679_s18  ;;  %s4689_s18 = smov 125  }
  0x3a   : > { %857 = vperm.xlu2 %4537, %v4843_v13   ;;  %852 = vperm.xlu1 %4538, %v4848_v14  }
  0x3b   : > { %936 = vrot.lane.b32.xlu0 %v4812_v4, %s4681_s28 }
  0x42   : > { %934 = vrot.lane.b32.xlu2 %v4823_v9, %s4681_s28  ;;  %932 = vrot.lane.b32.xlu1 %v4814_v5, %s4681_s28 }
  0x43   : > { %942 = vrot.lane.b32.xlu0 %v4819_v7, %s4681_s28  ;;  %4541 = vset.pattern.permute.xlu2 %v4680_v6 }
  0x44   : > { %4540 = vset.pattern.permute.xlu1 %v4680_v6 }
  0x4a   : > { %940 = vrot.lane.b32.xlu2 %v4810_v3, %s4681_s28  ;;  %938 = vrot.lane.b32.xlu1 %v4821_v8, %s4681_s28 }
  0x4b   : > { %966 = vperm.xlu0 %4539, %v4833_v11  }
  0x52   : > { %946 = vrot.lane.b32.xlu2 %v4828_v10, %s4681_s28  ;;  %944 = vrot.lane.b32.xlu1 %v4835_v12, %s4681_s28 }
  0x53   : > { %1055 = vrot.lane.b32.xlu0 %v4823_v9, %s4682_s29 }
  0x54   : > { %4544 = vset.pattern.permute.xlu0 %v4683_v15 }
  0x5a   : > { %974 = vperm.xlu2 %4541, %v4848_v14   ;;  %970 = vperm.xlu1 %4540, %v4874_v16  }
  0x5b   : > { %1061 = vrot.lane.b32.xlu0 %v4810_v3, %s4682_s29 }
  0x62   : > { %1053 = vrot.lane.b32.xlu2 %v4814_v5, %s4682_s29  ;;  %978 = vperm.xlu1 %4540, %v4843_v13  }
  0x63   : > { %1067 = vrot.lane.b32.xlu0 %v4828_v10, %s4682_s29  ;;  %4543 = vset.pattern.permute.xlu2 %v4683_v15 }
  0x6a   : > { %1059 = vrot.lane.b32.xlu2 %v4821_v8, %s4682_s29  ;;  %1057 = vrot.lane.b32.xlu1 %v4812_v4, %s4682_s29 }
  0x6b   : > { %1095 = vperm.xlu0 %4544, %v4848_v14   ;;  %4542 = vset.pattern.permute.xlu1 %v4683_v15  ;;  %v4309_v15 = vsel %vm516_vm2, 1.0, %v9764_v59 }
  0x72   : > { %1065 = vrot.lane.b32.xlu2 %v4835_v12, %s4682_s29  ;;  %1063 = vrot.lane.b32.xlu1 %v4819_v7, %s4682_s29 }
  0x73   : > { %4547 = vset.pattern.permute.xlu0 %v4684_v17 }
  0x74   : > { %1187 = vperm.xlu0 %4547, %v4843_v13  }
  0x7a   : > { %1091 = vperm.xlu2 %4543, %v4874_v16   ;;  %1087 = vperm.xlu1 %4542, %v4833_v11  }
  0x7c   : > { %1262 = vrot.lane.b32.xlu0 %v4810_v3, %s4685_s15  ;;  %v4899_v18 = vpop.permute.xlu2 %815 }
  0x7d   : > { %4550 = vset.pattern.permute.xlu0 %v4686_v19 }
  0x82   : > { %4545 = vset.pattern.permute.xlu2 %v4684_v17  ;;  %1099 = vperm.xlu1 %4542, %v4843_v13  }
  0x83   : > { %1175 = vperm.xlu2 %4545, %v4833_v11  }
  0x84   : > { %1268 = vrot.lane.b32.xlu0 %v4828_v10, %s4685_s15  ;;  %v4905_v20 = vpop.permute.xlu2 %817 }
  0x8a   : > { %4546 = vset.pattern.permute.xlu1 %v4684_v17 }
  0x8b   : > { %1183 = vperm.xlu2 %4545, %v4848_v14   ;;  %1179 = vperm.xlu1 %4546, %v4874_v16  }
  0x8c   : > { %1296 = vperm.xlu0 %4550, %v4848_v14   ;;  %v4910_v21 = vpop.permute.xlu2 %842 }
  0x93   : > { %1256 = vrot.lane.b32.xlu2 %v4823_v9, %s4685_s15  ;;  %1254 = vrot.lane.b32.xlu1 %v4814_v5, %s4685_s15 }
  0x94   : > { %1381 = vrot.lane.b32.xlu0 %v4821_v8, %s4687_s17  ;;  %v4918_v22 = vpop.permute.xlu2 %857  ;;  %v4920_v23 = vpop.permute.xlu1 %811  ;;  %4549 = vset.pattern.permute.xlu2 %v4686_v19 }
  0x95   : > { %v4922_v24 = vpop.permute.xlu0 %807  ;;  %4552 = vset.pattern.permute.xlu0 %v4688_v25  ;;  %4548 = vset.pattern.permute.xlu1 %v4686_v19  ;;  %v401_v19 = vadd.s32 384, %v4992_v46 }
  0x9b   : > { %1260 = vrot.lane.b32.xlu2 %v4821_v8, %s4685_s15  ;;  %1258 = vrot.lane.b32.xlu1 %v4812_v4, %s4685_s15 }
  0x9c   : > { %1387 = vrot.lane.b32.xlu0 %v4835_v12, %s4687_s17  ;;  %v4930_v26 = vpop.permute.xlu1 %813  ;;  %v4932_v27 = vpop.permute.xlu2 %934 }
  0x9d   : > { %v4934_v28 = vpop.permute.xlu0 %809 }
  0xa3   : > { %1266 = vrot.lane.b32.xlu2 %v4835_v12, %s4685_s15  ;;  %1264 = vrot.lane.b32.xlu1 %v4819_v7, %s4685_s15 }
  0xa4   : > { %1413 = vperm.xlu0 %4552, %v4874_v16   ;;  %v4941_v29 = vpop.permute.xlu1 %821  ;;  %v4943_v30 = vpop.permute.xlu2 %940 }
  0xa5   : > { %v4945_v31 = vpop.permute.xlu0 %819 }
  0xa6   : > { %v825_v17 = vsel %vm823_vm3, %v4905_v20, %v4945_v31 }
  0xa7   : > { %v838_v45 = vmul.f32 %v4309_v15, %v825_v17 }
  0xab   : > { %1292 = vperm.xlu2 %4549, %v4874_v16   ;;  %1288 = vperm.xlu1 %4548, %v4833_v11  }
  0xac   : > { %1500 = vrot.lane.b32.xlu0 %v4812_v4, %s4689_s18  ;;  %v4951_v32 = vpop.permute.xlu1 %852  ;;  %v4953_v33 = vpop.permute.xlu2 %946 }
  0xad   : > { %v4955_v34 = vpop.permute.xlu0 %936  ;;  %4554 = vset.pattern.permute.xlu0 %v4690_v35 }
  0xb3   : > { %1375 = vrot.lane.b32.xlu2 %v4814_v5, %s4687_s17  ;;  %1300 = vperm.xlu1 %4548, %v4843_v13  }
  0xb4   : > { %1506 = vrot.lane.b32.xlu0 %v4819_v7, %s4689_s18  ;;  %v4962_v36 = vpop.permute.xlu2 %974  ;;  %v4964_v37 = vpop.permute.xlu1 %932  ;;  %4551 = vset.pattern.permute.xlu2 %v4688_v25 }
  0xb5   : > { %v4966_v38 = vpop.permute.xlu0 %942 }
  0xbb   : > { %1379 = vrot.lane.b32.xlu2 %v4812_v4, %s4687_s17  ;;  %1377 = vrot.lane.b32.xlu1 %v4823_v9, %s4687_s17 }
  0xbc   : > { %1530 = vperm.xlu0 %4554, %v4833_v11   ;;  %v4973_v39 = vpop.permute.xlu1 %938  ;;  %v4975_v40 = vpop.permute.xlu2 %1053  ;;  %4553 = vset.pattern.permute.xlu1 %v4688_v25  ;;  %v402_v25 = vadd.s32 512, %v4992_v46 }
  0xbd   : > { %v4977_v41 = vpop.permute.xlu0 %966 }
  0xbe   : > { %10059 = vst [vmem:[#allocation17_spill] sm:$0xff] %v4977_v41 }
  0xc3   : > { %1385 = vrot.lane.b32.xlu2 %v4819_v7, %s4687_s17  ;;  %1383 = vrot.lane.b32.xlu1 %v4810_v3, %s4687_s17 }
  0xc4   : > { %4555 = vset.pattern.permute.xlu0 %v9762_v1  ;;  %v4984_v42 = vpop.permute.xlu1 %944  ;;  %v4986_v43 = vpop.permute.xlu2 %1059 }
  0xc5   : > { %847 = vperm.xlu0 %4555, %v4874_v16   ;;  %v4989_v44 = vpop.permute.xlu0 %1055  ;;  %v950_v61 = vsel %vm948_vm1, %v4966_v38, %v4984_v42 }
  0xc6   : > { %v963_v6 = vmul.f32 %v5021_v60, %v950_v61  ;;  %v5060_v61 = vand.u32 127, %v401_v19  ;;  %v399_v19 = vadd.s32 128, %v4992_v46 }
  0xc8   : > { %v5050_v50 = vperm.slane %v963_v6, 0  ;;  %10072 = vst [vmem:[#allocation30_spill] sm:$0xff] %v5060_v61  ;;  %v5067_v6 = vand.u32 127, %v402_v25 }
  0xca   : > { %10070 = vst [vmem:[#allocation28_spill] sm:$0xff] %v5050_v50  ;;  %v1011_v60 = vmul.f32 %v5050_v50, %v4962_v36 }
  0xcb   : > { %1409 = vperm.xlu2 %4551, %v4833_v11   ;;  %1389 = vrot.lane.b32.xlu1 %v4828_v10, %s4687_s17  ;;  %v5040_v11 = vand.u32 127, %v403_v58  ;;  %10074 = vst [vmem:[#allocation32_spill] sm:$0xff] %v5067_v6 }
  0xcc   : > { %v4996_v47 = vpop.permute.xlu1 %970  ;;  %v4998_v48 = vpop.permute.xlu2 %1065 }
  0xcd   : > { %10061 = vst [vmem:[#allocation19_spill] sm:$0xff] %v4996_v47  ;;  %v5000_v49 = vpop.permute.xlu0 %1061  ;;  %1624 = vperm.xlu0 %4555, %v353_v57   ;;  %v507_v52 = vadd.s32 4294967293, %v5040_v11  ;;  %v603_v56 = vadd.s32 4294967295, %v5040_v11  ;;  %v5055_v57 = vsel %vm612_vm4, 1.0, %v9764_v59  ;;  %v651_v58 = vadd.s32 1, %v5040_v11 }
  0xce   : > { %10069 = vst [vmem:[#allocation27_spill] sm:$0xff] %v5040_v11  ;;  %v5078_v59 = vperm.slane %v838_v45, 0  ;;  %v506_v45 = vadd.s32 4294967293, %v5067_v6 }
  0xcf   : > { %10071 = vst [vmem:[#allocation29_spill] sm:$0xff] %v5055_v57  ;;  %vm515_vm6 = vcmp.ge.s32.totalorder %v507_v52, 0  ;;  %vm611_vm7 = vcmp.ge.s32.totalorder %v603_v56, 0  ;;  %vm667_vm8 = vcmp.lt.s32.totalorder %v651_v58, 128  ;;  %v5095_v52 = vand.u32 127, %v399_v19 }
  0xd0   : > { %10077 = vst [vmem:[#allocation35_spill] sm:$0xff] %v5078_v59  ;;  %v890_v4 = vmul.f32 %v5078_v59, %v4951_v32  ;;  %vm514_vm10 = vcmp.ge.s32.totalorder %v506_v45, 0 }
  0xd1   : > { %10080 = vst [vmem:[#allocation38_spill] sm:$0xff] %v5095_v52  ;;  %v503_v58 = vadd.s32 4294967293, %v5095_v52 }
  0xd3   : > { %1421 = vperm.xlu2 %4551, %v4843_v13   ;;  %1417 = vperm.xlu1 %4553, %v4848_v14   ;;  %vm511_vm2 = vcmp.ge.s32.totalorder %v503_v58, 0 }
  0xd4   : > { %v5008_v53 = vpop.permute.xlu1 %978  ;;  %v5010_v54 = vpop.permute.xlu2 %1091 }
  0xd5   : > { %10063 = vst [vmem:[#allocation21_spill] sm:$0xff] %v5008_v53  ;;  %v5012_v55 = vpop.permute.xlu0 %1067 }
  0xd6   : > { %10064 = vst [vmem:[#allocation22_spill] sm:$0xff] %v5010_v54 }
  0xdb   : > { %1498 = vrot.lane.b32.xlu2 %v4823_v9, %s4689_s18  ;;  %1496 = vrot.lane.b32.xlu1 %v4814_v5, %s4689_s18  ;;  %v602_v9 = vadd.s32 4294967295, %v5067_v6  ;;  %v10081_v5 = vmov 0.0  }
  0xdc   : > { %v5032_v63 = vpop.permute.xlu1 %1057  ;;  %4557 = vset.pattern.permute.xlu2 %v4690_v35  ;;  %4556 = vset.pattern.permute.xlu1 %v4690_v35  ;;  %v400_v35 = vadd.s32 256, %v4992_v46  ;;  %v4308_v54 = vsel %vm515_vm6, 1.0, %v10081_v5  ;;  %v5110_v19 = vsel %vm667_vm8, 1.0, %v10081_v5 }
  0xdd   : > { %10066 = vst [vmem:[#allocation24_spill] sm:$0xff] %v5032_v63  ;;  %v5034_v0 = vpop.permute.xlu0 %1095  ;;  %v5036_v2 = vpop.permute.xlu2 %1175  ;;  %v5106_v63 = vsel %vm611_vm7, 1.0, %v10081_v5  ;;  %vm610_vm12 = vcmp.ge.s32.totalorder %v602_v9, 0 }
  0xde   : > { %10067 = vst [vmem:[#allocation25_spill] sm:$0xff] %v5034_v0  ;;  %v5069_v15 = vand.u32 127, %v400_v35  ;;  %v505_v35 = vadd.s32 4294967293, %v5060_v61 }
  0xdf   : > { %10068 = vst [vmem:[#allocation26_spill] sm:$0xff] %v5036_v2 }
  0xe0   : > { %10075 = vst [vmem:[#allocation33_spill] sm:$0xff] %v5069_v15  ;;  %vm513_vm9 = vcmp.ge.s32.totalorder %v505_v35, 0  ;;  %v599_v35 = vadd.s32 4294967295, %v5095_v52 }
  0xe1   : > { %10082 = vst [vmem:[#allocation39_spill] sm:$0xff] %v5106_v63 }
  0xe2   : > { %10083 = vst [vmem:[#allocation40_spill] sm:$0xff] %v5110_v19  ;;  %v5141_v19 = vsel %vm610_vm12, 1.0, %v10081_v5  ;;  %vm607_vm4 = vcmp.ge.s32.totalorder %v599_v35, 0 }
  0xe3   : > { %1504 = vrot.lane.b32.xlu2 %v4810_v3, %s4689_s18  ;;  %1502 = vrot.lane.b32.xlu1 %v4821_v8, %s4689_s18  ;;  %v601_v8 = vadd.s32 4294967295, %v5060_v61  ;;  %10089 = vst [vmem:[#allocation46_spill] sm:$0xff] %v5141_v19 }
  0xe4   : > { %v5065_v62 = vpop.permute.xlu1 %1063 }
  0xe5   : > { %10073 = vst [vmem:[#allocation31_spill] sm:$0xff] %v5065_v62  ;;  %v1071_v17 = vsel %vm1069_vm5, %v5065_v62, %v4998_v48  ;;  %v5075_v1 = vpop.permute.xlu2 %1183  ;;  %v405_v62 = vadd.s32 896, %v4992_v46  ;;  %vm609_vm11 = vcmp.ge.s32.totalorder %v601_v8, 0  ;;  %v5130_v8 = vsel %vm513_vm9, 1.0, %v10081_v5 }
  0xe6   : > { %10076 = vst [vmem:[#allocation34_spill] sm:$0xff] %v5075_v1  ;;  %v1084_v7 = vmul.f32 %v5055_v57, %v1071_v17  ;;  %v5083_v25 = vpop.permute.xlu0 %1187  ;;  %v504_v17 = vadd.s32 4294967293, %v5069_v15  ;;  %v649_v57 = vadd.s32 1, %v5060_v61  ;;  %v5138_v45 = vsel %vm609_vm11, 1.0, %v10081_v5 }
  0xe7   : > { %10078 = vst [vmem:[#allocation36_spill] sm:$0xff] %v5083_v25  ;;  %v1043_v25 = vadd.f32 %v1011_v60, %v890_v4  ;;  %v5132_v9 = vand.u32 127, %v405_v62  ;;  %v502_v62 = vadd.s32 4294967293, %v4992_v46 }
  0xe8   : > { %v5088_v3 = vperm.slane %v1084_v7, 0  ;;  %v650_v7 = vadd.s32 1, %v5067_v6  ;;  %vm665_vm13 = vcmp.lt.s32.totalorder %v649_v57, 128  ;;  %vm512_vm14 = vcmp.ge.s32.totalorder %v504_v17, 0  ;;  %10088 = vst [vmem:[#allocation45_spill] sm:$0xff] %v5138_v45 }
  0xe9   : > { %10087 = vst [vmem:[#allocation44_spill] sm:$0xff] %v5132_v9  ;;  %v5135_v57 = vsel %vm514_vm10, 1.0, %v10081_v5  ;;  %v605_v63 = vadd.s32 4294967295, %v5132_v9  ;;  %v652_v45 = vadd.s32 1, %v5003_v51  ;;  %vm510_vm8 = vcmp.ge.s32.totalorder %v502_v62, 0 }
  0xea   : > { %10079 = vst [vmem:[#allocation37_spill] sm:$0xff] %v5088_v3  ;;  %v1132_v2 = vmul.f32 %v5088_v3, %v5034_v0  ;;  %vm666_vm15 = vcmp.lt.s32.totalorder %v650_v7, 128  ;;  %v509_v0 = vadd.s32 4294967293, %v5132_v9 }
  0xeb   : > { %1510 = vrot.lane.b32.xlu2 %v4828_v10, %s4689_s18  ;;  %1508 = vrot.lane.b32.xlu1 %v4835_v12, %s4689_s18  ;;  %v600_v10 = vadd.s32 4294967295, %v5069_v15  ;;  %vm613_vm10 = vcmp.ge.s32.totalorder %v605_v63, 0  ;;  %vm668_vm11 = vcmp.lt.s32.totalorder %v652_v45, 128  ;;  %v10103_v63 = vmov 0   ;;  %s4219_s18 = scalar_lea.hbm %s9761_s9, %s4448_s10 }
  0xec   : > { %v5112_v4 = vadd.f32 %v1132_v2, %v1043_v25  ;;  %v5116_v60 = vpop.permute.xlu1 %1087  ;;  %v826_v25 = vsel %vm823_vm3, %v4899_v18, %v4905_v20  ;;  %v647_v20 = vadd.s32 1, %v5095_v52  ;;  %vm517_vm9 = vcmp.ge.s32.totalorder %v509_v0, 0  ;;  %s4223_s23 = sshll.u32 %s4219_s18, 4  ;;  %s4224_s23 = int_to_ptr.hbm [resolvable:$true] %s4223_s23 }
  0xed   : > { %10084 = vst [vmem:[#allocation41_spill] sm:$0xff] %v5116_v60  ;;  %v5119_v56 = vpop.permute.xlu2 %1256  ;;  %vm608_vm0 = vcmp.ge.s32.totalorder %v600_v10, 0  ;;  %v837_v7 = vmul.f32 %v4308_v54, %v826_v25  ;;  %v5150_v60 = vsel %vm666_vm15, 1.0, %v10081_v5  ;;  %v4305_v10 = vsel %vm512_vm14, 1.0, %v10081_v5  ;;  %s4621_s24 = sshra.s32 %s4224_s23, 4  ;;  %s4622_s24 = int_to_ptr.hbm [resolvable:$true] %s4621_s24 }
  0xee   : > { %10085 = vst [vmem:[#allocation42_spill] sm:$0xff] %v5119_v56  ;;  %v5123_v2 = vpop.permute.xlu0 %1262  ;;  %v648_v56 = vadd.s32 1, %v5069_v15  ;;  %v5161_v54 = vsel %vm608_vm0, 1.0, %v10081_v5  ;;  %v653_v25 = vadd.s32 1, %v5132_v9  ;;  %vm663_vm7 = vcmp.lt.s32.totalorder %v647_v20, 128  ;;  %p4628_p3 = scmp.lt.s32.totalorder %s4622_s24, %s9761_s9 }
  0xef   : > { %10086 = vst [vmem:[#allocation43_spill] sm:$0xff] %v5123_v2  ;;  %v5145_v2 = vsel %vm665_vm13, 1.0, %v10081_v5  ;;  %v5172_v17 = vperm.slane %v837_v7, 0  ;;  %v551_v7 = vadd.s32 4294967294, %v5095_v52  ;;  %v5189_v35 = vsel %vm663_vm7, 1.0, %v10081_v5 }
  0xf0   : > { %10090 = vst [vmem:[#allocation47_spill] sm:$0xff] %v5145_v2  ;;  %v1019_v2 = vmul.f32 %v5050_v50, %v5008_v53  ;;  %vm664_vm6 = vcmp.lt.s32.totalorder %v648_v56, 128  ;;  %v898_v50 = vmul.f32 %v5078_v59, %v4918_v22  ;;  %v5178_v53 = vsel %vm607_vm4, 1.0, %v10081_v5 }
  0xf1   : > { %10091 = vst [vmem:[#allocation48_spill] sm:$0xff] %v5150_v60  ;;  %vm669_vm12 = vcmp.lt.s32.totalorder %v653_v25, 128  ;;  %v5202_v52 = vmul.f32 %v5172_v17, %v4910_v21  ;;  %v4303_v20 = vsel %vm510_vm8, 1.0, %v10081_v5  ;;  %v5210_v56 = vsel %vm613_vm10, 1.0, %v10081_v5 }
  0xf2   : > { %10092 = vst [vmem:[#allocation49_spill] sm:$0xff] %v5161_v54  ;;  %v4304_v54 = vsel %vm511_vm2, 1.0, %v10081_v5  ;;  %v1051_v19 = vadd.f32 %v1019_v2, %v898_v50  ;;  %v352_v50 = vld [vmem:[%s9754_s2] sm:$0xff]  ;;  %v5222_v62 = vsel %vm668_vm11, 1.0, %v10081_v5  ;;  %v5226_v0 = vsel %vm669_vm12, 1.0, %v10081_v5 }
  0xf3   : > { %1538 = vperm.xlu2 %4557, %v4848_v14   ;;  %1534 = vperm.xlu1 %4556, %v4874_v16   ;;  %v552_v14 = vadd.s32 4294967294, %v5069_v15  ;;  %10095 = vst [vmem:[#allocation52_spill] sm:$0xff] %v5172_v17  ;;  %v550_v15 = vadd.s32 4294967294, %v4992_v46  ;;  %vm559_vm15 = vcmp.ge.s32.totalorder %v551_v7, 0  ;;  %v553_v45 = vadd.s32 4294967294, %v5060_v61 }
  0xf4   : > { %v5165_v60 = vpop.permute.xlu1 %1099  ;;  %10096 = vst [vmem:[#allocation53_spill] sm:$0xff] %v5178_v53  ;;  %vm1270_vm2 = vcmp.lt.s32.totalorder %v4992_v46, 127  ;;  %vm1391_vm10 = vcmp.lt.s32.totalorder %v4992_v46, 126 }
  0xf5   : > { %10093 = vst [vmem:[#allocation50_spill] sm:$0xff] %v5165_v60  ;;  %v5170_v51 = vpop.permute.xlu2 %1260  ;;  %v1140_v16 = vmul.f32 %v5088_v3, %v5165_v60  ;;  %v5193_v3 = vsel %vm664_vm6, 1.0, %v10081_v5  ;;  %vm560_vm13 = vcmp.ge.s32.totalorder %v552_v14, 0  ;;  %v828_v14 = vsel %vm823_vm3, %v4920_v23, %v4930_v26 }
  0xf6   : > { %10094 = vst [vmem:[#allocation51_spill] sm:$0xff] %v5170_v51  ;;  %v555_v51 = vadd.s32 4294967294, %v5040_v11  ;;  %v5185_v58 = vpop.permute.xlu0 %1268  ;;  %vm558_vm14 = vcmp.ge.s32.totalorder %v550_v15, 0  ;;  %v824_v15 = vsel %vm823_vm3, %v4945_v31, %v4941_v29  ;;  %vm561_vm4 = vcmp.ge.s32.totalorder %v553_v45, 0 }
  0xf7   : > { %10097 = vst [vmem:[#allocation54_spill] sm:$0xff] %v5185_v58  ;;  %v5198_v2 = vadd.f32 %v1140_v16, %v1051_v19  ;;  %v827_v19 = vsel %vm823_vm3, %v4930_v26, %v4899_v18  ;;  %v5230_v16 = vsel %vm560_vm13, 1.0, %v10081_v5  ;;  %v829_v18 = vsel %vm823_vm3, %v4934_v28, %v4920_v23 }
  0xf8   : > { %10098 = vst [vmem:[#allocation55_spill] sm:$0xff] %v5189_v35  ;;  %v4310_v35 = vsel %vm517_vm9, 1.0, %v10081_v5  ;;  %vm563_vm0 = vcmp.ge.s32.totalorder %v555_v51, 0  ;;  %v830_v26 = vsel %vm823_vm3, %v4922_v24, %v4934_v28  ;;  %v5256_v28 = vmul.f32 %v5172_v17, %v4918_v22 }
  0xf9   : > { %10099 = vst [vmem:[#allocation56_spill] sm:$0xff] %v5193_v3  ;;  %v5260_v61 = vsel %vm558_vm14, 1.0, %v10081_v5 }
  0xfa   : > { %10100 = vst [vmem:[#allocation57_spill] sm:$0xff] %v5210_v56 }
  0xfb   : > { %10101 = vst [vmem:[#allocation58_spill] sm:$0xff] %v5222_v62  ;;  %4558 = vset.pattern.permute.xlu2 %v10103_v63  ;;  %1542 = vperm.xlu1 %4556, %v4843_v13   ;;  %v835_v13 = vmul.f32 %v5130_v8, %v828_v14  ;;  %v1212_v8 = vmul.f32 %v5075_v1, %v4835_v12 }
  0xfc   : > { %10102 = vst [vmem:[#allocation59_spill] sm:$0xff] %v5226_v0  ;;  %1619 = vperm.xlu2 %4558, %v352_v50   ;;  %v836_v50 = vmul.f32 %v5135_v57, %v827_v19  ;;  %v554_v0 = vadd.s32 4294967294, %v5067_v6  ;;  %v833_v57 = vmul.f32 %v4304_v54, %v830_v26  ;;  %v834_v19 = vmul.f32 %v4305_v10, %v829_v18 }
  0xfd   : > { %10104 = vst [vmem:[#allocation60_spill] sm:$0xff] %v5230_v16  ;;  %v5243_v25 = vpop.permute.xlu2 %1266  ;;  %v5245_v3 = vpop.permute.xlu1 %1179  ;;  %v831_v14 = vsel %vm823_vm3, %v4941_v29, %v4922_v24  ;;  %v5271_v6 = vsel %vm559_vm15, 1.0, %v10081_v5  ;;  %v355_v24 = vld [vmem:[%s9754_s2 + $0x18] sm:$0xff]  ;;  %v5286_v54 = vperm.slane %v835_v13, 0  ;;  %v954_v29 = vsel %vm948_vm1, %v4932_v27, %v4955_v34 }
  0xfe   : > { %10105 = vst [vmem:[#allocation61_spill] sm:$0xff] %v5243_v25  ;;  %v1271_v23 = vsel %vm1270_vm2, %v5243_v25, %v5185_v58  ;;  %v5288_v7 = vperm.slane %v836_v50, 0  ;;  %vm562_vm3 = vcmp.ge.s32.totalorder %v554_v0, 0  ;;  %v5294_v31 = vpop.permute.xlu0 %1296  ;;  %v832_v51 = vmul.f32 %v4303_v20, %v831_v14 }
  0xff   : > { %10106 = vst [vmem:[#allocation62_spill] sm:$0xff] %v5245_v3  ;;  %v1285_v3 = vmul.f32 %v5222_v62, %v1271_v23  ;;  %v5279_v23 = vsel %vm563_vm0, 1.0, %v10081_v5  ;;  %v557_v18 = vadd.s32 4294967294, %v5132_v9  ;;  %v1244_v26 = vadd.f32 %v1212_v8, %v5112_v4 }
 0x100   : > { %10107 = vst [vmem:[#allocation63_spill] sm:$0xff] %v5260_v61  ;;  %v5303_v50 = vperm.slane %v833_v57, 0  ;;  %v5305_v62 = vperm.slane %v834_v19, 0  ;;  %v839_v25 = vmul.f32 %v4310_v35, %v824_v15  ;;  %v956_v0 = vsel %vm948_vm1, %v4953_v33, %v4964_v37 }
 0x101   : > { %10108 = vst [vmem:[#allocation64_spill] sm:$0xff] %v5271_v6  ;;  %v5281_v10 = vperm.slane %v1285_v3, 0  ;;  %v354_v3 = vld [vmem:[%s9754_s2 + $0x10] sm:$0xff]  ;;  %v959_v20 = vmul.f32 %v5230_v16, %v954_v29  ;;  %v5315_v4 = vsel %vm561_vm4, 1.0, %v10081_v5  ;;  %v5318_v8 = vsel %vm562_vm3, 1.0, %v10081_v5 }
 0x102   : > { %10109 = vst [vmem:[#allocation65_spill] sm:$0xff] %v5279_v23  ;;  %v5332_v14 = vmul.f32 %v5288_v7, %v4910_v21  ;;  %v5336_v45 = vmul.f32 %v5286_v54, %v4918_v22  ;;  %v955_v15 = vsel %vm948_vm1, %v4964_v37, %v4932_v27  ;;  %v957_v29 = vmul.f32 %v5260_v61, %v956_v0 }
 0x103   : > { %10110 = vst [vmem:[#allocation66_spill] sm:$0xff] %v5281_v10  ;;  %v1333_v13 = vmul.f32 %v5281_v10, %v5294_v31  ;;  %4559 = vset.pattern.permute.xlu1 %v10103_v63  ;;  %v5328_v63 = vmul.f32 %v5286_v54, %v4910_v21  ;;  %vm565_vm6 = vcmp.ge.s32.totalorder %v557_v18, 0  ;;  %v5359_v27 = vmul.f32 %v5305_v62, %v4910_v21 }
 0x104   : > { %10111 = vst [vmem:[#allocation67_spill] sm:$0xff] %v5286_v54  ;;  %1634 = vperm.xlu2 %4558, %v355_v24   ;;  %1629 = vperm.xlu1 %4559, %v354_v3   ;;  %v5342_v24 = vperm.slane %v832_v51, 0  ;;  %v951_v3 = vsel %vm948_vm1, %v4943_v30, %v4966_v38  ;;  %v5361_v37 = vperm.slane %v839_v25, 0  ;;  %v5363_v51 = vperm.slane %v959_v20, 0 }
 0x105   : > { %10112 = vst [vmem:[#allocation68_spill] sm:$0xff] %v5288_v7  ;;  %v5320_v57 = vpop.permute.xlu2 %1292  ;;  %v5322_v35 = vpop.permute.xlu1 %1254  ;;  %v5324_v19 = vadd.f32 %v1333_v13, %v1244_v26  ;;  %v5351_v26 = vmul.f32 %v5288_v7, %v4918_v22  ;;  %v5355_v13 = vmul.f32 %v5303_v50, %v4910_v21  ;;  %v958_v0 = vmul.f32 %v5271_v6, %v955_v15 }
 0x106   : > { %10113 = vst [vmem:[#allocation69_spill] sm:$0xff] %v5294_v31  ;;  %v952_v38 = vsel %vm948_vm1, %v4973_v39, %v4943_v30  ;;  %v953_v18 = vsel %vm948_vm1, %v4955_v34, %v4973_v39  ;;  %v5376_v16 = vmul.f32 %v5303_v50, %v4918_v22  ;;  %v962_v25 = vmul.f32 %v5279_v23, %v951_v3 }
 0x107   : > { %10114 = vst [vmem:[#allocation70_spill] sm:$0xff] %v5303_v50  ;;  %v5380_v20 = vsel %vm565_vm6, 1.0, %v10081_v5  ;;  %v949_v15 = vsel %vm948_vm1, %v4984_v42, %v4953_v33  ;;  %v5388_v30 = vmul.f32 %v5305_v62, %v4918_v22  ;;  %v868_v34 = vmul.f32 %v5342_v24, %v4910_v21 }
 0x108   : > { %10115 = vst [vmem:[#allocation71_spill] sm:$0xff] %v5305_v62  ;;  %v5394_v39 = vmul.f32 %v5342_v24, %v4918_v22  ;;  %v5396_v3 = vperm.slane %v957_v29, 0  ;;  %v5400_v23 = vmul.f32 %v5078_v59, %v4910_v21  ;;  %v960_v6 = vmul.f32 %v5315_v4, %v953_v18 }
 0x109   : > { %10116 = vst [vmem:[#allocation72_spill] sm:$0xff] %v5315_v4  ;;  %v961_v33 = vmul.f32 %v5318_v8, %v952_v38  ;;  %v598_v42 = vadd.s32 4294967295, %v4992_v46  ;;  %v875_v61 = vmul.f32 %v5361_v37, %v4910_v21  ;;  %v5418_v18 = vmul.f32 %v5361_v37, %v4918_v22 }
 0x10a   : > { %10117 = vst [vmem:[#allocation73_spill] sm:$0xff] %v5318_v8  ;;  %v884_v38 = vmul.f32 %v5342_v24, %v4951_v32  ;;  %v885_v21 = vmul.f32 %v5303_v50, %v4951_v32  ;;  %v887_v8 = vmul.f32 %v5286_v54, %v4951_v32  ;;  %v886_v22 = vmul.f32 %v5305_v62, %v4951_v32 }
 0x10b   : > { %10118 = vst [vmem:[#allocation74_spill] sm:$0xff] %v5320_v57  ;;  %v964_v57 = vmul.f32 %v5380_v20, %v949_v15  ;;  %v1005_v15 = vmul.f32 %v5396_v3, %v4962_v36  ;;  %v888_v4 = vmul.f32 %v5288_v7, %v4951_v32  ;;  %v984_v59 = vperm.slane %v960_v6, 0 }
 0x10c   : > { %10119 = vst [vmem:[#allocation75_spill] sm:$0xff] %v5322_v35  ;;  %vm606_vm7 = vcmp.ge.s32.totalorder %v598_v42, 0  ;;  %v891_v50 = vmul.f32 %v5361_v37, %v4951_v32  ;;  %v989_v62 = vmul.f32 %v5396_v3, %v4977_v41  ;;  %vm1512_vm3 = vcmp.lt.s32.totalorder %v4992_v46, 125 }
 0x10d   : > { %10120 = vst [vmem:[#allocation76_spill] sm:$0xff] %v5324_v19  ;;  %v5407_v19 = vperm.slane %v958_v0, 0  ;;  %v5410_v31 = vpop.permute.xlu2 %1375  ;;  %v5412_v29 = vpop.permute.xlu1 %1258  ;;  %v5424_v0 = vperm.slane %v962_v25, 0  ;;  %v5452_v42 = vadd.f32 %v1005_v15, %v884_v38 }
 0x10e   : > { %10121 = vst [vmem:[#allocation77_spill] sm:$0xff] %v5342_v24  ;;  %v985_v24 = vperm.slane %v961_v33, 0  ;;  %v1076_v33 = vsel %vm1069_vm5, %v4975_v40, %v4989_v44 }
 0x10f   : > { %10122 = vst [vmem:[#allocation78_spill] sm:$0xff] %v5361_v37  ;;  %v1006_v25 = vmul.f32 %v5407_v19, %v4962_v36  ;;  %v1010_v54 = vmul.f32 %v5424_v0, %v4962_v36  ;;  %v990_v6 = vmul.f32 %v5407_v19, %v4977_v41  ;;  %v992_v37 = vmul.f32 %v984_v59, %v4977_v41 }
 0x110   : > { %10123 = vst [vmem:[#allocation79_spill] sm:$0xff] %v5380_v20  ;;  %v889_v20 = vmul.f32 %v5172_v17, %v4951_v32  ;;  %v991_v32 = vmul.f32 %v5363_v51, %v4977_v41  ;;  %v1009_v7 = vmul.f32 %v985_v24, %v4962_v36  ;;  %v993_v9 = vmul.f32 %v985_v24, %v4977_v41 }
 0x111   : > { %10124 = vst [vmem:[#allocation80_spill] sm:$0xff] %v5400_v23  ;;  %v1007_v23 = vmul.f32 %v5363_v51, %v4962_v36  ;;  %v5467_v38 = vadd.f32 %v1006_v25, %v885_v21  ;;  %v1079_v58 = vmul.f32 %v5178_v53, %v1076_v33  ;;  %v5485_v21 = vadd.f32 %v990_v6, %v5355_v13 }
 0x112   : > { %10125 = vst [vmem:[#allocation81_spill] sm:$0xff] %v5410_v31  ;;  %v988_v31 = vperm.slane %v964_v57, 0  ;;  %v5459_v57 = vsel %vm606_vm7, 1.0, %v10081_v5  ;;  %v5474_v60 = vadd.f32 %v1010_v54, %v889_v20  ;;  %v1077_v5 = vsel %vm1069_vm5, %v5012_v55, %v4975_v40 }
 0x113   : > { %10126 = vst [vmem:[#allocation82_spill] sm:$0xff] %v5412_v29  ;;  %v5440_v17 = vadd.f32 %v1007_v23, %v886_v22  ;;  %v994_v23 = vmul.f32 %v5424_v0, %v4977_v41  ;;  %v1008_v22 = vmul.f32 %v984_v59, %v4962_v36  ;;  %v5465_v29 = vpop.permute.xlu0 %1381  ;;  %v1070_v54 = vsel %vm1069_vm5, %v4998_v48, %v5012_v55 }
 0x114   : > { %10128 = vst [vmem:[#allocation84_spill] sm:$0xff] %v5459_v57  ;;  %v996_v15 = vmul.f32 %v988_v31, %v4977_v41  ;;  %v1012_v11 = vmul.f32 %v988_v31, %v4962_v36  ;;  %v1073_v36 = vsel %vm1069_vm5, %v4986_v43, %v5000_v49  ;;  %v5496_v20 = vadd.f32 %v991_v32, %v5359_v27 }
 0x115   : > { %10127 = vst [vmem:[#allocation83_spill] sm:$0xff] %v5440_v17  ;;  %v5472_v35 = vpop.permute.xlu2 %1379  ;;  %v5480_v17 = vpop.permute.xlu1 %1264  ;;  %v5499_v40 = vadd.f32 %v994_v23, %v5202_v52  ;;  %v1041_v13 = vadd.f32 %v1009_v7, %v888_v4  ;;  %v5507_v25 = vadd.f32 %v993_v9, %v5332_v14  ;;  %v5511_v53 = vperm.slane %v1079_v58, 0  ;;  %v10135_v7 = vld [vmem:[#allocation46_spill] sm:$0xff]  ;;  %v10139_v14 = vld [vmem:[#allocation24_spill] sm:$0xff] }
 0x116   : > { %10129 = vst [vmem:[#allocation85_spill] sm:$0xff] %v5465_v29  ;;  %v5482_v29 = vadd.f32 %v989_v62, %v868_v34  ;;  %v5501_v62 = vadd.f32 %v1008_v22, %v887_v8  ;;  %v5504_v34 = vadd.f32 %v992_v37, %v5328_v63  ;;  %v5509_v6 = vadd.f32 %v996_v15, %v875_v61 }
 0x117   : > { %10130 = vst [vmem:[#allocation86_spill] sm:$0xff] %v5472_v35  ;;  %v1044_v33 = vadd.f32 %v1012_v11, %v891_v50  ;;  %v1078_v48 = vmul.f32 %v5459_v57, %v1077_v5  ;;  %v5516_v55 = vmul.f32 %v5396_v3, %v4996_v47  ;;  %v5520_v52 = vmul.f32 %v5407_v19, %v4996_v47  ;;  %v10138_v5 = vld [vmem:[#allocation21_spill] sm:$0xff] }
 0x118   : > { %10131 = vst [vmem:[#allocation87_spill] sm:$0xff] %v5480_v17  ;;  %v1082_v4 = vmul.f32 %v10135_v7, %v1073_v36  ;;  %v1085_v9 = vmul.f32 %v5210_v56, %v1070_v54  ;;  %v5526_v61 = vmul.f32 %v5363_v51, %v4996_v47  ;;  %v5529_v11 = vmul.f32 %v984_v59, %v4996_v47 }
 0x119   : > { %10132 = vst [vmem:[#allocation88_spill] sm:$0xff] %v5501_v62  ;;  %v1013_v58 = vmul.f32 %v5396_v3, %v10138_v5  ;;  %v1014_v50 = vmul.f32 %v5407_v19, %v10138_v5  ;;  %v1016_v8 = vmul.f32 %v984_v59, %v10138_v5  ;;  %v1017_v63 = vmul.f32 %v985_v24, %v10138_v5 }
 0x11a   : > { %10133 = vst [vmem:[#allocation89_spill] sm:$0xff] %v5516_v55  ;;  %v1074_v27 = vsel %vm1069_vm5, %v10139_v14, %v4986_v43  ;;  %v1075_v37 = vsel %vm1069_vm5, %v4989_v44, %v10139_v14  ;;  %v5546_v32 = vmul.f32 %v985_v24, %v4996_v47  ;;  %v5550_v19 = vmul.f32 %v5424_v0, %v4996_v47  ;;  %v10143_v44 = vld [vmem:[#allocation31_spill] sm:$0xff]  ;;  %v10147_v14 = vld [vmem:[#allocation49_spill] sm:$0xff] }
 0x11b   : > { %10134 = vst [vmem:[#allocation90_spill] sm:$0xff] %v5520_v52  ;;  %v1020_v59 = vmul.f32 %v988_v31, %v10138_v5  ;;  %v5553_v3 = vperm.slane %v1078_v48, 0  ;;  %v5557_v22 = vperm.slane %v1082_v4, 0  ;;  %v1015_v43 = vmul.f32 %v5363_v51, %v10138_v5  ;;  %v5567_v36 = vpop.permute.xlu0 %1387  ;;  %v10148_v51 = vld [vmem:[#allocation45_spill] sm:$0xff] }
 0x11c   : > { %10136 = vst [vmem:[#allocation91_spill] sm:$0xff] %v5526_v61  ;;  %v5561_v15 = vperm.slane %v1085_v9, 0  ;;  %v1072_v24 = vsel %vm1069_vm5, %v5000_v49, %v10143_v44  ;;  %v5572_v48 = vmul.f32 %v988_v31, %v4996_v47  ;;  %v1018_v4 = vmul.f32 %v5424_v0, %v10138_v5  ;;  %v10150_v31 = vld [vmem:[#allocation39_spill] sm:$0xff]  ;;  %v10151_v47 = vld [vmem:[#allocation25_spill] sm:$0xff] }
 0x11d   : > { %10137 = vst [vmem:[#allocation92_spill] sm:$0xff] %v5529_v11  ;;  %v5555_v23 = vpop.permute.xlu2 %1385  ;;  %v5569_v54 = vpop.permute.xlu1 %1288  ;;  %v1080_v56 = vmul.f32 %v10147_v14, %v1075_v37  ;;  %v1081_v9 = vmul.f32 %v10148_v51, %v1074_v27  ;;  %v5579_v7 = vadd.f32 %v1013_v58, %v5394_v39  ;;  %v5582_v57 = vadd.f32 %v1014_v50, %v5376_v16  ;;  %v10152_v27 = vld [vmem:[#allocation22_spill] sm:$0xff]  ;;  %v10156_v37 = vld [vmem:[#allocation11_spill] sm:$0xff] }
 0x11e   : > { %10140 = vst [vmem:[#allocation21_spill] sm:$0xff] %v5546_v32  ;;  %v5585_v49 = vadd.f32 %v1017_v63, %v5351_v26  ;;  %v5588_v44 = vadd.f32 %v1016_v8, %v5336_v45  ;;  %v1083_v41 = vmul.f32 %v10150_v31, %v1072_v24  ;;  %v1126_v0 = vmul.f32 %v5553_v3, %v10151_v47  ;;  %v10158_v31 = vld [vmem:[#allocation36_spill] sm:$0xff]  ;;  %v10162_v51 = vld [vmem:[#allocation14_spill] sm:$0xff] }
 0x11f   : > { %10141 = vst [vmem:[#allocation24_spill] sm:$0xff] %v5550_v19  ;;  %v5594_v5 = vadd.f32 %v1020_v59, %v5418_v18  ;;  %v5598_v39 = vmul.f32 %v5511_v53, %v10152_v27  ;;  %v1133_v16 = vmul.f32 %v5561_v15, %v10151_v47  ;;  %v1127_v26 = vmul.f32 %v5511_v53, %v10151_v47  ;;  %v10157_v59 = vld [vmem:[#allocation26_spill] sm:$0xff] }
 0x120   : > { %10142 = vst [vmem:[#allocation93_spill] sm:$0xff] %v5555_v23  ;;  %v1130_v45 = vmul.f32 %v5557_v22, %v10151_v47  ;;  %v5607_v58 = vadd.f32 %v1015_v43, %v5388_v30  ;;  %v5609_v50 = vperm.slane %v1080_v56, 0  ;;  %v5611_v18 = vperm.slane %v1081_v9, 0 }
 0x121   : > { %10144 = vst [vmem:[#allocation31_spill] sm:$0xff] %v5567_v36  ;;  %v5615_v8 = vmul.f32 %v5561_v15, %v10152_v27  ;;  %v5618_v63 = vadd.f32 %v1018_v4, %v5256_v28  ;;  %v5622_v24 = vmul.f32 %v10157_v59, %v10156_v37  ;;  %v1220_v14 = vmul.f32 %v10158_v31, %v4835_v12 }
 0x122   : > { %10145 = vst [vmem:[#allocation94_spill] sm:$0xff] %v5569_v54  ;;  %v5628_v56 = vmul.f32 %v5553_v3, %v10152_v27  ;;  %v5632_v30 = vmul.f32 %v5557_v22, %v10152_v27  ;;  %v5634_v43 = vperm.slane %v1083_v41, 0  ;;  %v646_v28 = vadd.s32 1, %v4992_v46  ;;  %v10179_v54 = vld [vmem:[#allocation12_spill] sm:$0xff] }
 0x123   : > { %10146 = vst [vmem:[#allocation95_spill] sm:$0xff] %v5572_v48  ;;  %v1158_v4 = vadd.f32 %v1126_v0, %v5452_v42  ;;  %v1191_v62 = vmul.f32 %v10157_v59, %v10162_v51  ;;  %v1165_v12 = vadd.f32 %v1133_v16, %v1044_v33  ;;  %v1159_v32 = vadd.f32 %v1127_v26, %v5467_v38  ;;  %v10168_v0 = vld [vmem:[#allocation9_spill] sm:$0xff]  ;;  %v10170_v16 = vld [vmem:[#allocation15_spill] sm:$0xff] }
 0x124   : > { %10149 = vst [vmem:[#allocation96_spill] sm:$0xff] %v5585_v49  ;;  %v5643_v49 = vadd.f32 %v1130_v45, %v1041_v13  ;;  %v5655_v42 = vmul.f32 %v5611_v18, %v10152_v27  ;;  %v1128_v33 = vmul.f32 %v5609_v50, %v10151_v47  ;;  %v1194_v38 = vmul.f32 %v10157_v59, %v10168_v0  ;;  %v5661_v13 = vpop.permute.xlu0 %1413 }
 0x125   : > { %10153 = vst [vmem:[#allocation25_spill] sm:$0xff] %v5598_v39  ;;  %v5638_v9 = vpop.permute.xlu2 %1409  ;;  %v5645_v11 = vpop.permute.xlu1 %1300  ;;  %v10165_v39 = vld [vmem:[#allocation13_spill] sm:$0xff]  ;;  %v1197_v26 = vmul.f32 %v10157_v59, %v10170_v16  ;;  %v1252_v45 = vadd.f32 %v1220_v14, %v5198_v2  ;;  %vm662_vm8 = vcmp.lt.s32.totalorder %v646_v28, 128  ;;  %v1206_v52 = vmul.f32 %v5075_v1, %v10156_v37 }
 0x126   : > { %10154 = vst [vmem:[#allocation97_spill] sm:$0xff] %v5615_v8  ;;  %v1193_v41 = vmul.f32 %v10157_v59, %v10165_v39  ;;  %v1213_v8 = vmul.f32 %v5075_v1, %v10170_v16  ;;  %v1207_v2 = vmul.f32 %v5075_v1, %v10162_v51  ;;  %v5686_v48 = vmul.f32 %v5611_v18, %v10151_v47 }
 0x127   : > { %10155 = vst [vmem:[#allocation98_spill] sm:$0xff] %v5618_v63  ;;  %v10176_v23 = vmov 0.0  }
 0x128   : > { %10159 = vst [vmem:[#allocation11_spill] sm:$0xff] %v5628_v56  ;;  %v10174_v56 = vld [vmem:[#allocation83_spill] sm:$0xff]  ;;  %v5719_v17 = vadd.f32 %v1207_v2, %v1159_v32  ;;  %v5735_v32 = vmul.f32 %v10158_v31, %v10165_v39 }
 0x129   : > { %10160 = vst [vmem:[#allocation36_spill] sm:$0xff] %v5632_v30  ;;  %v5651_v30 = vmul.f32 %v5609_v50, %v10152_v27  ;;  %v1160_v28 = vadd.f32 %v1128_v33, %v10174_v56 }
 0x12a   : > { %10161 = vst [vmem:[#allocation99_spill] sm:$0xff] %v5638_v9  ;;  %v5696_v9 = vsel %vm662_vm8, 1.0, %v10176_v23 }
 0x12b   : > { %10163 = vst [vmem:[#allocation14_spill] sm:$0xff] %v5643_v49  ;;  %v1341_v49 = vmul.f32 %v5281_v10, %v5645_v11 }
 0x12c   : > { %10164 = vst [vmem:[#allocation100_spill] sm:$0xff] %v5645_v11 }
 0x12d   : > { %10166 = vst [vmem:[#allocation101_spill] sm:$0xff] %v5651_v30  ;;  %v10171_v30 = vld [vmem:[#allocation10_spill] sm:$0xff]  ;;  %v5682_v10 = vadd.f32 %v1341_v49, %v1252_v45  ;;  %v5700_v49 = vmul.f32 %v5075_v1, %v10168_v0  ;;  %v5707_v45 = vadd.f32 %v1206_v52, %v1158_v4  ;;  %v5713_v35 = vpop.permute.xlu2 %1421  ;;  %v5723_v63 = vpop.permute.xlu1 %1377 }
 0x12e   : > { %10167 = vst [vmem:[#allocation102_spill] sm:$0xff] %v5655_v42  ;;  %v5670_v61 = vmul.f32 %v10157_v59, %v10171_v30  ;;  %v1131_v42 = vmul.f32 %v5634_v43, %v10151_v47  ;;  %v1208_v14 = vmul.f32 %v5075_v1, %v10171_v30 }
 0x12f   : > { %10169 = vst [vmem:[#allocation103_spill] sm:$0xff] %v5661_v13  ;;  %v10175_v13 = vld [vmem:[#allocation41_spill] sm:$0xff] }
 0x130   : > { %10172 = vst [vmem:[#allocation15_spill] sm:$0xff] %v5682_v10  ;;  %v1110_v19 = vmul.f32 %v5553_v3, %v10175_v13  ;;  %v1111_v55 = vmul.f32 %v5511_v53, %v10175_v13  ;;  %v1113_v11 = vmul.f32 %v5611_v18, %v10175_v13  ;;  %v1114_v47 = vmul.f32 %v5557_v22, %v10175_v13 }
 0x131   : > { %10173 = vst [vmem:[#allocation10_spill] sm:$0xff] %v5686_v48  ;;  %v1117_v56 = vmul.f32 %v5561_v15, %v10175_v13  ;;  %v1163_v33 = vadd.f32 %v1131_v42, %v5474_v60  ;;  %v5709_v48 = vadd.f32 %v1213_v8, %v1165_v12  ;;  %v1211_v10 = vmul.f32 %v5075_v1, %v10179_v54 }
 0x132   : > { %10177 = vst [vmem:[#allocation83_spill] sm:$0xff] %v5696_v9  ;;  %v5721_v36 = vadd.f32 %v1208_v14, %v1160_v28  ;;  %v1214_v60 = vmul.f32 %v10158_v31, %v10156_v37  ;;  %v1142_v12 = vadd.f32 %v1110_v19, %v5482_v29  ;;  %v1143_v52 = vadd.f32 %v1111_v55, %v5485_v21  ;;  %v10184_v55 = vld [vmem:[#allocation51_spill] sm:$0xff] }
 0x133   : > { %10178 = vst [vmem:[#allocation104_spill] sm:$0xff] %v5700_v49  ;;  %v5717_v49 = vmul.f32 %v5634_v43, %v10152_v27  ;;  %v1215_v8 = vmul.f32 %v10158_v31, %v10162_v51  ;;  %v1145_v4 = vadd.f32 %v1113_v11, %v5504_v34  ;;  %v1146_v42 = vadd.f32 %v1114_v47, %v5507_v25  ;;  %v10183_v25 = vld [vmem:[#allocation43_spill] sm:$0xff]  ;;  %v10185_v11 = vld [vmem:[#allocation33_spill] sm:$0xff]  ;;  %v10187_v47 = vld [vmem:[#allocation50_spill] sm:$0xff] }
 0x134   : > { %10180 = vst [vmem:[#allocation12_spill] sm:$0xff] %v5735_v32  ;;  %v1149_v2 = vadd.f32 %v1117_v56, %v5509_v6  ;;  %v1112_v14 = vmul.f32 %v5609_v50, %v10175_v13  ;;  %v5740_v28 = vadd.f32 %v1211_v10, %v1163_v33  ;;  %v5744_v29 = vmul.f32 %v10158_v31, %v10168_v0  ;;  %v5757_v10 = vpop.permute.xlu0 %1500 }
 0x135   : > { %v1221_v21 = vmul.f32 %v10158_v31, %v10170_v16  ;;  %v5750_v34 = vmul.f32 %v10158_v31, %v10171_v30  ;;  %v1274_v6 = vsel %vm1270_vm2, %v10184_v55, %v10183_v25  ;;  %v696_v19 = vadd.s32 2, %v10185_v11  ;;  %10186 = vst [vmem:[#allocation43_spill] sm:$0xff] %v5757_v10 }
 0x136   : > { %10181 = vst [vmem:[#allocation105_spill] sm:$0xff] %v5744_v29  ;;  %v1134_v56 = vmul.f32 %v5553_v3, %v10187_v47  ;;  %v1135_v33 = vmul.f32 %v5511_v53, %v10187_v47  ;;  %v5764_v27 = vadd.f32 %v5622_v24, %v1142_v12  ;;  %v5766_v0 = vadd.f32 %v1191_v62, %v1143_v52  ;;  %v10190_v53 = vld [vmem:[#allocation47_spill] sm:$0xff]  ;;  %v5780_v24 = vpop.permute.xlu2 %1498 }
 0x137   : > { %10182 = vst [vmem:[#allocation106_spill] sm:$0xff] %v5750_v34  ;;  %v5768_v29 = vadd.f32 %v1193_v41, %v1145_v4  ;;  %v1141_v1 = vmul.f32 %v5561_v15, %v10187_v47  ;;  %v5772_v32 = vadd.f32 %v1194_v38, %v1146_v42  ;;  %v5774_v34 = vadd.f32 %v1197_v26, %v1149_v2  ;;  %v10191_v38 = vld [vmem:[#allocation42_spill] sm:$0xff]  ;;  %v10192_v26 = vld [vmem:[#allocation75_spill] sm:$0xff]  ;;  %v5794_v4 = vpop.permute.xlu1 %1383  ;;  %v10195_v2 = vld [vmem:[#allocation20_spill] sm:$0xff] }
 0x138   : > { %v1144_v11 = vadd.f32 %v1112_v14, %v5496_v20  ;;  %v1115_v3 = vmul.f32 %v5634_v43, %v10175_v13  ;;  %v1282_v10 = vmul.f32 %v10190_v53, %v1274_v6  ;;  %v1137_v62 = vmul.f32 %v5611_v18, %v10187_v47  ;;  %10193 = vst [vmem:[#allocation42_spill] sm:$0xff] %v5794_v4  ;;  %v10194_v18 = vld [vmem:[#allocation54_spill] sm:$0xff]  ;;  %v10237_v4 = vld [vmem:[#allocation32_spill] sm:$0xff] }
 0x139   : > { %10188 = vst [vmem:[#allocation51_spill] sm:$0xff] %v5768_v29  ;;  %v1195_v41 = vmul.f32 %v10157_v59, %v10179_v54  ;;  %v1219_v15 = vmul.f32 %v10158_v31, %v10179_v54  ;;  %v1277_v20 = vsel %vm1270_vm2, %v10192_v26, %v10191_v38  ;;  %vm712_vm9 = vcmp.lt.s32.totalorder %v696_v19, 128  ;;  %v10204_v53 = vld [vmem:[#allocation82_spill] sm:$0xff] }
 0x13a   : > { %10189 = vst [vmem:[#allocation50_spill] sm:$0xff] %v5772_v32  ;;  %v1166_v12 = vadd.f32 %v1134_v56, %v5579_v7  ;;  %v1167_v52 = vadd.f32 %v1135_v33, %v5582_v57  ;;  %v1278_v42 = vsel %vm1270_vm2, %v10194_v18, %v10192_v26  ;;  %v700_v14 = vadd.s32 2, %v10195_v2  ;;  %v10198_v26 = vld [vmem:[#allocation27_spill] sm:$0xff] }
 0x13b   : > { %v1173_v31 = vadd.f32 %v1141_v1, %v5594_v5  ;;  %v1136_v6 = vmul.f32 %v5609_v50, %v10187_v47  ;;  %v5806_v7 = vadd.f32 %v5670_v61, %v1144_v11  ;;  %v1147_v57 = vadd.f32 %v1115_v3, %v5499_v40  ;;  %v10201_v61 = vld [vmem:[#allocation59_spill] sm:$0xff] }
 0x13c   : > { %v1139_v19 = vmul.f32 %v5634_v43, %v10187_v47  ;;  %v1279_v56 = vmul.f32 %v5696_v9, %v1277_v20  ;;  %v5813_v33 = vsel %vm712_vm9, 1.0, %v10176_v23  ;;  %v699_v1 = vadd.s32 2, %v10198_v26  ;;  %v10224_v32 = vld [vmem:[#allocation87_spill] sm:$0xff] }
 0x13d   : > { %10196 = vst [vmem:[#allocation75_spill] sm:$0xff] %v5806_v7  ;;  %v5818_v5 = vmul.f32 %v5557_v22, %v10187_v47  ;;  %v5820_v50 = vperm.slane %v1282_v10, 0  ;;  %v1286_v11 = vmul.f32 %v10201_v61, %v1278_v42  ;;  %v5823_v18 = vadd.f32 %v1214_v60, %v1166_v12  ;;  %v5839_v10 = vpop.permute.xlu0 %1506  ;;  %v10205_v60 = vld [vmem:[#allocation62_spill] sm:$0xff] }
 0x13e   : > { %10197 = vst [vmem:[#allocation54_spill] sm:$0xff] %v5813_v33  ;;  %v5826_v40 = vadd.f32 %v1137_v62, %v5588_v44  ;;  %v5828_v43 = vadd.f32 %v1215_v8, %v1167_v52  ;;  %vm716_vm11 = vcmp.lt.s32.totalorder %v700_v14, 128  ;;  %v5830_v3 = vadd.f32 %v1221_v21, %v1173_v31  ;;  %v10206_v8 = vld [vmem:[#allocation98_spill] sm:$0xff]  ;;  %v5855_v12 = vpop.permute.xlu2 %1504 }
 0x13f   : > { %10199 = vst [vmem:[#allocation20_spill] sm:$0xff] %v5818_v5  ;;  %v5833_v20 = vadd.f32 %v1136_v6, %v5607_v58  ;;  %v1276_v22 = vsel %vm1270_vm2, %v10191_v38, %v10204_v53  ;;  %v5843_v47 = vmul.f32 %v10205_v60, %v10170_v16  ;;  %v5845_v44 = vadd.f32 %v1195_v41, %v1147_v57  ;;  %v10208_v16 = vld [vmem:[#allocation44_spill] sm:$0xff]  ;;  %v1390_v14 = vpop.permute.xlu1 %1389  ;;  %v10210_v6 = vld [vmem:[#allocation55_spill] sm:$0xff]  ;;  %v10218_v61 = vld [vmem:[#allocation38_spill] sm:$0xff] }
 0x140   : > { %10200 = vst [vmem:[#allocation27_spill] sm:$0xff] %v5820_v50  ;;  %v1171_v62 = vadd.f32 %v1139_v19, %v10206_v8  ;;  %v5848_v21 = vperm.slane %v1279_v56, 0  ;;  %v1275_v58 = vsel %vm1270_vm2, %v10204_v53, %v10184_v55  ;;  %vm715_vm12 = vcmp.lt.s32.totalorder %v699_v1, 128  ;;  %v10214_v56 = vld [vmem:[#allocation56_spill] sm:$0xff]  ;;  %v10217_v8 = vld [vmem:[#allocation69_spill] sm:$0xff] }
 0x141   : > { %10202 = vst [vmem:[#allocation107_spill] sm:$0xff] %v5826_v40  ;;  %v694_v38 = vadd.s32 2, %v4992_v46  ;;  %v5857_v52 = vperm.slane %v1286_v11, 0  ;;  %v701_v42 = vadd.s32 2, %v10208_v16  ;;  %v5861_v41 = vsel %vm716_vm11, 1.0, %v10176_v23  ;;  %v10226_v5 = vld [vmem:[#allocation81_spill] sm:$0xff] }
 0x142   : > { %10203 = vst [vmem:[#allocation108_spill] sm:$0xff] %v5833_v20  ;;  %v5865_v31 = vmul.f32 %v10205_v60, %v10156_v37  ;;  %v1280_v57 = vmul.f32 %v10210_v6, %v1276_v22  ;;  %v5870_v55 = vmul.f32 %v10205_v60, %v10162_v51  ;;  %v5874_v53 = vmul.f32 %v10205_v60, %v10171_v30  ;;  %v10216_v37 = vld [vmem:[#allocation31_spill] sm:$0xff] }
 0x143   : > { %10207 = vst [vmem:[#allocation82_spill] sm:$0xff] %v5855_v12  ;;  %v5878_v19 = vmul.f32 %v10205_v60, %v10165_v39  ;;  %v1281_v1 = vmul.f32 %v10214_v56, %v1275_v58  ;;  %v5882_v11 = vsel %vm715_vm12, 1.0, %v10176_v23  ;;  %v1392_v22 = vsel %vm1391_vm10, %v10216_v37, %v1390_v14  ;;  %v10219_v56 = vld [vmem:[#allocation74_spill] sm:$0xff] }
 0x144   : > { %10209 = vst [vmem:[#allocation98_spill] sm:$0xff] %v5861_v41  ;;  %v5889_v51 = vmul.f32 %v10205_v60, %v10179_v54  ;;  %v1327_v30 = vmul.f32 %v5848_v21, %v10217_v8  ;;  %v695_v6 = vadd.s32 2, %v10218_v61  ;;  %vm710_vm13 = vcmp.lt.s32.totalorder %v694_v38, 128 }
 0x145   : > { %10211 = vst [vmem:[#allocation44_spill] sm:$0xff] %v5870_v55  ;;  %v1406_v9 = vmul.f32 %v5861_v41, %v1392_v22  ;;  %v1334_v58 = vmul.f32 %v5857_v52, %v10217_v8  ;;  %vm717_vm14 = vcmp.lt.s32.totalorder %v701_v42, 128  ;;  %v5899_v59 = vmul.f32 %v5820_v50, %v10219_v56  ;;  %v10223_v42 = vld [vmem:[#allocation61_spill] sm:$0xff]  ;;  %v5942_v20 = vpop.permute.xlu0 %1530 }
 0x146   : > { %10212 = vst [vmem:[#allocation109_spill] sm:$0xff] %v5874_v53  ;;  %v5901_v13 = vadd.f32 %v1219_v15, %v1171_v62  ;;  %v5905_v54 = vmul.f32 %v5848_v21, %v10219_v56  ;;  %v5909_v60 = vmul.f32 %v5857_v52, %v10219_v56  ;;  %v5911_v38 = vperm.slane %v1280_v57, 0 }
 0x147   : > { %10213 = vst [vmem:[#allocation110_spill] sm:$0xff] %v5878_v19  ;;  %v5913_v22 = vperm.slane %v1406_v9, 0  ;;  %v5915_v41 = vperm.slane %v1281_v1, 0  ;;  %v1272_v15 = vsel %vm1270_vm2, %v10224_v32, %v10223_v42  ;;  %v5922_v62 = vsel %vm710_vm13, 1.0, %v10176_v23  ;;  %v5937_v42 = vpop.permute.xlu2 %1510 }
 0x148   : > { %10215 = vst [vmem:[#allocation111_spill] sm:$0xff] %v5882_v11  ;;  %v1398_v39 = vsel %vm1391_vm10, %v10226_v5, %v5723_v63  ;;  %v5929_v57 = vadd.f32 %v1327_v30, %v5707_v45  ;;  %vm711_vm15 = vcmp.lt.s32.totalorder %v695_v6, 128  ;;  %v5932_v9 = vsel %vm717_vm14, 1.0, %v10176_v23  ;;  %v5946_v45 = vpop.permute.xlu1 %1417 }
 0x149   : > { %10220 = vst [vmem:[#allocation31_spill] sm:$0xff] %v5899_v59  ;;  %v1399_v1 = vsel %vm1391_vm10, %v1390_v14, %v10226_v5  ;;  %v5940_v40 = vadd.f32 %v1334_v58, %v5709_v48  ;;  %v1462_v59 = vmul.f32 %v5913_v22, %v5713_v35  ;;  %v742_v6 = vadd.s32 3, %v4992_v46  ;;  %v10229_v5 = vld [vmem:[#allocation85_spill] sm:$0xff]  ;;  %v10230_v14 = vld [vmem:[#allocation86_spill] sm:$0xff]  ;;  %v10231_v58 = vld [vmem:[#allocation40_spill] sm:$0xff] }
 0x14a   : > { %10221 = vst [vmem:[#allocation38_spill] sm:$0xff] %v5909_v60  ;;  %v749_v30 = vadd.s32 3, %v10208_v16  ;;  %v1328_v7 = vmul.f32 %v5911_v38, %v10217_v8  ;;  %v1396_v48 = vsel %vm1391_vm10, %v10230_v14, %v10229_v5  ;;  %v1284_v29 = vmul.f32 %v10231_v58, %v1272_v15  ;;  %v10236_v58 = vld [vmem:[#allocation30_spill] sm:$0xff] }
 0x14b   : > { %10222 = vst [vmem:[#allocation112_spill] sm:$0xff] %v5915_v41  ;;  %v1400_v19 = vmul.f32 %v5922_v62, %v1398_v39  ;;  %v1329_v50 = vmul.f32 %v5915_v41, %v10217_v8  ;;  %v5961_v12 = vsel %vm711_vm15, 1.0, %v10176_v23  ;;  %v1407_v16 = vmul.f32 %v5932_v9, %v1399_v1 }
 0x14c   : > { %10225 = vst [vmem:[#allocation61_spill] sm:$0xff] %v5922_v62  ;;  %v5969_v55 = vmul.f32 %v5911_v38, %v10219_v56  ;;  %v1273_v39 = vsel %vm1270_vm2, %v10183_v25, %v10224_v32  ;;  %v743_v15 = vadd.s32 3, %v10218_v61  ;;  %v697_v62 = vadd.s32 2, %v10236_v58  ;;  %v10241_v61 = vld [vmem:[#allocation48_spill] sm:$0xff] }
 0x14d   : > { %10227 = vst [vmem:[#allocation87_spill] sm:$0xff] %v5929_v57  ;;  %v10233_v57 = vld [vmem:[#allocation15_spill] sm:$0xff]  ;;  %v1402_v5 = vmul.f32 %v5813_v33, %v1396_v48  ;;  %v698_v1 = vadd.s32 2, %v10237_v4  ;;  %vm758_vm0 = vcmp.lt.s32.totalorder %v742_v6, 128  ;;  %vm765_vm4 = vcmp.lt.s32.totalorder %v749_v30, 128  ;;  %v10243_v30 = vld [vmem:[#allocation94_spill] sm:$0xff] }
 0x14e   : > { %10228 = vst [vmem:[#allocation81_spill] sm:$0xff] %v5932_v9  ;;  %v5965_v53 = vadd.f32 %v1462_v59, %v10233_v57  ;;  %v5981_v59 = vmul.f32 %v5915_v41, %v10219_v56  ;;  %v5984_v57 = vadd.f32 %v1328_v7, %v5719_v17  ;;  %v5986_v9 = vperm.slane %v1284_v29, 0 }
 0x14f   : > { %10232 = vst [vmem:[#allocation86_spill] sm:$0xff] %v5961_v12  ;;  %v5988_v32 = vperm.slane %v1400_v19, 0  ;;  %v5991_v25 = vadd.f32 %v1329_v50, %v5721_v36  ;;  %v5994_v48 = vmul.f32 %v10241_v61, %v1273_v39  ;;  %v5997_v6 = vperm.slane %v1407_v16, 0  ;;  %v6001_v17 = vpop.permute.xlu2 %1538  ;;  %v10244_v39 = vld [vmem:[#allocation99_spill] sm:$0xff] }
 0x150   : > { %10234 = vst [vmem:[#allocation15_spill] sm:$0xff] %v5965_v53  ;;  %v1311_v33 = vmul.f32 %v5848_v21, %v10243_v30  ;;  %vm759_vm6 = vcmp.lt.s32.totalorder %v743_v15, 128  ;;  %v4343_v29 = vsel %vm758_vm0, 1.0, %v10176_v23  ;;  %v4350_v7 = vsel %vm765_vm4, 1.0, %v10176_v23  ;;  %v1497_v50 = vpop.permute.xlu1 %1496 }
 0x151   : > { %10235 = vst [vmem:[#allocation113_spill] sm:$0xff] %v5969_v55  ;;  %v6005_v19 = vperm.slane %v1402_v5, 0  ;;  %vm713_vm7 = vcmp.lt.s32.totalorder %v697_v62, 128  ;;  %vm714_vm8 = vcmp.lt.s32.totalorder %v698_v1, 128  ;;  %v1318_v36 = vmul.f32 %v5857_v52, %v10243_v30  ;;  %v6022_v1 = vpop.permute.xlu0 %847  ;;  %v10247_v55 = vld [vmem:[#allocation93_spill] sm:$0xff] }
 0x152   : > { %10238 = vst [vmem:[#allocation30_spill] sm:$0xff] %v5981_v59  ;;  %v1332_v16 = vmul.f32 %v5986_v9, %v10217_v8  ;;  %v1432_v15 = vmul.f32 %v5988_v32, %v10244_v39  ;;  %v1519_v61 = vsel %vm1512_vm3, %v1497_v50, %v5780_v24  ;;  %v1520_v5 = vsel %vm1512_vm3, %v5937_v42, %v1497_v50 }
 0x153   : > { %10239 = vst [vmem:[#allocation32_spill] sm:$0xff] %v5984_v57  ;;  %v6020_v62 = vsel %vm759_vm6, 1.0, %v10176_v23  ;;  %v1521_v8 = vmul.f32 %v4343_v29, %v1519_v61  ;;  %v6028_v41 = vmul.f32 %v5986_v9, %v10219_v56  ;;  %v1343_v53 = vadd.f32 %v1311_v33, %v5764_v27  ;;  %v10249_v33 = vld [vmem:[#allocation77_spill] sm:$0xff] }
 0x154   : > { %10240 = vst [vmem:[#allocation114_spill] sm:$0xff] %v5991_v25  ;;  %v1528_v25 = vmul.f32 %v4350_v7, %v1520_v5  ;;  %v6032_v59 = vsel %vm713_vm7, 1.0, %v10176_v23  ;;  %v6035_v50 = vsel %vm714_vm8, 1.0, %v10176_v23  ;;  %v1393_v57 = vsel %vm1391_vm10, %v10247_v55, %v10216_v37  ;;  %v10255_v55 = vld [vmem:[#allocation89_spill] sm:$0xff] }
 0x155   : > { %10242 = vst [vmem:[#allocation115_spill] sm:$0xff] %v5994_v48  ;;  %v1439_v48 = vmul.f32 %v5997_v6, %v10244_v39  ;;  %v1350_v61 = vadd.f32 %v1318_v36, %v5774_v34  ;;  %v6042_v29 = vperm.slane %v1521_v8, 0  ;;  %v6047_v5 = vadd.f32 %v1332_v16, %v5740_v28 }
 0x156   : > { %10245 = vst [vmem:[#allocation94_spill] sm:$0xff] %v6032_v59  ;;  %v6044_v7 = vperm.slane %v1528_v25, 0  ;;  %v1464_v27 = vadd.f32 %v1432_v15, %v1343_v53  ;;  %v876_v56 = vmul.f32 %v10249_v33, %v6022_v1  ;;  %v10250_v59 = vld [vmem:[#allocation52_spill] sm:$0xff]  ;;  %v1405_v28 = vmul.f32 %v5882_v11, %v1393_v57 }
 0x157   : > { %10246 = vst [vmem:[#allocation99_spill] sm:$0xff] %v6035_v50  ;;  %v1455_v50 = vmul.f32 %v5997_v6, %v5946_v45  ;;  %v881_v60 = vmul.f32 %v10250_v59, %v6022_v1  ;;  %v1471_v37 = vadd.f32 %v1439_v48, %v1350_v61  ;;  %v1553_v34 = vmul.f32 %v6042_v29, %v5942_v20  ;;  %v6069_v59 = vpop.permute.xlu2 %1619  ;;  %v10254_v57 = vld [vmem:[#allocation100_spill] sm:$0xff] }
 0x158   : > { %10248 = vst [vmem:[#allocation116_spill] sm:$0xff] %v6044_v7  ;;  %v1560_v8 = vmul.f32 %v6044_v7, %v5942_v20  ;;  %v1312_v53 = vmul.f32 %v5911_v38, %v10243_v30  ;;  %v6063_v25 = vadd.s32 3, %v10237_v4  ;;  %v1576_v36 = vmul.f32 %v6044_v7, %v6001_v17  ;;  %v6067_v16 = vpop.permute.xlu1 %1502 }
 0x159   : > { %10252 = vst [vmem:[#allocation52_spill] sm:$0xff] %v6067_v16  ;;  %v1585_v48 = vadd.f32 %v1553_v34, %v1464_v27  ;;  %v747_v15 = vadd.s32 3, %v10198_v26  ;;  %v748_v61 = vadd.s32 3, %v10195_v2  ;;  %v1335_v11 = vmul.f32 %v5848_v21, %v10254_v57  ;;  %v10256_v27 = vld [vmem:[#allocation24_spill] sm:$0xff] }
 0x15a   : > { %10251 = vst [vmem:[#allocation77_spill] sm:$0xff] %v6063_v25  ;;  %v6073_v33 = vadd.f32 %v1560_v8, %v1471_v37  ;;  %v1029_v4 = vadd.f32 %v10255_v55, %v876_v56  ;;  %v1487_v25 = vadd.f32 %v1455_v50, %v5940_v40  ;;  %v1454_v7 = vmul.f32 %v5913_v22, %v5946_v45  ;;  %v10258_v56 = vld [vmem:[#allocation78_spill] sm:$0xff]  ;;  %v10260_v8 = vld [vmem:[#allocation11_spill] sm:$0xff] }
 0x15b   : > { %v1336_v16 = vmul.f32 %v5911_v38, %v10254_v57  ;;  %v1342_v26 = vmul.f32 %v5857_v52, %v10254_v57  ;;  %v1637_v2 = vadd.f32 %v6069_v59, %v1585_v48  ;;  %v1034_v37 = vadd.f32 %v10256_v27, %v881_v60  ;;  %v10259_v52 = vld [vmem:[#allocation103_spill] sm:$0xff] }
 0x15c   : > { %10253 = vst [vmem:[#allocation117_spill] sm:$0xff] %v6073_v33  ;;  %v1429_v34 = vperm.slane %v1405_v28, 0  ;;  %v6088_v21 = vadd.f32 %v1312_v53, %v5766_v0  ;;  %v1397_v40 = vsel %vm1391_vm10, %v5723_v63, %v10230_v14  ;;  %v6094_v55 = vadd.f32 %v1576_v36, %v1487_v25  ;;  %v10261_v53 = vld [vmem:[#allocation76_spill] sm:$0xff] }
 0x15d   : > { %v883_v38 = vmul.f32 %v10258_v56, %v6022_v1  ;;  %v6098_v50 = vmax.f32 %v1637_v2, 0.0  ;;  %vm763_vm9 = vcmp.lt.s32.totalorder %v747_v15, 128  ;;  %vm764_vm11 = vcmp.lt.s32.totalorder %v748_v61, 128 }
 0x15e   : > { %10257 = vst [vmem:[#allocation100_spill] sm:$0xff] %v6094_v55  ;;  %v1445_v60 = vmul.f32 %v1429_v34, %v10259_v52  ;;  %v1150_v28 = vadd.f32 %v10260_v8, %v1029_v4  ;;  %v1316_v0 = vmul.f32 %v5986_v9, %v10243_v30  ;;  %v1486_v48 = vadd.f32 %v1454_v7, %v10261_v53 }
 0x15f   : > { %v6106_v63 = vadd.f32 %v1335_v11, %v5823_v18  ;;  %v6109_v14 = vadd.f32 %v1336_v16, %v5828_v43  ;;  %v6112_v25 = vadd.f32 %v1342_v26, %v5830_v3  ;;  %1701 = vrot.lane.b32.xlu1 %v6098_v50, %s4681_s28  ;;  %v1155_v36 = vadd.f32 %v5717_v49, %v1034_v37  ;;  %v10262_v11 = vld [vmem:[#allocation43_spill] sm:$0xff] }
 0x160   : > { %v1401_v15 = vmul.f32 %v5961_v12, %v1397_v40  ;;  %v4348_v61 = vsel %vm763_vm9, 1.0, %v10176_v23  ;;  %v4349_v7 = vsel %vm764_vm11, 1.0, %v10176_v23  ;;  %v1340_v18 = vmul.f32 %v5986_v9, %v10254_v57  ;;  %v10263_v3 = vld [vmem:[#allocation95_spill] sm:$0xff]  ;;  %v1509_v4 = vpop.permute.xlu1 %1508 }
 0x161   : > { %v1518_v43 = vsel %vm1512_vm3, %v5780_v24, %v10262_v11  ;;  %v1036_v16 = vadd.f32 %v10263_v3, %v883_v38  ;;  %v1437_v26 = vmul.f32 %v1429_v34, %v10244_v39  ;;  %v1461_v49 = vmul.f32 %v1429_v34, %v5713_v35 }
 0x162   : > { %v1513_v2 = vsel %vm1512_vm3, %v1509_v4, %v5937_v42  ;;  %v1514_v9 = vsel %vm1512_vm3, %v5839_v10, %v1509_v4  ;;  %v1230_v27 = vadd.f32 %v5865_v31, %v1150_v28  ;;  %v1453_v37 = vmul.f32 %v1429_v34, %v5946_v45  ;;  %v10264_v4 = vld [vmem:[#allocation97_spill] sm:$0xff] }
 0x163   : > { %v1526_v24 = vmul.f32 %v4348_v61, %v1514_v9  ;;  %v1527_v40 = vmul.f32 %v4349_v7, %v1513_v2  ;;  %v1235_v56 = vadd.f32 %v5889_v51, %v1155_v36  ;;  %v1348_v38 = vadd.f32 %v1316_v0, %v5845_v44  ;;  %v10265_v61 = vld [vmem:[#allocation70_spill] sm:$0xff] }
 0x164   : > { %v1425_v8 = vperm.slane %v1401_v15, 0  ;;  %v1522_v53 = vmul.f32 %v6020_v62, %v1518_v43  ;;  %v6142_v42 = vmul.f32 %v6005_v19, %v10259_v52  ;;  %v1372_v3 = vadd.f32 %v1340_v18, %v5901_v13 }
 0x165   : > { %v1157_v12 = vadd.f32 %v10264_v4, %v1036_v16  ;;  %v1550_v31 = vperm.slane %v1526_v24, 0  ;;  %v6146_v28 = vperm.slane %v1527_v40, 0  ;;  %v1469_v34 = vadd.f32 %v1437_v26, %v1348_v38  ;;  %v10269_v38 = vld [vmem:[#allocation90_spill] sm:$0xff] }
 0x166   : > { %v877_v51 = vmul.f32 %v10265_v61, %v6022_v1  ;;  %v1351_v44 = vadd.f32 %v5905_v54, %v1230_v27  ;;  %v1485_v0 = vadd.f32 %v1453_v37, %v6047_v5  ;;  %v6152_v62 = vadd.f32 %v1461_v49, %v1372_v3  ;;  %v10268_v37 = vld [vmem:[#allocation33_spill] sm:$0xff] }
 0x167   : > { %v1558_v36 = vmul.f32 %v1550_v31, %v5942_v20  ;;  %v1574_v15 = vmul.f32 %v1550_v31, %v6001_v17  ;;  %v1575_v13 = vmul.f32 %v6146_v28, %v6001_v17  ;;  %v1356_v7 = vadd.f32 %v6028_v41, %v1235_v56  ;;  %v10267_v41 = vld [vmem:[#allocation71_spill] sm:$0xff] }
 0x168   : > { %v1433_v18 = vmul.f32 %v1425_v8, %v10244_v39  ;;  %v1440_v43 = vmul.f32 %v5988_v32, %v10259_v52  ;;  %v1456_v54 = vmul.f32 %v5988_v32, %v5713_v35  ;;  %v6164_v5 = vperm.slane %v1522_v53, 0  ;;  %v6167_v26 = vpop.permute.xlu1 %1534 }
 0x169   : > { %v1237_v16 = vadd.f32 %v5843_v47, %v1157_v12  ;;  %v6169_v49 = vadd.f32 %v1574_v15, %v1485_v0  ;;  %v6171_v2 = vadd.f32 %v1558_v36, %v1469_v34  ;;  %v6173_v9 = vadd.f32 %v1575_v13, %v1486_v48  ;;  %v6182_v12 = vpop.permute.xlu0 %1624  ;;  %v10270_v36 = vld [vmem:[#allocation38_spill] sm:$0xff] }
 0x16a   : > { %v878_v27 = vmul.f32 %v10267_v41, %v6022_v1  ;;  %v744_v24 = vadd.s32 3, %v10268_v37  ;;  %v1472_v40 = vadd.f32 %v1440_v43, %v1351_v44  ;;  %v1561_v56 = vmul.f32 %v6042_v29, %v6167_v26  ;;  %v10271_v43 = vld [vmem:[#allocation91_spill] sm:$0xff] }
 0x16b   : > { %10266 = vst [vmem:[#allocation89_spill] sm:$0xff] %v6173_v9  ;;  %v1447_v47 = vmul.f32 %v5997_v6, %v10259_v52  ;;  %v1030_v53 = vadd.f32 %v10269_v38, %v877_v51  ;;  %v1477_v3 = vadd.f32 %v1445_v60, %v1356_v7  ;;  %v1566_v48 = vmul.f32 %v1550_v31, %v6167_v26  ;;  %v10273_v38 = vld [vmem:[#allocation116_spill] sm:$0xff] }
 0x16c   : > { %v6187_v4 = vmul.f32 %v1425_v8, %v10259_v52  ;;  %v1457_v34 = vmul.f32 %v1425_v8, %v5713_v35  ;;  %v745_v61 = vadd.s32 3, %v10236_v58  ;;  %v1593_v44 = vadd.f32 %v1561_v56, %v1472_v40  ;;  %v10272_v40 = vld [vmem:[#allocation25_spill] sm:$0xff] }
 0x16d   : > { %v1554_v0 = vmul.f32 %v6164_v5, %v5942_v20  ;;  %v1358_v15 = vadd.f32 %v10270_v36, %v1237_v16  ;;  %v1463_v13 = vmul.f32 %v5997_v6, %v5713_v35  ;;  %v6196_v51 = vadd.f32 %v1566_v48, %v1477_v3  ;;  %v10274_v6 = vld [vmem:[#allocation42_spill] sm:$0xff]  ;;  %v10275_v3 = vld [vmem:[#allocation85_spill] sm:$0xff] }
 0x16e   : > { %v1465_v60 = vadd.f32 %v1433_v18, %v6088_v21  ;;  %vm760_vm12 = vcmp.lt.s32.totalorder %v744_v24, 128  ;;  %v1645_v7 = vadd.f32 %v6182_v12, %v1593_v44  ;;  %v1031_v41 = vadd.f32 %v10271_v43, %v878_v27  ;;  %v10276_v18 = vld [vmem:[#allocation67_spill] sm:$0xff] }
 0x16f   : > { %v1488_v58 = vadd.f32 %v1456_v54, %v6106_v63  ;;  %v1479_v37 = vadd.f32 %v1447_v47, %v1358_v15  ;;  %v1151_v56 = vadd.f32 %v10272_v40, %v1030_v53  ;;  %v1568_v16 = vmul.f32 %v10273_v38, %v6167_v26  ;;  %v10278_v15 = vld [vmem:[#allocation101_spill] sm:$0xff] }
 0x170   : > { %v1489_v36 = vadd.f32 %v1457_v34, %v6109_v14  ;;  %v1395_v21 = vsel %vm1391_vm10, %v10275_v3, %v10274_v6  ;;  %v879_v24 = vmul.f32 %v10276_v18, %v6022_v1  ;;  %v6212_v48 = vmax.f32 %v1645_v7, 0.0  ;;  %v6216_v27 = vpop.permute.xlu1 %1542  ;;  %v10280_v7 = vld [vmem:[#allocation44_spill] sm:$0xff] }
 0x171   : > { %v1495_v63 = vadd.f32 %v1463_v13, %v6112_v25  ;;  %v4345_v54 = vsel %vm760_vm12, 1.0, %v10176_v23  ;;  %v1586_v47 = vadd.f32 %v1554_v0, %v1465_v60  ;;  %v6218_v53 = vadd.f32 %v1568_v16, %v1479_v37  ;;  %v10279_v13 = vld [vmem:[#allocation52_spill] sm:$0xff]  ;;  %v6232_v60 = vpop.permute.xlu2 %1634 }
 0x172   : > { %1703 = vrot.lane.b32.xlu2 %v6212_v48, %s4681_s28  ;;  %v1577_v14 = vmul.f32 %v6042_v29, %v6216_v27  ;;  %v1448_v34 = vmul.f32 %v5988_v32, %v5946_v45  ;;  %v1449_v44 = vmul.f32 %v1425_v8, %v5946_v45  ;;  %v1152_v25 = vadd.f32 %v10278_v15, %v1031_v41  ;;  %v10284_v15 = vld [vmem:[#allocation87_spill] sm:$0xff] }
 0x173   : > { %10277 = vst [vmem:[#allocation24_spill] sm:$0xff] %v6218_v53  ;;  %v1517_v0 = vsel %vm1512_vm3, %v10262_v11, %v10279_v13  ;;  %v1231_v43 = vadd.f32 %v10280_v7, %v1151_v56  ;;  %v1582_v37 = vmul.f32 %v1550_v31, %v6216_v27  ;;  %v1584_v40 = vmul.f32 %v10273_v38, %v6216_v27  ;;  %v10281_v11 = vld [vmem:[#allocation92_spill] sm:$0xff] }
 0x174   : > { %vm761_vm13 = vcmp.lt.s32.totalorder %v745_v61, 128  ;;  %v1609_v32 = vadd.f32 %v1577_v14, %v1488_v58  ;;  %v1638_v8 = vadd.f32 %v6069_v59, %v1586_v47  ;;  %v1578_v41 = vmul.f32 %v6164_v5, %v6216_v27  ;;  %v10283_v58 = vld [vmem:[#allocation109_spill] sm:$0xff] }
 0x175   : > { %v1569_v16 = vmul.f32 %v6042_v29, %v6001_v17  ;;  %v1032_v3 = vadd.f32 %v10281_v11, %v879_v24  ;;  %v6245_v18 = vadd.f32 %v1582_v37, %v6152_v62  ;;  %v6247_v56 = vadd.f32 %v1584_v40, %v1495_v63  ;;  %v10285_v29 = vld [vmem:[#allocation32_spill] sm:$0xff]  ;;  %v10286_v24 = vld [vmem:[#allocation113_spill] sm:$0xff]  ;;  %v10287_v62 = vld [vmem:[#allocation82_spill] sm:$0xff] }
 0x176   : > { %v1523_v31 = vmul.f32 %v4345_v54, %v1517_v0  ;;  %v1661_v38 = vadd.f32 %v6232_v60, %v1609_v32  ;;  %v1570_v61 = vmul.f32 %v6164_v5, %v6001_v17  ;;  %v1232_v47 = vadd.f32 %v10283_v58, %v1152_v25  ;;  %v10288_v40 = vld [vmem:[#allocation94_spill] sm:$0xff] }
 0x177   : > { %10282 = vst [vmem:[#allocation78_spill] sm:$0xff] %v6247_v56  ;;  %v4346_v14 = vsel %vm761_vm13, 1.0, %v10176_v23  ;;  %v1480_v7 = vadd.f32 %v1448_v34, %v10284_v15  ;;  %v1481_v9 = vadd.f32 %v1449_v44, %v10285_v29  ;;  %v1352_v11 = vadd.f32 %v10286_v24, %v1231_v43  ;;  %v10289_v58 = vld [vmem:[#allocation102_spill] sm:$0xff]  ;;  %v10322_v56 = vld [vmem:[#allocation105_spill] sm:$0xff] }
 0x178   : > { %v1516_v63 = vsel %vm1512_vm3, %v10279_v13, %v10287_v62  ;;  %v6261_v54 = vmax.f32 %v1661_v38, 0.0  ;;  %v6263_v0 = vmax.f32 %v1638_v8, 0.0  ;;  %v1610_v37 = vadd.f32 %v1578_v41, %v1489_v36  ;;  %v6271_v43 = vpop.permute.xlu1 %1629  ;;  %v10290_v36 = vld [vmem:[#allocation30_spill] sm:$0xff] }
 0x179   : > { %v1403_v25 = vmul.f32 %v10288_v40, %v1395_v21  ;;  %v1601_v32 = vadd.f32 %v1569_v16, %v1480_v7  ;;  %v1562_v34 = vmul.f32 %v6164_v5, %v6167_v26  ;;  %v1153_v44 = vadd.f32 %v10289_v58, %v1032_v3  ;;  %v10293_v7 = vld [vmem:[#allocation27_spill] sm:$0xff]  ;;  %v10295_v58 = vld [vmem:[#allocation110_spill] sm:$0xff] }
 0x17a   : > { %v6269_v15 = vperm.slane %v1523_v31, 0  ;;  %1707 = vrot.lane.b32.xlu1 %v6261_v54, %s4681_s28  ;;  %1709 = vrot.lane.b32.xlu2 %v6263_v0, %s4681_s28  ;;  %v1602_v13 = vadd.f32 %v1570_v61, %v1481_v9  ;;  %v1353_v8 = vadd.f32 %v10290_v36, %v1232_v47  ;;  %v1583_v21 = vmul.f32 %v6146_v28, %v6216_v27  ;;  %v10291_v61 = vld [vmem:[#allocation15_spill] sm:$0xff]  ;;  %v10296_v36 = vld [vmem:[#allocation93_spill] sm:$0xff] }
 0x17b   : > { %v1524_v41 = vmul.f32 %v4346_v14, %v1516_v63  ;;  %v1653_v5 = vadd.f32 %v6271_v43, %v1601_v32  ;;  %v1473_v16 = vadd.f32 %v6187_v4, %v1352_v11  ;;  %v1450_v3 = vmul.f32 %v6005_v19, %v5946_v45  ;;  %v10294_v4 = vld [vmem:[#allocation112_spill] sm:$0xff] }
 0x17c   : > { %v1654_v31 = vadd.f32 %v6271_v43, %v1602_v13  ;;  %v1662_v38 = vadd.f32 %v6232_v60, %v1610_v37  ;;  %v1563_v9 = vmul.f32 %v6269_v15, %v6167_v26  ;;  %v6289_v47 = vadd.f32 %v1583_v21, %v10291_v61 }
 0x17d   : > { %v1314_v14 = vmul.f32 %v10293_v7, %v10243_v30  ;;  %v6293_v29 = vmax.f32 %v1653_v5, 0.0  ;;  %v1594_v24 = vadd.f32 %v1562_v34, %v1473_v16  ;;  %v1313_v11 = vmul.f32 %v10294_v4, %v10243_v30  ;;  %v10297_v5 = vld [vmem:[#allocation77_spill] sm:$0xff]  ;;  %v10298_v34 = vld [vmem:[#allocation114_spill] sm:$0xff] }
 0x17e   : > { %10292 = vst [vmem:[#allocation103_spill] sm:$0xff] %v6289_v47  ;;  %v6297_v63 = vperm.slane %v1403_v25, 0  ;;  %v1571_v37 = vmul.f32 %v6269_v15, %v6001_v17  ;;  %v1474_v32 = vadd.f32 %v6142_v42, %v1353_v8  ;;  %v1233_v13 = vadd.f32 %v10295_v58, %v1153_v44  ;;  %v10299_v58 = vld [vmem:[#allocation51_spill] sm:$0xff] }
 0x17f   : > { %v1394_v21 = vsel %vm1391_vm10, %v10274_v6, %v10296_v36  ;;  %vm762_vm14 = vcmp.lt.s32.totalorder %v10297_v5, 128  ;;  %1705 = vrot.lane.b32.xlu0 %v6293_v29, %s4681_s28  ;;  %v1482_v25 = vadd.f32 %v1450_v3, %v10298_v34  ;;  %v1434_v16 = vmul.f32 %v6005_v19, %v10244_v39  ;;  %v10300_v5 = vld [vmem:[#allocation75_spill] sm:$0xff] }
 0x180   : > { %v6313_v61 = vperm.slane %v1524_v41, 0  ;;  %v6315_v42 = vmax.f32 %v1654_v31, 0.0  ;;  %v6317_v44 = vmax.f32 %v1662_v38, 0.0  ;;  %v1595_v8 = vadd.f32 %v1563_v9, %v1474_v32  ;;  %v10301_v38 = vld [vmem:[#allocation31_spill] sm:$0xff] }
 0x181   : > { %v1346_v40 = vadd.f32 %v1314_v14, %v10299_v58  ;;  %v1555_v6 = vmul.f32 %v6269_v15, %v5942_v20  ;;  %v1646_v36 = vadd.f32 %v6182_v12, %v1594_v24  ;;  %v1345_v47 = vadd.f32 %v1313_v11, %v10300_v5  ;;  %v10302_v14 = vld [vmem:[#allocation99_spill] sm:$0xff]  ;;  %v10303_v5 = vld [vmem:[#allocation108_spill] sm:$0xff] }
 0x182   : > { %v1435_v3 = vmul.f32 %v6297_v63, %v10244_v39  ;;  %v4347_v41 = vsel %vm762_vm14, 1.0, %v10176_v23  ;;  %1713 = vrot.lane.b32.xlu1 %v6315_v42, %s4681_s28  ;;  %1715 = vrot.lane.b32.xlu2 %v6317_v44, %s4681_s28  ;;  %v1603_v31 = vadd.f32 %v1571_v37, %v1482_v25  ;;  %v1354_v9 = vadd.f32 %v10301_v38, %v1233_v13  ;;  %v10304_v38 = vld [vmem:[#allocation106_spill] sm:$0xff] }
 0x183   : > { %v1404_v32 = vmul.f32 %v10302_v14, %v1394_v21  ;;  %v1443_v24 = vmul.f32 %v6297_v63, %v10259_v52  ;;  %v1515_v11 = vsel %vm1512_vm3, %v10287_v62, %v5839_v10  ;;  %v1466_v23 = vadd.f32 %v1434_v16, %v1345_v47  ;;  %v10305_v62 = vld [vmem:[#allocation115_spill] sm:$0xff] }
 0x184   : > { %v1556_v34 = vmul.f32 %v6313_v61, %v5942_v20  ;;  %v1647_v58 = vadd.f32 %v6182_v12, %v1595_v8  ;;  %v1655_v37 = vadd.f32 %v6271_v43, %v1603_v31  ;;  %v1564_v13 = vmul.f32 %v6313_v61, %v6167_v26 }
 0x185   : > { %v6345_v21 = vmax.f32 %v1646_v36, 0.0  ;;  %v1587_v25 = vadd.f32 %v1555_v6, %v1466_v23  ;;  %v1248_v14 = vadd.f32 %v10304_v38, %v10303_v5  ;;  %v1337_v10 = vmul.f32 %v10294_v4, %v10254_v57  ;;  %v10306_v36 = vld [vmem:[#allocation68_spill] sm:$0xff] }
 0x186   : > { %v6352_v47 = vperm.slane %v10305_v62, 0  ;;  %v1467_v16 = vadd.f32 %v1435_v3, %v1346_v40  ;;  %v1525_v46 = vmul.f32 %v4347_v41, %v1515_v11  ;;  %v1475_v8 = vadd.f32 %v1443_v24, %v1354_v9  ;;  %v10309_v41 = vld [vmem:[#allocation107_spill] sm:$0xff]  ;;  %v10310_v9 = vld [vmem:[#allocation12_spill] sm:$0xff] }
 0x187   : > { %v1338_v31 = vmul.f32 %v10293_v7, %v10254_v57  ;;  %v6356_v33 = vperm.slane %v1404_v32, 0  ;;  %v880_v6 = vmul.f32 %v10306_v36, %v6022_v1  ;;  %1711 = vrot.lane.b32.xlu0 %v6345_v21, %s4681_s28  ;;  %v1458_v4 = vmul.f32 %v6005_v19, %v5713_v35 }
 0x188   : > { %v6364_v23 = vmax.f32 %v1647_v58, 0.0  ;;  %v6366_v5 = vmax.f32 %v1655_v37, 0.0  ;;  %v1588_v40 = vadd.f32 %v1556_v34, %v1467_v16  ;;  %v1596_v3 = vadd.f32 %v1564_v13, %v1475_v8  ;;  %v10311_v34 = vld [vmem:[#allocation13_spill] sm:$0xff]  ;;  %v10312_v37 = vld [vmem:[#allocation34_spill] sm:$0xff]  ;;  %v10313_v13 = vld [vmem:[#allocation96_spill] sm:$0xff] }
 0x189   : > { %v1249_v24 = vadd.f32 %v10310_v9, %v10309_v41  ;;  %v1639_v32 = vadd.f32 %v6069_v59, %v1587_v25  ;;  %v1369_v11 = vadd.f32 %v1337_v10, %v1248_v14  ;;  %v1579_v38 = vmul.f32 %v6269_v15, %v6216_v27  ;;  %v10314_v25 = vld [vmem:[#allocation20_spill] sm:$0xff]  ;;  %v10315_v8 = vld [vmem:[#allocation21_spill] sm:$0xff] }
 0x18a   : > { %10307 = vst [vmem:[#allocation11_spill] sm:$0xff] %v6364_v23  ;;  %v1315_v62 = vmul.f32 %v6352_v47, %v10243_v30  ;;  %v1459_v19 = vmul.f32 %v6297_v63, %v5713_v35  ;;  %v6377_v58 = vperm.slane %v1525_v46, 0  ;;  %1719 = vrot.lane.b32.xlu1 %v6364_v23, %s4681_s28  ;;  %1721 = vrot.lane.b32.xlu2 %v6366_v5, %s4681_s28  ;;  %vm2253_vm15 = vcmask 261120  }
 0x18b   : > { %10308 = vst [vmem:[#allocation76_spill] sm:$0xff] %v6366_v5  ;;  %v1209_v14 = vmul.f32 %v10312_v37, %v10311_v34  ;;  %v1170_v15 = vadd.f32 %v10314_v25, %v10313_v13  ;;  %v1370_v10 = vadd.f32 %v1338_v31, %v1249_v24  ;;  %v1490_v16 = vadd.f32 %v1458_v4, %v1369_v11  ;;  %v10316_v37 = vld [vmem:[#allocation88_spill] sm:$0xff]  ;;  %v10317_v5 = vld [vmem:[#allocation10_spill] sm:$0xff]  ;;  %v10318_v31 = vld [vmem:[#allocation69_spill] sm:$0xff] }
 0x18c   : > { %v1033_v36 = vadd.f32 %v10315_v8, %v880_v6  ;;  %v1436_v46 = vmul.f32 %v6356_v33, %v10244_v39  ;;  %v1640_v41 = vadd.f32 %v6069_v59, %v1588_v40  ;;  %v1648_v9 = vadd.f32 %v6182_v12, %v1596_v3  ;;  %v10319_v6 = vld [vmem:[#allocation14_spill] sm:$0xff]  ;;  %v10320_v24 = vld [vmem:[#allocation104_spill] sm:$0xff] }
 0x18d   : > { %v1580_v53 = vmul.f32 %v6313_v61, %v6216_v27  ;;  %v6394_v55 = vmax.f32 %v1639_v32, 0.0  ;;  %v1611_v34 = vadd.f32 %v1579_v38, %v1490_v16  ;;  %v1161_v13 = vadd.f32 %v10317_v5, %v10316_v37  ;;  %v10321_v25 = vld [vmem:[#allocation50_spill] sm:$0xff]  ;;  %v10323_v38 = vld [vmem:[#allocation36_spill] sm:$0xff] }
 0x18e   : > { %v1330_v4 = vmul.f32 %v10293_v7, %v10318_v31  ;;  %v1242_v11 = vadd.f32 %v10320_v24, %v10319_v6  ;;  %v1347_v8 = vadd.f32 %v1315_v62, %v10321_v25  ;;  %v1491_v40 = vadd.f32 %v1459_v19, %v1370_v10  ;;  %v10327_v25 = vld [vmem:[#allocation19_spill] sm:$0xff] }
 0x18f   : > { %v1557_v3 = vmul.f32 %v6377_v58, %v5942_v20  ;;  %v1250_v23 = vadd.f32 %v10322_v56, %v1170_v15  ;;  %v1339_v32 = vmul.f32 %v6352_v47, %v10254_v57  ;;  %1717 = vrot.lane.b32.xlu0 %v6394_v55, %s4681_s28  ;;  %v1241_v5 = vadd.f32 %v1209_v14, %v1161_v13  ;;  %v10324_v15 = vld [vmem:[#allocation9_spill] sm:$0xff]  ;;  %v10325_v57 = vld [vmem:[#allocation62_spill] sm:$0xff] }
 0x190   : > { %v1154_v7 = vadd.f32 %v10323_v38, %v1033_v36  ;;  %v1468_v16 = vadd.f32 %v1436_v46, %v1347_v8  ;;  %v6411_v37 = vmax.f32 %v1640_v41, 0.0  ;;  %v6413_v6 = vmax.f32 %v1648_v9, 0.0  ;;  %v10326_v41 = vld [vmem:[#allocation35_spill] sm:$0xff]  ;;  %v10328_v8 = vld [vmem:[#allocation28_spill] sm:$0xff] }
 0x191   : > { %v1612_v62 = vadd.f32 %v1580_v53, %v1491_v40  ;;  %v1663_v19 = vadd.f32 %v6232_v60, %v1611_v34  ;;  %v1362_v10 = vadd.f32 %v1330_v4, %v1241_v5  ;;  %v1451_v56 = vmul.f32 %v6297_v63, %v5946_v45  ;;  %v10329_v40 = vld [vmem:[#allocation74_spill] sm:$0xff] }
 0x192   : > { %v1202_v24 = vmul.f32 %v10325_v57, %v10324_v15  ;;  %v1331_v14 = vmul.f32 %v6352_v47, %v10318_v31  ;;  %v1460_v36 = vmul.f32 %v6356_v33, %v5713_v35  ;;  %1725 = vrot.lane.b32.xlu1 %v6411_v37, %s4681_s28  ;;  %1727 = vrot.lane.b32.xlu2 %v6413_v6, %s4681_s28  ;;  %vm4198_vm0 = vcmask 1044484  }
 0x193   : > { %v1589_v53 = vadd.f32 %v1557_v3, %v1468_v16  ;;  %v1371_v46 = vadd.f32 %v1339_v32, %v1250_v23  ;;  %v882_v63 = vmul.f32 %v10326_v41, %v6022_v1  ;;  %v1572_v9 = vmul.f32 %v6313_v61, %v6001_v17  ;;  %v10330_v32 = vld [vmem:[#allocation17_spill] sm:$0xff]  ;;  %v10331_v16 = vld [vmem:[#allocation22_spill] sm:$0xff] }
 0x194   : > { %v1234_v34 = vadd.f32 %v1202_v24, %v1154_v7  ;;  %v1664_v13 = vadd.f32 %v6232_v60, %v1612_v62  ;;  %v1452_v35 = vmul.f32 %v6356_v33, %v5946_v45  ;;  %v1581_v4 = vmul.f32 %v6377_v58, %v6216_v27  ;;  %v10332_v62 = vld [vmem:[#allocation37_spill] sm:$0xff] }
 0x195   : > { %v1641_v31 = vadd.f32 %v6069_v59, %v1589_v53  ;;  %v1003_v23 = vmul.f32 %v10328_v8, %v10327_v25  ;;  %v1323_v1 = vmul.f32 %v6352_v47, %v10329_v40  ;;  %v6442_v3 = vmax.f32 %v1663_v19, 0.0 }
 0x196   : > { %v1483_v61 = vadd.f32 %v1451_v56, %v1362_v10  ;;  %v995_v5 = vmul.f32 %v10328_v8, %v10330_v32  ;;  %v1363_v38 = vadd.f32 %v1331_v14, %v1242_v11  ;;  %v1492_v7 = vadd.f32 %v1460_v36, %v1371_v46  ;;  %v10334_v14 = vld [vmem:[#allocation41_spill] sm:$0xff]  ;;  %v10338_v32 = vld [vmem:[#allocation66_spill] sm:$0xff] }
 0x197   : > { %v1573_v45 = vmul.f32 %v6377_v58, %v6001_v17  ;;  %v1124_v27 = vmul.f32 %v10332_v62, %v10331_v16  ;;  %v1035_v15 = vadd.f32 %v1003_v23, %v882_v63  ;;  %1723 = vrot.lane.b32.xlu0 %v6442_v3, %s4681_s28  ;;  %v1355_v47 = vadd.f32 %v1323_v1, %v1234_v34  ;;  %v10335_v63 = vld [vmem:[#allocation80_spill] sm:$0xff] }
 0x198   : > { %v1604_v24 = vadd.f32 %v1572_v9, %v1483_v61  ;;  %v6452_v19 = vmax.f32 %v1664_v13, 0.0  ;;  %v6454_v10 = vmax.f32 %v1641_v31, 0.0  ;;  %v1484_v56 = vadd.f32 %v1452_v35, %v1363_v38  ;;  %v10337_v31 = vld [vmem:[#allocation26_spill] sm:$0xff] }
 0x199   : > { %v1613_v53 = vadd.f32 %v1581_v4, %v1492_v7  ;;  %v1444_v11 = vmul.f32 %v6356_v33, %v10259_v52  ;;  %v1116_v17 = vmul.f32 %v10332_v62, %v10334_v14  ;;  %v1565_v46 = vmul.f32 %v6377_v58, %v6167_v26  ;;  %v10336_v33 = vld [vmem:[#allocation16_spill] sm:$0xff] }
 0x19a   : > { %10333 = vst [vmem:[#allocation43_spill] sm:$0xff] %v6454_v10  ;;  %v1656_v36 = vadd.f32 %v6271_v43, %v1604_v24  ;;  %1731 = vrot.lane.b32.xlu1 %v6452_v19, %s4681_s28  ;;  %1733 = vrot.lane.b32.xlu2 %v6454_v10, %s4681_s28  ;;  %v1605_v41 = vadd.f32 %v1573_v45, %v1484_v56  ;;  %vm4200_vm4 = vcmask 1046534   ;;  %vm4202_vm3 = vcmask 1045508  }
 0x19b   : > { %v1027_v9 = vadd.f32 %v995_v5, %v10335_v63  ;;  %v1156_v34 = vadd.f32 %v1124_v27, %v1035_v15  ;;  %v1476_v13 = vadd.f32 %v1444_v11, %v1355_v47  ;;  %v1196_v35 = vmul.f32 %v10337_v31, %v10336_v33 }
 0x19c   : > { %v1657_v4 = vadd.f32 %v6271_v43, %v1605_v41  ;;  %v1665_v25 = vadd.f32 %v6232_v60, %v1613_v53  ;;  %v1204_v58 = vmul.f32 %v10325_v57, %v10336_v33  ;;  %v6474_v23 = vmax.f32 %v1656_v36, 0.0  ;;  %v10347_v41 = vld [vmem:[#allocation11_spill] sm:$0xff] }
 0x19d   : > { %v1148_v8 = vadd.f32 %v1116_v17, %v1027_v9  ;;  %v1597_v1 = vadd.f32 %v1565_v46, %v1476_v13  ;;  %v1317_v5 = vmul.f32 %v10338_v32, %v10243_v30  ;;  %v1325_v16 = vmul.f32 %v10338_v32, %v10329_v40  ;;  %v10349_v9 = vld [vmem:[#allocation78_spill] sm:$0xff]  ;;  %v10350_v13 = vld [vmem:[#allocation76_spill] sm:$0xff] }
 0x19e   : > { %v1236_v61 = vadd.f32 %v1204_v58, %v1156_v34  ;;  %v6480_v38 = vmax.f32 %v1657_v4, 0.0  ;;  %v6482_v7 = vmax.f32 %v1665_v25, 0.0  ;;  %v1438_v62 = vmul.f32 %v5913_v22, %v10244_v39 }
 0x19f   : > { %1729 = vrot.lane.b32.xlu0 %v6474_v23, %s4681_s28  ;;  %v1228_v45 = vadd.f32 %v1196_v35, %v1148_v8  ;;  %v1649_v57 = vadd.f32 %v6182_v12, %v1597_v1  ;;  %v1446_v27 = vmul.f32 %v5913_v22, %v10259_v52  ;;  %v1559_v24 = vmul.f32 %v6146_v28, %v5942_v20  ;;  %v10352_v35 = vld [vmem:[#allocation100_spill] sm:$0xff] }
 0x1a0   : > { %10339 = vst [vmem:[#allocation95_spill] sm:$0xff] %v6480_v38  ;;  %v1357_v15 = vadd.f32 %v1325_v16, %v1236_v61  ;;  %v1650_v40 = vadd.f32 %v6182_v12, %v6196_v51  ;;  %v1658_v39 = vadd.f32 %v6271_v43, %v6169_v49  ;;  %v1567_v22 = vmul.f32 %v6146_v28, %v6167_v26  ;;  %v10354_v1 = vld [vmem:[#allocation24_spill] sm:$0xff] }
 0x1a1   : > { %10340 = vst [vmem:[#allocation97_spill] sm:$0xff] %v6482_v7  ;;  %v1349_v30 = vadd.f32 %v1317_v5, %v1228_v45  ;;  %v6503_v52 = vmax.f32 %v1649_v57, 0.0  ;;  %v1642_v51 = vadd.f32 %v6069_v59, %v6171_v2  ;;  %v1666_v2 = vadd.f32 %v6232_v60, %v6245_v18  ;;  %v10355_v57 = vld [vmem:[#allocation117_spill] sm:$0xff] }
 0x1a2   : > { %1737 = vrot.lane.b32.xlu1 %v6480_v38, %s4681_s28  ;;  %1739 = vrot.lane.b32.xlu2 %v6482_v7, %s4681_s28  ;;  %v1478_v56 = vadd.f32 %v1446_v27, %v1357_v15  ;;  %v6507_v53 = vmax.f32 %v1650_v40, 0.0  ;;  %v6509_v11 = vmax.f32 %v1658_v39, 0.0  ;;  %v1668_v34 = vadd.f32 %v6232_v60, %v10349_v9 }
 0x1a3   : > { %10341 = vst [vmem:[#allocation70_spill] sm:$0xff] %v6503_v52  ;;  %v1470_v47 = vadd.f32 %v1438_v62, %v1349_v30  ;;  %v6519_v49 = vmax.f32 %v1642_v51, 0.0  ;;  %v6533_v46 = vmax.f32 %v1666_v2, 0.0  ;;  %v1660_v4 = vadd.f32 %v6271_v43, %v10352_v35 }
 0x1a4   : > { %10342 = vst [vmem:[#allocation71_spill] sm:$0xff] %v6507_v53  ;;  %v1599_v14 = vadd.f32 %v1567_v22, %v1478_v56  ;;  %v6567_v33 = vmax.f32 %v1668_v34, 0.0  ;;  %v1652_v61 = vadd.f32 %v6182_v12, %v10354_v1  ;;  %vm4204_vm6 = vcmask 1043456  }
 0x1a5   : > { %10343 = vst [vmem:[#allocation33_spill] sm:$0xff] %v6509_v11  ;;  %v1591_v20 = vadd.f32 %v1559_v24, %v1470_v47  ;;  %v6587_v8 = vmax.f32 %v1660_v4, 0.0 }
 0x1a6   : > { %v1651_v26 = vadd.f32 %v6182_v12, %v1599_v14  ;;  %10344 = vst [vmem:[#allocation90_spill] sm:$0xff] %v6519_v49  ;;  %v6601_v45 = vmax.f32 %v1652_v61, 0.0  ;;  %v1644_v12 = vadd.f32 %v6069_v59, %v10355_v57 }
 0x1a7   : > { %1735 = vrot.lane.b32.xlu0 %v6503_v52, %s4681_s28  ;;  %v1643_v28 = vadd.f32 %v6069_v59, %v1591_v20  ;;  %10346 = vst [vmem:[#allocation91_spill] sm:$0xff] %v6533_v46 }
 0x1a8   : > { %v6525_v36 = vmax.f32 %v1651_v26, 0.0  ;;  %10351 = vst [vmem:[#allocation116_spill] sm:$0xff] %v6567_v33  ;;  %v6617_v30 = vmax.f32 %v1644_v12, 0.0 }
 0x1a9   : > { %v6523_v17 = vmax.f32 %v1643_v28, 0.0  ;;  %10353 = vst [vmem:[#allocation42_spill] sm:$0xff] %v6587_v8 }
 0x1aa   : > { %1743 = vrot.lane.b32.xlu1 %v6507_v53, %s4681_s28  ;;  %1745 = vrot.lane.b32.xlu2 %v6509_v11, %s4681_s28  ;;  %10345 = vst [vmem:[#allocation38_spill] sm:$0xff] %v6525_v36 }
 0x1af   : > { %1741 = vrot.lane.b32.xlu0 %v6519_v49, %s4681_s28 }
 0x1b2   : > { %1749 = vrot.lane.b32.xlu1 %v6523_v17, %s4681_s28  ;;  %1751 = vrot.lane.b32.xlu2 %v6525_v36, %s4681_s28 }
 0x1b7   : > { %1747 = vrot.lane.b32.xlu0 %v6533_v46, %s4681_s28 }
 0x1ba   : > { %1971 = vrot.lane.b32.xlu1 %v6317_v44, %s4685_s15  ;;  %1961 = vrot.lane.b32.xlu2 %v6293_v29, %s4685_s15 }
 0x1bf   : > { %1963 = vrot.lane.b32.xlu0 %v6261_v54, %s4685_s15 }
 0x1c2   : > { %1959 = vrot.lane.b32.xlu1 %v6212_v48, %s4685_s15  ;;  %1967 = vrot.lane.b32.xlu2 %v6345_v21, %s4685_s15 }
 0x1c7   : > { %1969 = vrot.lane.b32.xlu0 %v6315_v42, %s4685_s15 }
 0x1ca   : > { %1957 = vrot.lane.b32.xlu1 %v6098_v50, %s4685_s15  ;;  %1965 = vrot.lane.b32.xlu2 %v6263_v0, %s4685_s15 }
 0x1cc   : > { %v6553_v18 = vpop.permute.xlu2 %1703 }
 0x1cf   : > { %1979 = vrot.lane.b32.xlu0 %v6442_v3, %s4685_s15 }
 0x1d1   : > { %v6583_v25 = vpop.permute.xlu1 %1701 }
 0x1d2   : > { %1975 = vrot.lane.b32.xlu1 %v10347_v41, %s4685_s15  ;;  %1973 = vrot.lane.b32.xlu2 %v6394_v55, %s4685_s15 }
 0x1d4   : > { %v6561_v63 = vpop.permute.xlu2 %1709 }
 0x1d5   : > { %10348 = vst [vmem:[#allocation25_spill] sm:$0xff] %v6561_v63 }
 0x1d7   : > { %1977 = vrot.lane.b32.xlu0 %v10350_v13, %s4685_s15 }
 0x1da   : > { %1891 = vrot.lane.b32.xlu1 %v6567_v33, %s4682_s29  ;;  %1833 = vrot.lane.b32.xlu2 %v6293_v29, %s4682_s29 }
 0x1dc   : > { %v6573_v31 = vpop.permute.xlu2 %1715 }
 0x1df   : > { %1835 = vrot.lane.b32.xlu0 %v6261_v54, %s4682_s29 }
 0x1e2   : > { %1831 = vrot.lane.b32.xlu1 %v6212_v48, %s4682_s29  ;;  %1843 = vrot.lane.b32.xlu2 %v6317_v44, %s4682_s29 }
 0x1e4   : > { %v6585_v58 = vpop.permute.xlu2 %1721 }
 0x1e7   : > { %1889 = vrot.lane.b32.xlu0 %v6587_v8, %s4682_s29 }
 0x1ea   : > { %1829 = vrot.lane.b32.xlu1 %v6098_v50, %s4682_s29  ;;  %1841 = vrot.lane.b32.xlu2 %v6315_v42, %s4682_s29 }
 0x1ec   : > { %v6597_v32 = vpop.permute.xlu1 %1707  ;;  %v6599_v5 = vpop.permute.xlu2 %1727 }
 0x1ef   : > { %1887 = vrot.lane.b32.xlu0 %v6601_v45, %s4682_s29 }
 0x1f1   : > { %v6605_v16 = vpop.permute.xlu0 %1705 }
 0x1f2   : > { %1763 = vrot.lane.b32.xlu1 %v6567_v33, %s4681_s28  ;;  %1839 = vrot.lane.b32.xlu2 %v6345_v21, %s4682_s29 }
 0x1f4   : > { %v6613_v62 = vpop.permute.xlu1 %1713  ;;  %v6615_v27 = vpop.permute.xlu2 %1733 }
 0x1f5   : > { %10356 = vst [vmem:[#allocation85_spill] sm:$0xff] %v6615_v27 }
 0x1f7   : > { %1885 = vrot.lane.b32.xlu0 %v6617_v30, %s4682_s29 }
 0x1f9   : > { %v6621_v15 = vpop.permute.xlu0 %1711 }
 0x1fa   : > { %1837 = vrot.lane.b32.xlu1 %v6263_v0, %s4682_s29  ;;  %1759 = vrot.lane.b32.xlu2 %v6601_v45, %s4681_s28 }
 0x1fc   : > { %v6627_v59 = vpop.permute.xlu1 %1719  ;;  %v6629_v24 = vpop.permute.xlu2 %1739 }
 0x1fd   : > { %10357 = vst [vmem:[#allocation67_spill] sm:$0xff] %v6629_v24 }
 0x1ff   : > { %1761 = vrot.lane.b32.xlu0 %v6587_v8, %s4681_s28 }
 0x201   : > { %v6633_v40 = vpop.permute.xlu0 %1717 }
 0x202   : > { %1987 = vrot.lane.b32.xlu1 %v6452_v19, %s4685_s15  ;;  %1995 = vrot.lane.b32.xlu2 %v6482_v7, %s4685_s15 }
 0x204   : > { %v6639_v39 = vpop.permute.xlu1 %1725  ;;  %v6641_v22 = vpop.permute.xlu2 %1745 }
 0x205   : > { %10358 = vst [vmem:[#allocation101_spill] sm:$0xff] %v6641_v22 }
 0x207   : > { %1757 = vrot.lane.b32.xlu0 %v6617_v30, %s4681_s28 }
 0x209   : > { %v6645_v47 = vpop.permute.xlu0 %1723 }
 0x20a   : > { %1993 = vrot.lane.b32.xlu1 %v6480_v38, %s4685_s15  ;;  %1983 = vrot.lane.b32.xlu2 %v6413_v6, %s4685_s15 }
 0x20c   : > { %v6651_v56 = vpop.permute.xlu1 %1731  ;;  %v6653_v20 = vpop.permute.xlu2 %1751 }
 0x20d   : > { %10359 = vst [vmem:[#allocation52_spill] sm:$0xff] %v6651_v56 }
 0x20e   : > { %10360 = vst [vmem:[#allocation44_spill] sm:$0xff] %v6653_v20 }
 0x20f   : > { %1985 = vrot.lane.b32.xlu0 %v6474_v23, %s4685_s15 }
 0x211   : > { %v6657_v14 = vpop.permute.xlu0 %1729 }
 0x212   : > { %1981 = vrot.lane.b32.xlu1 %v6411_v37, %s4685_s15  ;;  %1989 = vrot.lane.b32.xlu2 %v6454_v10, %s4685_s15 }
 0x214   : > { %v6663_v51 = vpop.permute.xlu1 %1737  ;;  %v6665_v28 = vpop.permute.xlu2 %1961 }
 0x215   : > { %10361 = vst [vmem:[#allocation92_spill] sm:$0xff] %v6663_v51 }
 0x216   : > { %10362 = vst [vmem:[#allocation109_spill] sm:$0xff] %v6665_v28 }
 0x217   : > { %1991 = vrot.lane.b32.xlu0 %v6503_v52, %s4685_s15 }
 0x219   : > { %v6669_v26 = vpop.permute.xlu0 %1735 }
 0x21a   : > { %10363 = vst [vmem:[#allocation87_spill] sm:$0xff] %v6669_v26  ;;  %1859 = vrot.lane.b32.xlu1 %v6452_v19, %s4682_s29  ;;  %2099 = vrot.lane.b32.xlu2 %v6317_v44, %s4687_s17 }
 0x21c   : > { %v6675_v2 = vpop.permute.xlu1 %1743  ;;  %v1968_v9 = vpop.permute.xlu2 %1967 }
 0x21d   : > { %10364 = vst [vmem:[#allocation32_spill] sm:$0xff] %v6675_v2 }
 0x21f   : > { %1851 = vrot.lane.b32.xlu0 %v6442_v3, %s4682_s29 }
 0x221   : > { %v6679_v34 = vpop.permute.xlu0 %1741 }
 0x222   : > { %10365 = vst [vmem:[#allocation113_spill] sm:$0xff] %v6679_v34  ;;  %1849 = vrot.lane.b32.xlu1 %v10350_v13, %s4682_s29  ;;  %1857 = vrot.lane.b32.xlu2 %v6474_v23, %s4682_s29  ;;  %v10370_v34 = vld [vmem:[#allocation83_spill] sm:$0xff] }
 0x224   : > { %v6685_v35 = vpop.permute.xlu1 %1749  ;;  %v1966_v4 = vpop.permute.xlu2 %1965 }
 0x225   : > { %10366 = vst [vmem:[#allocation82_spill] sm:$0xff] %v6685_v35 }
 0x227   : > { %2107 = vrot.lane.b32.xlu0 %v6442_v3, %s4687_s17 }
 0x229   : > { %v6689_v1 = vpop.permute.xlu0 %1747 }
 0x22a   : > { %10367 = vst [vmem:[#allocation102_spill] sm:$0xff] %v6689_v1  ;;  %2105 = vrot.lane.b32.xlu1 %v10350_v13, %s4687_s17  ;;  %1847 = vrot.lane.b32.xlu2 %v10347_v41, %s4682_s29 }
 0x22c   : > { %v1972_v61 = vpop.permute.xlu1 %1971  ;;  %v6695_v57 = vpop.permute.xlu2 %1973 }
 0x22f   : > { %2097 = vrot.lane.b32.xlu0 %v6315_v42, %s4687_s17 }
 0x231   : > { %v6699_v12 = vpop.permute.xlu0 %1963 }
 0x232   : > { %10368 = vst [vmem:[#allocation30_spill] sm:$0xff] %v6699_v12  ;;  %2095 = vrot.lane.b32.xlu1 %v6345_v21, %s4687_s17  ;;  %2103 = vrot.lane.b32.xlu2 %v10347_v41, %s4687_s17  ;;  %v2048_v20 = vsel %vm1270_vm2, %v6699_v12, %v1972_v61 }
 0x233   : > { %v2077_v2 = vmul.f32 %v10370_v34, %v2048_v20 }
 0x234   : > { %v6709_v22 = vpop.permute.xlu1 %1959  ;;  %v6711_v27 = vpop.permute.xlu2 %1833 }
 0x235   : > { %10371 = vst [vmem:[#allocation15_spill] sm:$0xff] %v6709_v22  ;;  %2278 = vmatpush.msra.mxu0 %v2077_v2  ;;  %v2046_v20 = vsel %vm1270_vm2, %v6709_v22, %v1968_v9 }
 0x236   : > { %v2061_v24 = vmul.f32 %v10370_v34, %v2046_v20 }
 0x237   : > { %1855 = vrot.lane.b32.xlu0 %v6413_v6, %s4682_s29 }
 0x239   : > { %v1970_v1 = vpop.permute.xlu0 %1969 }
 0x23a   : > { %1853 = vrot.lane.b32.xlu1 %v6411_v37, %s4682_s29  ;;  %2093 = vrot.lane.b32.xlu2 %v6263_v0, %s4687_s17  ;;  %v2047_v12 = vsel %vm1270_vm2, %v6665_v28, %v1970_v1 }
 0x23b   : > { %v2069_v2 = vmul.f32 %v10370_v34, %v2047_v12 }
 0x23c   : > { %v6726_v26 = vpop.permute.xlu1 %1957  ;;  %v6728_v51 = vpop.permute.xlu2 %1843 }
 0x23d   : > { %10372 = vst [vmem:[#allocation27_spill] sm:$0xff] %v6726_v26  ;;  %2279 = vmatpush.msra.mxu0 %v2069_v2  ;;  %v2045_v41 = vsel %vm1270_vm2, %v6726_v26, %v1966_v4 }
 0x23e   : > { %v2053_v13 = vmul.f32 %v10370_v34, %v2045_v41  ;;  %v10373_v41 = vld [vmem:[#allocation55_spill] sm:$0xff] }
 0x23f   : > { %1845 = vrot.lane.b32.xlu0 %v6394_v55, %s4682_s29  ;;  %2280 = vmatpush.msra.mxu0 %v2061_v24 }
 0x241   : > { %2281 = vmatpush.msra.mxu0 %v2053_v13  ;;  %v6737_v22 = vpop.permute.xlu0 %1979 }
 0x242   : > { %2091 = vrot.lane.b32.xlu1 %v6261_v54, %s4687_s17  ;;  %2115 = vrot.lane.b32.xlu2 %v6452_v19, %s4687_s17  ;;  %v2044_v12 = vsel %vm1270_vm2, %v1972_v61, %v6737_v22 }
 0x243   : > { %2282 = vmatpush.msra.mxu0 %v6261_v54  ;;  %v2078_v20 = vmul.f32 %v10373_v41, %v2044_v12 }
 0x244   : > { %v6748_v2 = vpop.permute.xlu1 %1975  ;;  %v6750_v24 = vpop.permute.xlu2 %1841 }
 0x245   : > { %2283 = vmatpush.msra.mxu0 %v6293_v29  ;;  %2360 = vmatpush.msra.mxu2 %v2078_v20  ;;  %v2042_v61 = vsel %vm1270_vm2, %v1968_v9, %v6748_v2 }
 0x246   : > { %v2062_v26 = vmul.f32 %v10373_v41, %v2042_v61 }
 0x247   : > { %2101 = vrot.lane.b32.xlu0 %v6394_v55, %s4687_s17  ;;  %2284 = vmatpush.msra.mxu0 %v6212_v48 }
 0x249   : > { %2285 = vmatpush.msra.mxu0 %v6098_v50  ;;  %v6757_v13 = vpop.permute.xlu0 %1977 }
 0x24a   : > { %2089 = vrot.lane.b32.xlu1 %v6293_v29, %s4687_s17  ;;  %2113 = vrot.lane.b32.xlu2 %v6474_v23, %s4687_s17  ;;  %v2043_v54 = vsel %vm1270_vm2, %v1970_v1, %v6757_v13  ;;  %v2041_v29 = vsel %vm1270_vm2, %v1966_v4, %v6695_v57 }
 0x24b   : > { %v2070_v12 = vmul.f32 %v10373_v41, %v2043_v54  ;;  %v2054_v1 = vmul.f32 %v10373_v41, %v2041_v29  ;;  %v10375_v54 = vld [vmem:[#allocation84_spill] sm:$0xff] }
 0x24c   : > { %v6770_v20 = vpop.permute.xlu1 %1891  ;;  %v6772_v34 = vpop.permute.xlu2 %1839 }
 0x24d   : > { %10374 = vst [vmem:[#allocation112_spill] sm:$0xff] %v6770_v20  ;;  %2361 = vmatpush.msra.mxu2 %v2070_v12 }
 0x24f   : > { %2123 = vrot.lane.b32.xlu0 %v6482_v7, %s4687_s17  ;;  %2362 = vmatpush.msra.mxu2 %v2062_v26 }
 0x251   : > { %2363 = vmatpush.msra.mxu2 %v2054_v1  ;;  %v1836_v9 = vpop.permute.xlu0 %1835  ;;  %v10378_v1 = vld [vmem:[#allocation53_spill] sm:$0xff] }
 0x252   : > { %2087 = vrot.lane.b32.xlu1 %v6212_v48, %s4687_s17  ;;  %2111 = vrot.lane.b32.xlu2 %v6413_v6, %s4687_s17  ;;  %v1924_v4 = vsel %vm1069_vm5, %v6770_v20, %v1836_v9  ;;  %v1920_v48 = vsel %vm1069_vm5, %v1836_v9, %v6728_v51 }
 0x253   : > { %2364 = vmatpush.msra.mxu2 %v6317_v44  ;;  %v1949_v61 = vmul.f32 %v10375_v54, %v1924_v4  ;;  %v1919_v44 = vsel %vm1069_vm5, %v6711_v27, %v6750_v24 }
 0x254   : > { %v1832_v12 = vpop.permute.xlu1 %1831  ;;  %v6790_v26 = vpop.permute.xlu2 %1759  ;;  %v1942_v4 = vmul.f32 %v10378_v1, %v1919_v44 }
 0x255   : > { %10376 = vst [vmem:[#allocation110_spill] sm:$0xff] %v6790_v26  ;;  %2286 = vmatpush.msra.mxu0 %v1949_v61  ;;  %2365 = vmatpush.msra.mxu2 %v6315_v42  ;;  %v1950_v42 = vmul.f32 %v10378_v1, %v1920_v48  ;;  %v1918_v9 = vsel %vm1069_vm5, %v1832_v12, %v6772_v34 }
 0x256   : > { %v1934_v20 = vmul.f32 %v10378_v1, %v1918_v9 }
 0x257   : > { %2121 = vrot.lane.b32.xlu0 %v6480_v38, %s4687_s17  ;;  %2366 = vmatpush.msra.mxu2 %v6345_v21 }
 0x259   : > { %2367 = vmatpush.msra.mxu2 %v6263_v0  ;;  %v6804_v29 = vpop.permute.xlu0 %1889 }
 0x25a   : > { %10377 = vst [vmem:[#allocation93_spill] sm:$0xff] %v6804_v29  ;;  %2085 = vrot.lane.b32.xlu1 %v6098_v50, %s4687_s17  ;;  %2109 = vrot.lane.b32.xlu2 %v6411_v37, %s4687_s17  ;;  %v1923_v21 = vsel %vm1069_vm5, %v6804_v29, %v6711_v27  ;;  %v10380_v50 = vld [vmem:[#allocation103_spill] sm:$0xff] }
 0x25b   : > { %2368 = vmatpush.msra.mxu2 %v1950_v42  ;;  %v1941_v0 = vmul.f32 %v10375_v54, %v1923_v21  ;;  %v1667_v41 = vadd.f32 %v6232_v60, %v10380_v50 }
 0x25c   : > { %v1830_v61 = vpop.permute.xlu1 %1829  ;;  %v6820_v48 = vpop.permute.xlu2 %1995 }
 0x25d   : > { %10379 = vst [vmem:[#allocation77_spill] sm:$0xff] %v6820_v48  ;;  %2287 = vmatpush.msra.mxu0 %v1941_v0  ;;  %2369 = vmatpush.msra.mxu2 %v1942_v4  ;;  %v6827_v27 = vmax.f32 %v1667_v41, 0.0  ;;  %v10384_v41 = vld [vmem:[#allocation89_spill] sm:$0xff] }
 0x25f   : > { %2119 = vrot.lane.b32.xlu0 %v6503_v52, %s4687_s17  ;;  %2370 = vmatpush.msra.mxu2 %v1934_v20  ;;  %10381 = vst [vmem:[#allocation114_spill] sm:$0xff] %v6827_v27  ;;  %v1659_v20 = vadd.f32 %v6271_v43, %v10384_v41  ;;  %v10387_v41 = vld [vmem:[#allocation63_spill] sm:$0xff] }
 0x261   : > { %v6829_v42 = vpop.permute.xlu0 %1887  ;;  %v6847_v0 = vmax.f32 %v1659_v20, 0.0 }
 0x262   : > { %10382 = vst [vmem:[#allocation51_spill] sm:$0xff] %v6829_v42  ;;  %2003 = vrot.lane.b32.xlu1 %v6533_v46, %s4685_s15  ;;  %2011 = vrot.lane.b32.xlu2 %v6827_v27, %s4685_s15  ;;  %v1922_v60 = vsel %vm1069_vm5, %v6829_v42, %v1832_v12 }
 0x263   : > { %v1933_v44 = vmul.f32 %v10375_v54, %v1922_v60 }
 0x264   : > { %v6839_v21 = vpop.permute.xlu1 %1763  ;;  %v6841_v9 = vpop.permute.xlu2 %1983 }
 0x265   : > { %10383 = vst [vmem:[#allocation75_spill] sm:$0xff] %v6839_v21  ;;  %2288 = vmatpush.msra.mxu0 %v1933_v44  ;;  %v1796_v43 = vsel %vm948_vm1, %v6839_v21, %v6597_v32  ;;  %v1792_v21 = vsel %vm948_vm1, %v6597_v32, %v6573_v31 }
 0x266   : > { %v1821_v20 = vmul.f32 %v10387_v41, %v1796_v43 }
 0x267   : > { %2117 = vrot.lane.b32.xlu0 %v6454_v10, %s4687_s17 }
 0x269   : > { %v6849_v4 = vpop.permute.xlu0 %1885 }
 0x26a   : > { %10385 = vst [vmem:[#allocation31_spill] sm:$0xff] %v6849_v4  ;;  %2009 = vrot.lane.b32.xlu1 %v6847_v0, %s4685_s15  ;;  %1999 = vrot.lane.b32.xlu2 %v6507_v53, %s4685_s15  ;;  %v1921_v12 = vsel %vm1069_vm5, %v6849_v4, %v1830_v61 }
 0x26b   : > { %v1925_v50 = vmul.f32 %v10375_v54, %v1921_v12  ;;  %v1791_v12 = vsel %vm948_vm1, %v6605_v16, %v6613_v62 }
 0x26c   : > { %v6863_v60 = vpop.permute.xlu1 %1837  ;;  %v6865_v44 = vpop.permute.xlu2 %1989 }
 0x26d   : > { %10386 = vst [vmem:[#allocation108_spill] sm:$0xff] %v6865_v44  ;;  %2289 = vmatpush.msra.mxu0 %v1925_v50  ;;  %v1917_v42 = vsel %vm1069_vm5, %v1830_v61, %v6863_v60  ;;  %v10389_v61 = vld [vmem:[#allocation64_spill] sm:$0xff] }
 0x26e   : > { %v1926_v4 = vmul.f32 %v10378_v1, %v1917_v42  ;;  %v1822_v50 = vmul.f32 %v10389_v61, %v1792_v21  ;;  %v1790_v42 = vsel %vm948_vm1, %v6553_v18, %v6621_v15 }
 0x26f   : > { %2001 = vrot.lane.b32.xlu0 %v6509_v11, %s4685_s15  ;;  %2290 = vmatpush.msra.mxu0 %v1821_v20  ;;  %v1794_v20 = vsel %vm948_vm1, %v6790_v26, %v6553_v18 }
 0x270   : > { %2371 = vmatpush.msra.mxu2 %v1926_v4  ;;  %v1814_v4 = vmul.f32 %v10389_v61, %v1791_v12  ;;  %v1806_v12 = vmul.f32 %v10389_v61, %v1790_v42 }
 0x271   : > { %v6882_v43 = vpop.permute.xlu0 %1761 }
 0x272   : > { %10388 = vst [vmem:[#allocation106_spill] sm:$0xff] %v6882_v43  ;;  %1997 = vrot.lane.b32.xlu1 %v6519_v49, %s4685_s15  ;;  %2005 = vrot.lane.b32.xlu2 %v6523_v17, %s4685_s15  ;;  %v1795_v32 = vsel %vm948_vm1, %v6882_v43, %v6605_v16  ;;  %v1789_v16 = vsel %vm948_vm1, %v6583_v25, %v6561_v63 }
 0x273   : > { %2372 = vmatpush.msra.mxu2 %v1822_v50  ;;  %v1813_v21 = vmul.f32 %v10387_v41, %v1795_v32  ;;  %v1805_v50 = vmul.f32 %v10387_v41, %v1794_v20  ;;  %v1798_v18 = vmul.f32 %v10389_v61, %v1789_v16  ;;  %v1782_v63 = vsel %vm948_vm1, %v6627_v59, %v6599_v5 }
 0x274   : > { %v6903_v54 = vpop.permute.xlu1 %1987  ;;  %v6905_v1 = vpop.permute.xlu2 %2099 }
 0x275   : > { %2373 = vmatpush.msra.mxu2 %v1814_v4  ;;  %2291 = vmatpush.msra.mxu0 %v1813_v21  ;;  %v6926_v4 = vld [vmem:[#allocation3] sm:$0xff]  ;;  %v2036_v61 = vsel %vm1270_vm2, %v6903_v54, %v6820_v48 }
 0x277   : > { %2374 = vmatpush.msra.mxu2 %v1806_v12  ;;  %2007 = vrot.lane.b32.xlu0 %v6525_v36, %s4685_s15  ;;  %v10393_v12 = vld [vmem:[#allocation47_spill] sm:$0xff] }
 0x278   : > { %2292 = vmatpush.msra.mxu0 %v1805_v50  ;;  %v2080_v50 = vmul.f32 %v10393_v12, %v2036_v61 }
 0x279   : > { %2375 = vmatpush.msra.mxu2 %v1798_v18  ;;  %v6916_v32 = vpop.permute.xlu0 %1757  ;;  %v6952_v18 = vld [vmem:[#allocation3 + $0x10] sm:$0xff] }
 0x27a   : > { %10390 = vst [vmem:[#allocation115_spill] sm:$0xff] %v6916_v32  ;;  %1875 = vrot.lane.b32.xlu1 %v6533_v46, %s4682_s29  ;;  %1865 = vrot.lane.b32.xlu2 %v6480_v38, %s4682_s29  ;;  %v1793_v42 = vsel %vm948_vm1, %v6916_v32, %v6583_v25  ;;  %v6973_v32 = vld [vmem:[#allocation3 + $0x20] sm:$0xff] }
 0x27b   : > { %v1797_v21 = vmul.f32 %v10387_v41, %v1793_v42  ;;  %2376 = vmatmul.f32.vlgmr.msra.gmra.mxu2 %v6926_v4 }
 0x27c   : > { %v6934_v20 = vpop.permute.xlu1 %1993  ;;  %v6936_v16 = vpop.permute.xlu2 %1857 }
 0x27d   : > { %10391 = vst [vmem:[#allocation68_spill] sm:$0xff] %v6934_v20  ;;  %2293 = vmatpush.msra.mxu0 %v1797_v21 }
 0x27e   : > { %10392 = vst [vmem:[#allocation107_spill] sm:$0xff] %v6936_v16  ;;  %2294 = vmatmul.f32.vlgmr.msra.gmra.mxu0 %v6926_v4 }
 0x27f   : > { %2524 = vmatpush.msrb.mxu0 %v2080_v50  ;;  %1867 = vrot.lane.b32.xlu0 %v6482_v7, %s4682_s29 }
 0x281   : > { %v6942_v25 = vpop.permute.xlu0 %1985 }
 0x282   : > { %1863 = vrot.lane.b32.xlu1 %v6503_v52, %s4682_s29  ;;  %1871 = vrot.lane.b32.xlu2 %v6507_v53, %s4682_s29  ;;  %v2035_v41 = vsel %vm1270_vm2, %v6942_v25, %v6934_v20 }
 0x283   : > { %v2072_v42 = vmul.f32 %v10393_v12, %v2035_v41  ;;  %2379 = vmatmul.f32.gmra.mxu2 %v6952_v18 }
 0x284   : > { %v6956_v61 = vpop.permute.xlu1 %1981  ;;  %v6958_v21 = vpop.permute.xlu2 %1847 }
 0x285   : > { %2525 = vmatpush.msrb.mxu0 %v2072_v42  ;;  %v2033_v42 = vsel %vm1270_vm2, %v6956_v61, %v6865_v44  ;;  %v7076_v44 = vld [vmem:[#allocation3 + $0x60] sm:$0xff] }
 0x286   : > { %2297 = vmatmul.f32.gmra.mxu0 %v6952_v18  ;;  %v2056_v28 = vmul.f32 %v10393_v12, %v2033_v42  ;;  %10399 = vst [vmem:[#allocation96_spill] sm:$0xff] %v7076_v44 }
 0x287   : > { %1873 = vrot.lane.b32.xlu0 %v6509_v11, %s4682_s29 }
 0x289   : > { %v6963_v50 = vpop.permute.xlu0 %1991 }
 0x28a   : > { %10394 = vst [vmem:[#allocation12_spill] sm:$0xff] %v6963_v50  ;;  %2139 = vrot.lane.b32.xlu1 %v6827_v27, %s4687_s17  ;;  %1861 = vrot.lane.b32.xlu2 %v6454_v10, %s4682_s29  ;;  %v2034_v41 = vsel %vm1270_vm2, %v6841_v9, %v6963_v50 }
 0x28b   : > { %v2064_v26 = vmul.f32 %v10393_v12, %v2034_v41  ;;  %2382 = vmatmul.f32.gmra.mxu2 %v6973_v32  ;;  %v6996_v41 = vld [vmem:[#allocation3 + $0x30] sm:$0xff] }
 0x28c   : > { %v6981_v43 = vpop.permute.xlu1 %1859  ;;  %v6983_v29 = vpop.permute.xlu2 %2103 }
 0x28d   : > { %10395 = vst [vmem:[#allocation13_spill] sm:$0xff] %v6981_v43  ;;  %2526 = vmatpush.msrb.mxu0 %v2064_v26 }
 0x28e   : > { %2300 = vmatmul.f32.gmra.mxu0 %v6973_v32 }
 0x28f   : > { %2131 = vrot.lane.b32.xlu0 %v6533_v46, %s4687_s17  ;;  %2527 = vmatpush.msrb.mxu0 %v2056_v28  ;;  %v10396_v28 = vld [vmem:[#allocation45_spill] sm:$0xff] }
 0x291   : > { %2528 = vmatpush.msrb.mxu0 %v6452_v19  ;;  %v6990_v10 = vpop.permute.xlu0 %1851 }
 0x292   : > { %2129 = vrot.lane.b32.xlu1 %v6509_v11, %s4687_s17  ;;  %2137 = vrot.lane.b32.xlu2 %v6847_v0, %s4687_s17  ;;  %v1912_v19 = vsel %vm1069_vm5, %v6990_v10, %v6981_v43 }
 0x293   : > { %2529 = vmatpush.msrb.mxu0 %v6474_v23  ;;  %2385 = vmatmul.f32.gmra.mxu2 %v6996_v41  ;;  %v1952_v12 = vmul.f32 %v10396_v28, %v1912_v19 }
 0x294   : > { %v7000_v26 = vpop.permute.xlu1 %1849  ;;  %v7002_v42 = vpop.permute.xlu2 %2093 }
 0x295   : > { %2530 = vmatpush.msrb.mxu0 %v6413_v6  ;;  %v1911_v23 = vsel %vm1069_vm5, %v7000_v26, %v6936_v16  ;;  %v7029_v16 = vld [vmem:[#allocation3 + $0x40] sm:$0xff] }
 0x296   : > { %2303 = vmatmul.f32.gmra.mxu0 %v6996_v41  ;;  %v1944_v43 = vmul.f32 %v10396_v28, %v1911_v23 }
 0x297   : > { %1869 = vrot.lane.b32.xlu0 %v6519_v49, %s4682_s29  ;;  %2531 = vmatpush.msrb.mxu0 %v6411_v37  ;;  %v10397_v37 = vld [vmem:[#allocation86_spill] sm:$0xff] }
 0x299   : > { %2532 = vmatpush.msrb.mxu0 %v1952_v12  ;;  %v7018_v52 = vpop.permute.xlu0 %2107 }
 0x29a   : > { %2135 = vrot.lane.b32.xlu1 %v6525_v36, %s4687_s17  ;;  %2125 = vrot.lane.b32.xlu2 %v6519_v49, %s4687_s17  ;;  %v2172_v6 = vsel %vm1391_vm10, %v6905_v1, %v7018_v52 }
 0x29b   : > { %2533 = vmatpush.msrb.mxu0 %v1944_v43  ;;  %v2206_v12 = vmul.f32 %v10397_v37, %v2172_v6  ;;  %2388 = vmatmul.f32.gmra.mxu2 %v7029_v16  ;;  %v7050_v6 = vld [vmem:[#allocation3 + $0x50] sm:$0xff] }
 0x29c   : > { %v7033_v19 = vpop.permute.xlu1 %2105  ;;  %v7035_v23 = vpop.permute.xlu2 %2115 }
 0x29d   : > { %2413 = vmatpush.msra.mxu3 %v2206_v12 }
 0x29e   : > { %2306 = vmatmul.f32.gmra.mxu0 %v7029_v16 }
 0x29f   : > { %2127 = vrot.lane.b32.xlu0 %v6507_v53, %s4687_s17 }
 0x2a1   : > { %v7040_v38 = vpop.permute.xlu0 %2097 }
 0x2a2   : > { %2019 = vrot.lane.b32.xlu1 %v6567_v33, %s4685_s15  ;;  %2017 = vrot.lane.b32.xlu2 %v6587_v8, %s4685_s15  ;;  %v2171_v43 = vsel %vm1391_vm10, %v7040_v38, %v7033_v19 }
 0x2a3   : > { %v2198_v12 = vmul.f32 %v10397_v37, %v2171_v43  ;;  %2391 = vmatmul.f32.gmra.mxu2 %v7050_v6 }
 0x2a4   : > { %v7054_v7 = vpop.permute.xlu1 %2095  ;;  %v7056_v49 = vpop.permute.xlu2 %2113 }
 0x2a5   : > { %2414 = vmatpush.msra.mxu3 %v2198_v12  ;;  %v2170_v53 = vsel %vm1391_vm10, %v7054_v7, %v6983_v29 }
 0x2a6   : > { %2309 = vmatmul.f32.gmra.mxu0 %v7050_v6  ;;  %v2190_v11 = vmul.f32 %v10397_v37, %v2170_v53 }
 0x2a7   : > { %2133 = vrot.lane.b32.xlu0 %v6523_v17, %s4687_s17 }
 0x2a8   : > { %2415 = vmatpush.msra.mxu3 %v2190_v11 }
 0x2a9   : > { %v7066_v43 = vpop.permute.xlu0 %1855 }
 0x2aa   : > { %10398 = vst [vmem:[#allocation34_spill] sm:$0xff] %v7066_v43  ;;  %2013 = vrot.lane.b32.xlu1 %v6617_v30, %s4685_s15  ;;  %1883 = vrot.lane.b32.xlu2 %v6827_v27, %s4682_s29  ;;  %v1910_v12 = vsel %vm1069_vm5, %v6958_v21, %v7066_v43  ;;  %v7097_v43 = vld [vmem:[#allocation3 + $0x70] sm:$0xff] }
 0x2ab   : > { %v1936_v53 = vmul.f32 %v10396_v28, %v1910_v12  ;;  %2394 = vmatmul.f32.gmra.mxu2 %v7076_v44 }
 0x2ac   : > { %v7080_v11 = vpop.permute.xlu1 %1853  ;;  %v7082_v46 = vpop.permute.xlu2 %2111 }
 0x2ad   : > { %10400 = vst [vmem:[#allocation20_spill] sm:$0xff] %v7080_v11  ;;  %2534 = vmatpush.msrb.mxu0 %v1936_v53  ;;  %v1784_v53 = vsel %vm948_vm1, %v6645_v47, %v6651_v56 }
 0x2ae   : > { %2312 = vmatmul.f32.gmra.mxu0 %v7076_v44 }
 0x2af   : > { %2015 = vrot.lane.b32.xlu0 %v6601_v45, %s4685_s15 }
 0x2b1   : > { %v7087_v50 = vpop.permute.xlu0 %1845 }
 0x2b2   : > { %1879 = vrot.lane.b32.xlu1 %v6525_v36, %s4682_s29  ;;  %2147 = vrot.lane.b32.xlu2 %v6567_v33, %s4687_s17  ;;  %v1909_v12 = vsel %vm1069_vm5, %v7087_v50, %v7080_v11  ;;  %v1783_v33 = vsel %vm948_vm1, %v6585_v58, %v6657_v14  ;;  %v10402_v11 = vld [vmem:[#allocation72_spill] sm:$0xff] }
 0x2b3   : > { %v1928_v44 = vmul.f32 %v10396_v28, %v1909_v12  ;;  %2397 = vmatmul.f32.gmra.mxu2 %v7097_v43  ;;  %v1824_v48 = vmul.f32 %v10402_v11, %v1784_v53  ;;  %v10403_v12 = vld [vmem:[#allocation61_spill] sm:$0xff] }
 0x2b4   : > { %v7105_v36 = vpop.permute.xlu1 %2091  ;;  %v7107_v20 = vpop.permute.xlu2 %2109 }
 0x2b5   : > { %10401 = vst [vmem:[#allocation21_spill] sm:$0xff] %v7105_v36  ;;  %2535 = vmatpush.msrb.mxu0 %v1928_v44  ;;  %v2176_v56 = vsel %vm1391_vm10, %v7105_v36, %v6905_v1  ;;  %v1816_v44 = vmul.f32 %v10402_v11, %v1783_v33  ;;  %v1781_v1 = vsel %vm948_vm1, %v6633_v40, %v6639_v39 }
 0x2b6   : > { %2315 = vmatmul.f32.gmra.mxu0 %v7097_v43  ;;  %v2205_v28 = vmul.f32 %v10403_v12, %v2176_v56  ;;  %v1808_v56 = vmul.f32 %v10402_v11, %v1782_v63  ;;  %v1800_v63 = vmul.f32 %v10402_v11, %v1781_v1  ;;  %v2167_v36 = vsel %vm1391_vm10, %v7033_v19, %v7056_v49 }
 0x2b7   : > { %1881 = vrot.lane.b32.xlu0 %v6847_v0, %s4682_s29  ;;  %2536 = vmatpush.msrb.mxu0 %v1824_v48  ;;  %v2168_v48 = vsel %vm1391_vm10, %v7018_v52, %v7035_v23  ;;  %v10404_v52 = vld [vmem:[#allocation54_spill] sm:$0xff]  ;;  %v2166_v19 = vsel %vm1391_vm10, %v6983_v29, %v7082_v46 }
 0x2b8   : > { %2331 = vmatpush.msra.mxu1 %v2205_v28  ;;  %v2199_v1 = vmul.f32 %v10404_v52, %v2167_v36 }
 0x2b9   : > { %2537 = vmatpush.msrb.mxu0 %v1816_v44  ;;  %v2102_v53 = vpop.permute.xlu0 %2101  ;;  %v7145_v44 = vld [vmem:[#allocation3 + $0x8] sm:$0xff] }
 0x2ba   : > { %2145 = vrot.lane.b32.xlu1 %v6587_v8, %s4687_s17  ;;  %1755 = vrot.lane.b32.xlu2 %v6827_v27, %s4681_s28  ;;  %v2169_v33 = vsel %vm1391_vm10, %v7002_v42, %v2102_v53 }
 0x2bb   : > { %2538 = vmatpush.msrb.mxu0 %v1808_v56  ;;  %v2182_v28 = vmul.f32 %v10397_v37, %v2169_v33  ;;  %v2207_v56 = vmul.f32 %v10404_v52, %v2168_v48  ;;  %v2191_v48 = vmul.f32 %v10404_v52, %v2166_v19  ;;  %v374_v19 = vld [vmem:[%s9756_s4 + $0x10] sm:$0xff] }
 0x2bc   : > { %v7147_v8 = vpop.permute.xlu1 %2089  ;;  %v7149_v27 = vpop.permute.xlu2 %2011 }
 0x2bd   : > { %2416 = vmatpush.msra.mxu3 %v2182_v28  ;;  %2539 = vmatpush.msrb.mxu0 %v1800_v63  ;;  %v2175_v37 = vsel %vm1391_vm10, %v7147_v8, %v7040_v38  ;;  %v2165_v38 = vsel %vm1391_vm10, %v2102_v53, %v7107_v20  ;;  %v10405_v53 = vld [vmem:[#allocation94_spill] sm:$0xff] }
 0x2be   : > { %4359 = vmatmul.msk.f32.vlgmr.msra.gmra.mxu3 %vm2253_vm15, %v7145_v44  ;;  %2540 = vmatmul.f32.vlgmr.msrb.gmra.mxu0 %v6926_v4  ;;  %v2197_v11 = vmul.f32 %v10403_v12, %v2175_v37  ;;  %v2183_v29 = vmul.f32 %v10404_v52, %v2165_v38  ;;  %v7191_v37 = vld [vmem:[#allocation3 + $0x18] sm:$0xff]  ;;  %v373_v52 = vld [vmem:[%s9756_s4 + $0x8] sm:$0xff] }
 0x2bf   : > { %2495 = vmatpush.msrb.mxu3 %v2207_v56  ;;  %1877 = vrot.lane.b32.xlu0 %v6523_v17, %s4682_s29 }
 0x2c0   : > { %2332 = vmatpush.msra.mxu1 %v2197_v11 }
 0x2c1   : > { %2496 = vmatpush.msrb.mxu3 %v2199_v1  ;;  %v7174_v33 = vpop.permute.xlu0 %2123 }
 0x2c2   : > { %1753 = vrot.lane.b32.xlu1 %v6847_v0, %s4681_s28  ;;  %2141 = vrot.lane.b32.xlu2 %v6617_v30, %s4687_s17  ;;  %v2164_v36 = vsel %vm1391_vm10, %v7035_v23, %v7174_v33 }
 0x2c3   : > { %2497 = vmatpush.msrb.mxu3 %v2191_v48  ;;  %v2208_v28 = vmul.f32 %v10405_v53, %v2164_v36 }
 0x2c4   : > { %v7187_v63 = vpop.permute.xlu1 %2087  ;;  %v7189_v56 = vpop.permute.xlu2 %1999 }
 0x2c5   : > { %2498 = vmatpush.msrb.mxu3 %v2183_v29  ;;  %2577 = vmatpush.msrb.mxu2 %v2208_v28  ;;  %v2174_v11 = vsel %vm1391_vm10, %v7187_v63, %v7054_v7  ;;  %v7220_v29 = vld [vmem:[#allocation3 + $0x28] sm:$0xff] }
 0x2c6   : > { %2543 = vmatmul.f32.gmra.mxu0 %v6952_v18  ;;  %v2189_v23 = vmul.f32 %v10403_v12, %v2174_v11  ;;  %4360 = vmatmul.msk.f32.gmra.mxu3 %vm2253_vm15, %v7191_v37 }
 0x2c7   : > { %4451 = vmatpush.msra.mxu3 %v2208_v28  ;;  %2143 = vrot.lane.b32.xlu0 %v6601_v45, %s4687_s17  ;;  %v372_v28 = vld [vmem:[%s9756_s4] sm:$0xff]  ;;  %s4209_s17 = scalar_lea.sflag [#allocation5], %s340_s27 }
 0x2c8   : > { %2333 = vmatpush.msra.mxu1 %v2189_v23 }
 0x2c9   : > { %v7209_v7 = vpop.permute.xlu0 %2121 }
 0x2ca   : > { %2220 = vperm.xlu1 %4559, %v373_v52   ;;  %2225 = vperm.xlu2 %4558, %v374_v19   ;;  %v2163_v1 = vsel %vm1391_vm10, %v7056_v49, %v7209_v7  ;;  %v2040_v49 = vsel %vm1270_vm2, %v6737_v22, %v6903_v54  ;;  %v376_v52 = vld [vmem:[%s9756_s4 + $0x20] sm:$0xff]  ;;  %v10406_v19 = vld [vmem:[#allocation56_spill] sm:$0xff] }
 0x2cb   : > { %v2200_v38 = vmul.f32 %v10405_v53, %v2163_v1  ;;  %v2079_v22 = vmul.f32 %v10406_v19, %v2040_v49  ;;  %v377_v54 = vld [vmem:[%s9756_s4 + $0x28] sm:$0xff]  ;;  %v2038_v1 = vsel %vm1270_vm2, %v6748_v2, %v6841_v9  ;;  %v7271_v49 = vld [vmem:[#allocation3 + $0x38] sm:$0xff] }
 0x2cc   : > { %v7216_v48 = vpop.permute.xlu1 %2085  ;;  %v7218_v36 = vpop.permute.xlu2 %2005  ;;  %v2063_v9 = vmul.f32 %v10406_v19, %v2038_v1 }
 0x2cd   : > { %2578 = vmatpush.msrb.mxu2 %v2200_v38  ;;  %4452 = vmatpush.msra.mxu3 %v2200_v38  ;;  %v2173_v11 = vsel %vm1391_vm10, %v7216_v48, %v7002_v42  ;;  %v2039_v42 = vsel %vm1270_vm2, %v6757_v13, %v6942_v25 }
 0x2ce   : > { %2546 = vmatmul.f32.gmra.mxu0 %v6973_v32  ;;  %v2181_v23 = vmul.f32 %v10403_v12, %v2173_v11  ;;  %4361 = vmatmul.msk.f32.gmra.mxu3 %vm2253_vm15, %v7220_v29  ;;  %v2071_v13 = vmul.f32 %v10406_v19, %v2039_v42  ;;  %v379_v42 = vld [vmem:[%s9756_s4 + $0x38] sm:$0xff] }
 0x2cf   : > { %2215 = vperm.xlu0 %4555, %v372_v28   ;;  %v2037_v28 = vsel %vm1270_vm2, %v6695_v57, %v6956_v61  ;;  %v10407_v57 = vld [vmem:[#allocation40_spill] sm:$0xff] }
 0x2d0   : > { %2334 = vmatpush.msra.mxu1 %v2181_v23 }
 0x2d1   : > { %4351 = vmatmul.msk.f32.vlgmr.msra.gmra.mxu1 %vm2253_vm15, %v7145_v44  ;;  %v7250_v12 = vpop.permute.xlu0 %2119 }
 0x2d2   : > { %2442 = vmatpush.msrb.mxu1 %v2079_v22  ;;  %2235 = vperm.xlu1 %4559, %v376_v52   ;;  %v2162_v25 = vsel %vm1391_vm10, %v7082_v46, %v7250_v12  ;;  %v375_v46 = vld [vmem:[%s9756_s4 + $0x18] sm:$0xff]  ;;  %v2055_v52 = vmul.f32 %v10406_v19, %v2037_v28  ;;  %v7303_v28 = vld [vmem:[#allocation3 + $0x48] sm:$0xff] }
 0x2d3   : > { %2240 = vperm.xlu2 %4558, %v377_v54   ;;  %v2192_v38 = vmul.f32 %v10405_v53, %v2162_v25 }
 0x2d4   : > { %2443 = vmatpush.msrb.mxu1 %v2071_v13  ;;  %v7266_v11 = vpop.permute.xlu1 %2003  ;;  %v7268_v2 = vpop.permute.xlu2 %1865  ;;  %v10408_v13 = vld [vmem:[#allocation76_spill] sm:$0xff] }
 0x2d5   : > { %v2028_v23 = vsel %vm1270_vm2, %v7266_v11, %v7149_v27  ;;  %2579 = vmatpush.msrb.mxu2 %v2192_v38  ;;  %4453 = vmatpush.msra.mxu3 %v2192_v38 }
 0x2d6   : > { %v2082_v61 = vmul.f32 %v10407_v57, %v2028_v23  ;;  %2444 = vmatpush.msrb.mxu1 %v2063_v9  ;;  %2549 = vmatmul.f32.gmra.mxu0 %v6996_v41  ;;  %v1915_v9 = vsel %vm1069_vm5, %v6750_v24, %v7000_v26  ;;  %v1914_v23 = vsel %vm1069_vm5, %v6772_v34, %v6958_v21 }
 0x2d7   : > { %4362 = vmatmul.msk.f32.gmra.mxu3 %vm2253_vm15, %v7271_v49  ;;  %2230 = vperm.xlu0 %4555, %v375_v46   ;;  %v10410_v46 = vld [vmem:[#allocation49_spill] sm:$0xff]  ;;  %v1913_v26 = vsel %vm1069_vm5, %v6863_v60, %v7087_v50  ;;  %v1788_v34 = vsel %vm948_vm1, %v6573_v31, %v6645_v47  ;;  %v1787_v60 = vsel %vm948_vm1, %v6613_v62, %v6585_v58  ;;  %v10411_v31 = vld [vmem:[#allocation60_spill] sm:$0xff] }
 0x2d8   : > { %2445 = vmatpush.msrb.mxu1 %v2055_v52  ;;  %2688 = vmatpush.msra.mxu0 %v2082_v61  ;;  %v1943_v24 = vmul.f32 %v10410_v46, %v1915_v9  ;;  %v1823_v47 = vmul.f32 %v10411_v31, %v1788_v34  ;;  %v1815_v58 = vmul.f32 %v10411_v31, %v1787_v60 }
 0x2d9   : > { %4352 = vmatmul.msk.f32.gmra.mxu1 %vm2253_vm15, %v7191_v37  ;;  %v7290_v22 = vpop.permute.xlu0 %2117 }
 0x2da   : > { %2446 = vmatpush.msrb.mxu1 %v6442_v3  ;;  %2250 = vperm.xlu1 %4559, %v379_v42   ;;  %v2161_v54 = vsel %vm1391_vm10, %v7107_v20, %v7290_v22  ;;  %v378_v3 = vld [vmem:[%s9756_s4 + $0x30] sm:$0xff]  ;;  %v1916_v20 = vsel %vm1069_vm5, %v6728_v51, %v6990_v10  ;;  %v1935_v42 = vmul.f32 %v10410_v46, %v1914_v23 }
 0x2db   : > { %v2184_v1 = vmul.f32 %v10405_v53, %v2161_v54  ;;  %v10409_v53 = vld [vmem:[#allocation11_spill] sm:$0xff]  ;;  %v1951_v10 = vmul.f32 %v10410_v46, %v1916_v20  ;;  %v7340_v54 = vld [vmem:[#allocation3 + $0x58] sm:$0xff] }
 0x2dc   : > { %2447 = vmatpush.msrb.mxu1 %v10408_v13  ;;  %v7299_v25 = vpop.permute.xlu1 %2009  ;;  %v7301_v38 = vpop.permute.xlu2 %1871  ;;  %v1786_v13 = vsel %vm948_vm1, %v6621_v15, %v6627_v59  ;;  %v10413_v15 = vld [vmem:[#allocation77_spill] sm:$0xff] }
 0x2dd   : > { %2580 = vmatpush.msrb.mxu2 %v2184_v1  ;;  %4454 = vmatpush.msra.mxu3 %v2184_v1  ;;  %v1927_v1 = vmul.f32 %v10410_v46, %v1913_v26  ;;  %v2032_v59 = vsel %vm1270_vm2, %v10413_v15, %v7266_v11  ;;  %v1807_v23 = vmul.f32 %v10411_v31, %v1786_v13  ;;  %v10415_v26 = vld [vmem:[#allocation96_spill] sm:$0xff]  ;;  %v10418_v13 = vld [vmem:[#allocation91_spill] sm:$0xff] }
 0x2de   : > { %2448 = vmatpush.msrb.mxu1 %v10409_v53  ;;  %2552 = vmatmul.f32.gmra.mxu0 %v7029_v16  ;;  %v10412_v53 = vld [vmem:[#allocation25_spill] sm:$0xff]  ;;  %v10416_v11 = vld [vmem:[#allocation48_spill] sm:$0xff]  ;;  %v10421_v15 = vld [vmem:[#allocation71_spill] sm:$0xff] }
 0x2df   : > { %4363 = vmatmul.msk.f32.gmra.mxu3 %vm2253_vm15, %v7303_v28  ;;  %4375 = vmatmul.msk.f32.vlgmr.msrb.gmra.mxu2 %vm2253_vm15, %v7145_v44  ;;  %v1785_v9 = vsel %vm948_vm1, %v10412_v53, %v6633_v40  ;;  %v2081_v34 = vmul.f32 %v10416_v11, %v2032_v59  ;;  %v7415_v53 = vld [vmem:[#allocation3 + $0x78] sm:$0xff] }
 0x2e0   : > { %2245 = vperm.xlu0 %4555, %v378_v3   ;;  %2449 = vmatpush.msrb.mxu1 %v6394_v55  ;;  %v1799_v40 = vmul.f32 %v10411_v31, %v1785_v9 }
 0x2e1   : > { %4353 = vmatmul.msk.f32.gmra.mxu1 %vm2253_vm15, %v7220_v29  ;;  %v2002_v51 = vpop.permute.xlu0 %2001 }
 0x2e2   : > { %2450 = vmatpush.msrb.mxu1 %v1951_v10  ;;  %v2027_v61 = vsel %vm1270_vm2, %v2002_v51, %v7299_v25 }
 0x2e3   : > { %v2074_v55 = vmul.f32 %v10407_v57, %v2027_v61  ;;  %v7387_v61 = vld [vmem:[#allocation3 + $0x68] sm:$0xff] }
 0x2e4   : > { %2451 = vmatpush.msrb.mxu1 %v1943_v24  ;;  %v1998_v52 = vpop.permute.xlu1 %1997  ;;  %v7346_v21 = vpop.permute.xlu2 %1861  ;;  %v10414_v24 = vld [vmem:[#allocation68_spill] sm:$0xff] }
 0x2e5   : > { %2689 = vmatpush.msra.mxu0 %v2074_v55  ;;  %v2025_v62 = vsel %vm1270_vm2, %v1998_v52, %v7218_v36  ;;  %v2031_v55 = vsel %vm1270_vm2, %v10414_v24, %v2002_v51 }
 0x2e6   : > { %2452 = vmatpush.msrb.mxu1 %v1935_v42  ;;  %2555 = vmatmul.f32.gmra.mxu0 %v7050_v6  ;;  %v2058_v42 = vmul.f32 %v10407_v57, %v2025_v62  ;;  %v10420_v62 = vld [vmem:[#allocation33_spill] sm:$0xff] }
 0x2e7   : > { %4364 = vmatmul.msk.f32.gmra.mxu3 %vm2253_vm15, %v7340_v54  ;;  %4376 = vmatmul.msk.f32.gmra.mxu2 %vm2253_vm15, %v7191_v37 }
 0x2e8   : > { %2453 = vmatpush.msrb.mxu1 %v1927_v1  ;;  %v10417_v1 = vld [vmem:[#allocation12_spill] sm:$0xff] }
 0x2e9   : > { %4354 = vmatmul.msk.f32.gmra.mxu1 %vm2253_vm15, %v7271_v49  ;;  %v7361_v50 = vpop.permute.xlu0 %2007  ;;  %v2030_v51 = vsel %vm1270_vm2, %v10417_v1, %v7189_v56 }
 0x2ea   : > { %2454 = vmatpush.msrb.mxu1 %v1823_v47  ;;  %v2026_v3 = vsel %vm1270_vm2, %v7189_v56, %v7361_v50  ;;  %v2073_v47 = vmul.f32 %v10416_v11, %v2031_v55  ;;  %v2065_v56 = vmul.f32 %v10416_v11, %v2030_v51 }
 0x2eb   : > { %v2066_v20 = vmul.f32 %v10407_v57, %v2026_v3  ;;  %v10419_v3 = vld [vmem:[#allocation108_spill] sm:$0xff] }
 0x2ec   : > { %2455 = vmatpush.msrb.mxu1 %v1815_v58  ;;  %v7384_v10 = vpop.permute.xlu1 %1875  ;;  %v7404_v60 = vpop.permute.xlu2 %2137  ;;  %v2029_v58 = vsel %vm1270_vm2, %v10419_v3, %v1998_v52  ;;  %v10422_v52 = vld [vmem:[#allocation90_spill] sm:$0xff] }
 0x2ed   : > { %2690 = vmatpush.msra.mxu0 %v2066_v20  ;;  %v2057_v59 = vmul.f32 %v10416_v11, %v2029_v58  ;;  %v10426_v58 = vld [vmem:[#allocation13_spill] sm:$0xff]  ;;  %v10437_v11 = vld [vmem:[#allocation92_spill] sm:$0xff] }
 0x2ee   : > { %2456 = vmatpush.msrb.mxu1 %v1807_v23  ;;  %2558 = vmatmul.f32.gmra.mxu0 %v10415_v26  ;;  %v10423_v23 = vld [vmem:[#allocation39_spill] sm:$0xff] }
 0x2ef   : > { %4365 = vmatmul.msk.f32.gmra.mxu3 %vm2253_vm15, %v7387_v61  ;;  %4377 = vmatmul.msk.f32.gmra.mxu2 %vm2253_vm15, %v7220_v29 }
 0x2f0   : > { %2457 = vmatpush.msrb.mxu1 %v1799_v40  ;;  %2691 = vmatpush.msra.mxu0 %v2058_v42 }
 0x2f1   : > { %v1868_v31 = vpop.permute.xlu0 %1867  ;;  %4355 = vmatmul.msk.f32.gmra.mxu1 %vm2253_vm15, %v7303_v28 }
 0x2f2   : > { %2606 = vmatpush.msra.mxu1 %v2081_v34  ;;  %2692 = vmatpush.msra.mxu0 %v10418_v13  ;;  %v1904_v9 = vsel %vm1069_vm5, %v1868_v31, %v7384_v10  ;;  %v10424_v34 = vld [vmem:[#allocation97_spill] sm:$0xff]  ;;  %v10425_v13 = vld [vmem:[#allocation95_spill] sm:$0xff] }
 0x2f3   : > { %v1954_v24 = vmul.f32 %v10423_v23, %v1904_v9  ;;  %v10427_v9 = vld [vmem:[#allocation70_spill] sm:$0xff] }
 0x2f4   : > { %2607 = vmatpush.msra.mxu1 %v2073_v47  ;;  %2693 = vmatpush.msra.mxu0 %v10420_v62  ;;  %v1864_v20 = vpop.permute.xlu1 %1863  ;;  %v7434_v42 = vpop.permute.xlu2 %2125 }
 0x2f5   : > { %v1902_v40 = vsel %vm1069_vm5, %v1864_v20, %v7301_v38 }
 0x2f6   : > { %2608 = vmatpush.msra.mxu1 %v2065_v56  ;;  %2694 = vmatpush.msra.mxu0 %v10421_v15  ;;  %v1908_v56 = vsel %vm1069_vm5, %v10426_v58, %v1868_v31  ;;  %v1938_v62 = vmul.f32 %v10423_v23, %v1902_v40  ;;  %v10428_v15 = vld [vmem:[#allocation107_spill] sm:$0xff]  ;;  %v10430_v31 = vld [vmem:[#allocation46_spill] sm:$0xff]  ;;  %v10432_v58 = vld [vmem:[#allocation20_spill] sm:$0xff] }
 0x2f7   : > { %4366 = vmatmul.msk.f32.gmra.mxu3 %vm2253_vm15, %v7415_v53  ;;  %2561 = vmatmul.f32.gmra.mxu0 %v7097_v43 }
 0x2f8   : > { %4378 = vmatmul.msk.f32.gmra.mxu2 %vm2253_vm15, %v7271_v49  ;;  %2609 = vmatpush.msra.mxu1 %v2057_v59  ;;  %v1907_v59 = vsel %vm1069_vm5, %v10428_v15, %v7268_v2 }
 0x2f9   : > { %2695 = vmatpush.msra.mxu0 %v10422_v52  ;;  %v7429_v55 = vpop.permute.xlu0 %1873  ;;  %4356 = vmatmul.msk.f32.gmra.mxu1 %vm2253_vm15, %v7340_v54  ;;  %v10429_v52 = vld [vmem:[#allocation43_spill] sm:$0xff] }
 0x2fa   : > { %2610 = vmatpush.msra.mxu1 %v10424_v34  ;;  %v1903_v1 = vsel %vm1069_vm5, %v7268_v2, %v7429_v55  ;;  %v10431_v34 = vld [vmem:[#allocation34_spill] sm:$0xff] }
 0x2fb   : > { %2696 = vmatpush.msra.mxu0 %v1954_v24  ;;  %v7443_v51 = vpop.f32.mrf.mxu0  ;;  %v1946_v47 = vmul.f32 %v10423_v23, %v1903_v1  ;;  %v1953_v24 = vmul.f32 %v10430_v31, %v1908_v56  ;;  %v1906_v40 = vsel %vm1069_vm5, %v10431_v34, %v1864_v20  ;;  %v1905_v56 = vsel %vm1069_vm5, %v10432_v58, %v7346_v21  ;;  %v10433_v20 = vld [vmem:[#allocation99_spill] sm:$0xff] }
 0x2fc   : > { %2611 = vmatpush.msra.mxu1 %v10425_v13  ;;  %v7447_v3 = vpop.permute.xlu1 %2139  ;;  %v1945_v13 = vmul.f32 %v10430_v31, %v1907_v59  ;;  %v1937_v59 = vmul.f32 %v10430_v31, %v1906_v40  ;;  %v10435_v34 = vld [vmem:[#allocation67_spill] sm:$0xff] }
 0x2fd   : > { %2697 = vmatpush.msra.mxu0 %v1946_v47 }
 0x2fe   : > { %2612 = vmatpush.msra.mxu1 %v10427_v9  ;;  %v10434_v9 = vld [vmem:[#allocation111_spill] sm:$0xff] }
 0x2ff   : > { %4367 = vmatmul.msk.f32.vlgmr.msrb.gmra.mxu3 %vm2253_vm15, %v7145_v44  ;;  %2698 = vmatpush.msra.mxu0 %v1938_v62 }
 0x300   : > { %4379 = vmatmul.msk.f32.gmra.mxu2 %vm2253_vm15, %v7303_v28  ;;  %2613 = vmatpush.msra.mxu1 %v10429_v52 }
 0x301   : > { %v2132_v1 = vpop.permute.xlu0 %2131  ;;  %4357 = vmatmul.msk.f32.gmra.mxu1 %vm2253_vm15, %v7387_v61 }
 0x302   : > { %2614 = vmatpush.msra.mxu1 %v1953_v24  ;;  %v2156_v2 = vsel %vm1391_vm10, %v2132_v1, %v7447_v3  ;;  %v2160_v47 = vsel %vm1391_vm10, %v7174_v33, %v2132_v1  ;;  %v7484_v24 = vpop.permute.xlu2 %2017  ;;  %v10436_v1 = vld [vmem:[#allocation52_spill] sm:$0xff] }
 0x303   : > { %v2209_v62 = vmul.f32 %v10433_v20, %v2160_v47  ;;  %v2210_v15 = vmul.f32 %v10434_v9, %v2156_v2  ;;  %v7482_v52 = vpop.f32.mrf.mxu0  ;;  %v1780_v58 = vsel %vm948_vm1, %v10436_v1, %v10435_v34  ;;  %v1929_v47 = vmul.f32 %v10430_v31, %v1905_v56  ;;  %v10444_v31 = vld [vmem:[#allocation32_spill] sm:$0xff] }
 0x304   : > { %2615 = vmatpush.msra.mxu1 %v1945_v13  ;;  %v2130_v33 = vpop.permute.xlu1 %2129  ;;  %v1779_v1 = vsel %vm948_vm1, %v6657_v14, %v10437_v11 }
 0x305   : > { %v2155_v57 = vsel %vm1391_vm10, %v2130_v33, %v7404_v60  ;;  %v2159_v2 = vsel %vm1391_vm10, %v7209_v7, %v2130_v33  ;;  %2659 = vmatpush.msrb.mxu3 %v2209_v62  ;;  %2741 = vmatpush.msra.mxu2 %v2210_v15  ;;  %v10438_v7 = vld [vmem:[#allocation73_spill] sm:$0xff]  ;;  %v10439_v15 = vld [vmem:[#allocation87_spill] sm:$0xff]  ;;  %v10440_v33 = vld [vmem:[#allocation102_spill] sm:$0xff] }
 0x306   : > { %2616 = vmatpush.msra.mxu1 %v1937_v59  ;;  %v2201_v40 = vmul.f32 %v10433_v20, %v2159_v2  ;;  %v2202_v13 = vmul.f32 %v10434_v9, %v2155_v57  ;;  %v1825_v62 = vmul.f32 %v10438_v7, %v1780_v58  ;;  %v1778_v56 = vsel %vm948_vm1, %v6599_v5, %v10439_v15  ;;  %v10441_v2 = vld [vmem:[#allocation85_spill] sm:$0xff] }
 0x307   : > { %4368 = vmatmul.msk.f32.gmra.mxu3 %vm2253_vm15, %v7191_v37  ;;  %v1776_v14 = vsel %vm948_vm1, %v10435_v34, %v10440_v33  ;;  %v1817_v58 = vmul.f32 %v10438_v7, %v1779_v1  ;;  %v1777_v5 = vsel %vm948_vm1, %v6639_v39, %v10441_v2  ;;  %v1809_v1 = vmul.f32 %v10438_v7, %v1778_v56  ;;  %v10445_v56 = vld [vmem:[#allocation113_spill] sm:$0xff] }
 0x308   : > { %4380 = vmatmul.msk.f32.gmra.mxu2 %vm2253_vm15, %v7340_v54  ;;  %2617 = vmatpush.msra.mxu1 %v1929_v47  ;;  %v1774_v46 = vsel %vm948_vm1, %v10439_v15, %v10444_v31  ;;  %v1773_v15 = vsel %vm948_vm1, %v10441_v2, %v10445_v56 }
 0x309   : > { %2660 = vmatpush.msrb.mxu3 %v2201_v40  ;;  %2742 = vmatpush.msra.mxu2 %v2202_v13  ;;  %v7513_v57 = vpop.permute.xlu0 %1869  ;;  %v10442_v40 = vld [vmem:[#allocation101_spill] sm:$0xff] }
 0x30a   : > { %2618 = vmatpush.msra.mxu1 %v1825_v62  ;;  %v1901_v59 = vsel %vm1069_vm5, %v7346_v21, %v7513_v57  ;;  %v1775_v13 = vsel %vm948_vm1, %v10437_v11, %v10442_v40  ;;  %v10443_v62 = vld [vmem:[#allocation65_spill] sm:$0xff]  ;;  %v7545_v19 = vpop.permute.xlu2 %1883 }
 0x30b   : > { %4358 = vmatmul.msk.f32.gmra.mxu1 %vm2253_vm15, %v7415_v53  ;;  %v7530_v47 = vpop.f32.mrf.mxu0  ;;  %v1930_v34 = vmul.f32 %v10423_v23, %v1901_v59  ;;  %v1826_v39 = vmul.f32 %v10443_v62, %v1776_v14  ;;  %v1801_v59 = vmul.f32 %v10438_v7, %v1777_v5  ;;  %v1818_v11 = vmul.f32 %v10443_v62, %v1775_v13 }
 0x30c   : > { %2619 = vmatpush.msra.mxu1 %v1817_v58  ;;  %v7537_v21 = vpop.permute.xlu1 %2135  ;;  %v1810_v58 = vmul.f32 %v10443_v62, %v1774_v46  ;;  %v2157_v7 = vsel %vm1391_vm10, %v7290_v22, %v7434_v42  ;;  %v1802_v22 = vmul.f32 %v10443_v62, %v1773_v15  ;;  %v10448_v15 = vld [vmem:[#allocation58_spill] sm:$0xff] }
 0x30d   : > { %2699 = vmatpush.msra.mxu0 %v1930_v34 }
 0x30e   : > { %2620 = vmatpush.msra.mxu1 %v1809_v1 }
 0x30f   : > { %4369 = vmatmul.msk.f32.gmra.mxu3 %vm2253_vm15, %v7220_v29  ;;  %2700 = vmatpush.msra.mxu0 %v1826_v39  ;;  %v2023_v39 = vsel %vm1270_vm2, %v7299_v25, %v7484_v24 }
 0x310   : > { %4381 = vmatmul.msk.f32.gmra.mxu2 %vm2253_vm15, %v7387_v61  ;;  %2621 = vmatpush.msra.mxu1 %v1801_v59  ;;  %v7578_v59 = vpop.f32.mrf.mxu2 }
 0x311   : > { %2701 = vmatpush.msra.mxu0 %v1818_v11  ;;  %v2128_v14 = vpop.permute.xlu0 %2127  ;;  %v10446_v11 = vld [vmem:[#allocation30_spill] sm:$0xff] }
 0x312   : > { %v2154_v5 = vsel %vm1391_vm10, %v2128_v14, %v7537_v21  ;;  %v2158_v34 = vsel %vm1391_vm10, %v7250_v12, %v2128_v14 }
 0x313   : > { %2458 = vmatmul.f32.vlgmr.msrb.gmra.mxu1 %v6926_v4  ;;  %2702 = vmatpush.msra.mxu0 %v1810_v58  ;;  %v2193_v2 = vmul.f32 %v10433_v20, %v2158_v34  ;;  %v2194_v46 = vmul.f32 %v10434_v9, %v2154_v5  ;;  %v7571_v13 = vpop.f32.mrf.mxu0  ;;  %v2185_v58 = vmul.f32 %v10433_v20, %v2157_v7  ;;  %v10447_v5 = vld [vmem:[#allocation109_spill] sm:$0xff]  ;;  %v10449_v34 = vld [vmem:[#allocation59_spill] sm:$0xff] }
 0x314   : > { %v2020_v1 = vpop.permute.xlu1 %2019  ;;  %v2051_v62 = vsel %vm1270_vm2, %v7484_v24, %v10447_v5  ;;  %v2075_v20 = vmul.f32 %v10448_v15, %v2023_v39 }
 0x315   : > { %v2024_v12 = vsel %vm1270_vm2, %v7149_v27, %v2020_v1  ;;  %v2052_v14 = vsel %vm1270_vm2, %v2020_v1, %v10446_v11  ;;  %2661 = vmatpush.msrb.mxu3 %v2193_v2  ;;  %2703 = vmatpush.msra.mxu0 %v1802_v22  ;;  %v7596_v27 = vpop.permute.xlu2 %2147  ;;  %v2076_v24 = vmul.f32 %v10449_v34, %v2051_v62  ;;  %v10451_v22 = vld [vmem:[#allocation81_spill] sm:$0xff]  ;;  %v10453_v62 = vld [vmem:[#allocation27_spill] sm:$0xff] }
 0x316   : > { %v2083_v25 = vmul.f32 %v10448_v15, %v2024_v12  ;;  %v2084_v23 = vmul.f32 %v10449_v34, %v2052_v14  ;;  %2743 = vmatpush.msra.mxu2 %v2194_v46  ;;  %2704 = vmatmul.f32.vlgmr.msra.gmra.mxu0 %v6926_v4  ;;  %v10450_v46 = vld [vmem:[#allocation21_spill] sm:$0xff]  ;;  %v10452_v14 = vld [vmem:[#allocation15_spill] sm:$0xff] }
 0x317   : > { %4370 = vmatmul.msk.f32.gmra.mxu3 %vm2253_vm15, %v7271_v49  ;;  %v2180_v4 = vsel %vm1391_vm10, %v7596_v27, %v10450_v46 }
 0x318   : > { %2662 = vmatpush.msrb.mxu3 %v2185_v58  ;;  %2770 = vmatpush.msrb.mxu1 %v2083_v25  ;;  %v2212_v39 = vmul.f32 %v10451_v22, %v2180_v4 }
 0x319   : > { %2852 = vmatpush.msrb.mxu0 %v2084_v23  ;;  %v7599_v7 = vpop.permute.xlu0 %2133 }
 0x31a   : > { %v2153_v2 = vsel %vm1391_vm10, %v7434_v42, %v7599_v7  ;;  %2771 = vmatpush.msrb.mxu1 %v2075_v20  ;;  %v7617_v42 = vpop.f32.mrf.mxu2 }
 0x31b   : > { %2461 = vmatmul.f32.gmra.mxu1 %v6952_v18  ;;  %2853 = vmatpush.msrb.mxu0 %v2076_v24  ;;  %v2186_v23 = vmul.f32 %v10434_v9, %v2153_v2  ;;  %v7613_v12 = vpop.f32.mrf.mxu0 }
 0x31c   : > { %v2014_v1 = vpop.permute.xlu1 %2013 }
 0x31d   : > { %2744 = vmatpush.msra.mxu2 %v2186_v23  ;;  %v2021_v5 = vsel %vm1270_vm2, %v7218_v36, %v2014_v1  ;;  %v2049_v25 = vsel %vm1270_vm2, %v2014_v1, %v10453_v62  ;;  %v10454_v23 = vld [vmem:[#allocation114_spill] sm:$0xff]  ;;  %v10455_v1 = vld [vmem:[#allocation116_spill] sm:$0xff] }
 0x31e   : > { %4391 = vmatmul.msk.f32.vlgmr.msra.gmra.mxu2 %vm2253_vm15, %v7145_v44  ;;  %2707 = vmatmul.f32.gmra.mxu0 %v6952_v18  ;;  %v2060_v36 = vmul.f32 %v10449_v34, %v2049_v25  ;;  %v1756_v25 = vpop.permute.xlu2 %1755 }
 0x31f   : > { %4371 = vmatmul.msk.f32.gmra.mxu3 %vm2253_vm15, %v7303_v28  ;;  %2905 = vmatpush.msrb.mxu2 %v2212_v39  ;;  %v10456_v39 = vld [vmem:[#allocation42_spill] sm:$0xff] }
 0x321   : > { %v2016_v11 = vpop.permute.xlu0 %2015 }
 0x322   : > { %v2022_v9 = vsel %vm1270_vm2, %v7361_v50, %v2016_v11  ;;  %v2050_v58 = vsel %vm1270_vm2, %v2016_v11, %v10452_v14  ;;  %v2059_v50 = vmul.f32 %v10448_v15, %v2021_v5  ;;  %v7646_v46 = vpop.f32.mrf.mxu2  ;;  %v10457_v14 = vld [vmem:[#allocation112_spill] sm:$0xff] }
 0x323   : > { %2464 = vmatmul.f32.gmra.mxu1 %v6973_v32  ;;  %v2067_v18 = vmul.f32 %v10448_v15, %v2022_v9  ;;  %v2068_v20 = vmul.f32 %v10449_v34, %v2050_v58  ;;  %v7644_v2 = vpop.f32.mrf.mxu0  ;;  %v1896_v58 = vsel %vm1069_vm5, %v7545_v19, %v10457_v14  ;;  %v10464_v14 = vld [vmem:[#allocation75_spill] sm:$0xff]  ;;  %v7926_v34 = vld [vmem:[#allocation3 + $0x50] sm:$0xff] }
 0x324   : > { %v1880_v24 = vpop.permute.xlu1 %1879 }
 0x325   : > { %2772 = vmatpush.msrb.mxu1 %v2067_v18  ;;  %2854 = vmatpush.msrb.mxu0 %v2068_v20 }
 0x326   : > { %4392 = vmatmul.msk.f32.gmra.mxu2 %vm2253_vm15, %v7191_v37  ;;  %2710 = vmatmul.f32.gmra.mxu0 %v6973_v32  ;;  %v1900_v32 = vsel %vm1069_vm5, %v7384_v10, %v7545_v19 }
 0x327   : > { %4372 = vmatmul.msk.f32.gmra.mxu3 %vm2253_vm15, %v7340_v54  ;;  %2773 = vmatpush.msrb.mxu1 %v2059_v50  ;;  %v10462_v50 = vld [vmem:[#allocation51_spill] sm:$0xff] }
 0x328   : > { %2855 = vmatpush.msrb.mxu0 %v2060_v36  ;;  %v1894_v36 = vsel %vm1069_vm5, %v1880_v24, %v10462_v50  ;;  %v10469_v50 = vld [vmem:[#allocation23_spill] sm:$0xff] }
 0x329   : > { %v1882_v4 = vpop.permute.xlu0 %1881  ;;  %2774 = vmatpush.msrb.mxu1 %v10454_v23 }
 0x32a   : > { %2856 = vmatpush.msrb.mxu0 %v10455_v1  ;;  %v1899_v10 = vsel %vm1069_vm5, %v7429_v55, %v1882_v4  ;;  %v1898_v55 = vsel %vm1069_vm5, %v7301_v38, %v1880_v24  ;;  %v7694_v23 = vpop.f32.mrf.mxu2  ;;  %v10463_v38 = vld [vmem:[#allocation31_spill] sm:$0xff] }
 0x32b   : > { %2467 = vmatmul.f32.gmra.mxu1 %v6996_v41 }
 0x32c   : > { %2775 = vmatpush.msrb.mxu1 %v6847_v0  ;;  %2857 = vmatpush.msrb.mxu0 %v10456_v39  ;;  %v7653_v11 = vpop.permute.xlu1 %2145  ;;  %v10458_v0 = vld [vmem:[#allocation38_spill] sm:$0xff] }
 0x32d   : > { %v2179_v9 = vsel %vm1391_vm10, %v7653_v11, %v7147_v8  ;;  %v10459_v8 = vld [vmem:[#allocation93_spill] sm:$0xff] }
 0x32e   : > { %2776 = vmatpush.msrb.mxu1 %v10458_v0  ;;  %2858 = vmatpush.msrb.mxu0 %v6601_v45  ;;  %v2204_v5 = vmul.f32 %v10451_v22, %v2179_v9  ;;  %v1895_v62 = vsel %vm1069_vm5, %v1882_v4, %v10459_v8  ;;  %v10460_v45 = vld [vmem:[#allocation29_spill] sm:$0xff]  ;;  %v7691_v4 = vpop.f32.mrf.mxu0  ;;  %v1772_v0 = vsel %vm948_vm1, %v10440_v33, %v1756_v25 }
 0x32f   : > { %4373 = vmatmul.msk.f32.gmra.mxu3 %vm2253_vm15, %v7387_v61  ;;  %2713 = vmatmul.f32.gmra.mxu0 %v6996_v41  ;;  %v1955_v19 = vmul.f32 %v10460_v45, %v1900_v32  ;;  %v10461_v41 = vld [vmem:[#allocation57_spill] sm:$0xff]  ;;  %v1939_v39 = vmul.f32 %v10460_v45, %v1898_v55  ;;  %v10467_v55 = vld [vmem:[#allocation110_spill] sm:$0xff] }
 0x330   : > { %4393 = vmatmul.msk.f32.gmra.mxu2 %vm2253_vm15, %v7220_v29  ;;  %2777 = vmatpush.msrb.mxu1 %v6523_v17  ;;  %v1956_v18 = vmul.f32 %v10461_v41, %v1896_v58  ;;  %v1947_v17 = vmul.f32 %v10460_v45, %v1899_v10  ;;  %v1940_v9 = vmul.f32 %v10461_v41, %v1894_v36  ;;  %v10465_v10 = vld [vmem:[#allocation106_spill] sm:$0xff] }
 0x331   : > { %2859 = vmatpush.msrb.mxu0 %v6617_v30  ;;  %2906 = vmatpush.msrb.mxu2 %v2204_v5  ;;  %v1878_v20 = vpop.permute.xlu0 %1877  ;;  %v1948_v30 = vmul.f32 %v10461_v41, %v1895_v62  ;;  %v1768_v58 = vsel %vm948_vm1, %v1756_v25, %v10464_v14  ;;  %v10466_v62 = vld [vmem:[#allocation79_spill] sm:$0xff]  ;;  %v1827_v36 = vmul.f32 %v10469_v50, %v1772_v0  ;;  %v10472_v0 = vld [vmem:[#allocation98_spill] sm:$0xff] }
 0x332   : > { %2778 = vmatpush.msrb.mxu1 %v1955_v19  ;;  %v1893_v1 = vsel %vm1069_vm5, %v1878_v20, %v10463_v38  ;;  %v1897_v24 = vsel %vm1069_vm5, %v7513_v57, %v1878_v20  ;;  %v1828_v19 = vmul.f32 %v10466_v62, %v1768_v58  ;;  %v7756_v14 = vpop.f32.mrf.mxu2 }
 0x333   : > { %2470 = vmatmul.f32.gmra.mxu1 %v7029_v16  ;;  %2860 = vmatpush.msrb.mxu0 %v1956_v18  ;;  %v1931_v57 = vmul.f32 %v10460_v45, %v1897_v24  ;;  %v1932_v5 = vmul.f32 %v10461_v41, %v1893_v1  ;;  %v10468_v18 = vld [vmem:[#allocation44_spill] sm:$0xff]  ;;  %v2152_v1 = vsel %vm1391_vm10, %v7447_v3, %v7596_v27 }
 0x334   : > { %2779 = vmatpush.msrb.mxu1 %v1947_v17  ;;  %v1754_v32 = vpop.permute.xlu1 %1753  ;;  %v1766_v20 = vsel %vm948_vm1, %v10468_v18, %v10467_v55  ;;  %v2142_v17 = vpop.permute.xlu2 %2141 }
 0x335   : > { %2861 = vmatpush.msrb.mxu0 %v1948_v30  ;;  %v1767_v8 = vsel %vm948_vm1, %v1754_v32, %v10465_v10  ;;  %v1771_v33 = vsel %vm948_vm1, %v10442_v40, %v1754_v32  ;;  %v1770_v40 = vsel %vm948_vm1, %v10444_v31, %v10468_v18  ;;  %v10471_v32 = vld [vmem:[#allocation115_spill] sm:$0xff]  ;;  %v1812_v3 = vmul.f32 %v10466_v62, %v1766_v20 }
 0x336   : > { %2780 = vmatpush.msrb.mxu1 %v1939_v39  ;;  %v1820_v30 = vmul.f32 %v10466_v62, %v1767_v8  ;;  %v7745_v24 = vpop.f32.mrf.mxu0  ;;  %v10470_v39 = vld [vmem:[#allocation82_spill] sm:$0xff]  ;;  %v2177_v27 = vsel %vm1391_vm10, %v2142_v17, %v7216_v48  ;;  %v1811_v58 = vmul.f32 %v10469_v50, %v1770_v40 }
 0x337   : > { %2862 = vmatpush.msrb.mxu0 %v1940_v9  ;;  %4374 = vmatmul.msk.f32.gmra.mxu3 %vm2253_vm15, %v7415_v53  ;;  %v1769_v31 = vsel %vm948_vm1, %v10445_v56, %v10470_v39  ;;  %v1765_v9 = vsel %vm948_vm1, %v10470_v39, %v10471_v32  ;;  %v2151_v56 = vsel %vm1391_vm10, %v7404_v60, %v7653_v11  ;;  %vm3530_vm1 = vcmask 523264  }
 0x338   : > { %2716 = vmatmul.f32.gmra.mxu0 %v7029_v16  ;;  %4394 = vmatmul.msk.f32.gmra.mxu2 %vm2253_vm15, %v7271_v49  ;;  %v1803_v48 = vmul.f32 %v10469_v50, %v1769_v31  ;;  %v1804_v60 = vmul.f32 %v10466_v62, %v1765_v9  ;;  %v2188_v11 = vmul.f32 %v10451_v22, %v2177_v27 }
 0x339   : > { %2781 = vmatpush.msrb.mxu1 %v1931_v57  ;;  %2863 = vmatpush.msrb.mxu0 %v1932_v5  ;;  %v2144_v25 = vpop.permute.xlu0 %2143  ;;  %v2211_v57 = vmul.f32 %v10472_v0, %v2152_v1  ;;  %v2203_v10 = vmul.f32 %v10472_v0, %v2151_v56 }
 0x33a   : > { %v2178_v16 = vsel %vm1391_vm10, %v2144_v25, %v7187_v63  ;;  %v1819_v63 = vmul.f32 %v10469_v50, %v1771_v33  ;;  %v2150_v5 = vsel %vm1391_vm10, %v7537_v21, %v2144_v25  ;;  %v2149_v21 = vsel %vm1391_vm10, %v7599_v7, %v2142_v17  ;;  %v7790_v62 = vpop.f32.mrf.mxu2 }
 0x33b   : > { %2473 = vmatmul.f32.gmra.mxu1 %v7050_v6  ;;  %2864 = vmatpush.msrb.mxu0 %v1828_v19  ;;  %v2196_v38 = vmul.f32 %v10451_v22, %v2178_v16  ;;  %v2187_v22 = vmul.f32 %v10472_v0, %v2149_v21  ;;  %vm4196_vm10 = vcmask 1041408  }
 0x33c   : > { %2782 = vmatpush.msrb.mxu1 %v1827_v36  ;;  %v7815_v36 = vpop.permute.xlu1 %2220 }
 0x33d   : > { %2865 = vmatpush.msrb.mxu0 %v1820_v30  ;;  %2907 = vmatpush.msrb.mxu2 %v2196_v38  ;;  %v7829_v30 = vpop.permute.xlu2 %2225 }
 0x33e   : > { %2783 = vmatpush.msrb.mxu1 %v1819_v63  ;;  %v7788_v33 = vpop.f32.mrf.mxu0  ;;  %v2302_v31 = vadd.f32 %v7530_v47, %v7829_v30 }
 0x33f   : > { %2866 = vmatpush.msrb.mxu0 %v1812_v3  ;;  %4382 = vmatmul.msk.f32.vlgmr.msra.gmra.mxu3 %vm2253_vm15, %v7415_v53 }
 0x340   : > { %2784 = vmatpush.msrb.mxu1 %v1811_v58  ;;  %2719 = vmatmul.f32.gmra.mxu0 %v7050_v6  ;;  %v2195_v6 = vmul.f32 %v10472_v0, %v2150_v5  ;;  %v7861_v0 = vld [vmem:[#allocation3 + $0x20] sm:$0xff] }
 0x341   : > { %4395 = vmatmul.msk.f32.gmra.mxu2 %vm2253_vm15, %v7303_v28  ;;  %2823 = vmatpush.msra.mxu3 %v2211_v57  ;;  %v7780_v8 = vpop.f32.mrf.mxu3  ;;  %v7797_v7 = vpop.permute.xlu0 %2215 }
 0x342   : > { %2785 = vmatpush.msrb.mxu1 %v1803_v48  ;;  %2867 = vmatpush.msrb.mxu0 %v1804_v60  ;;  %10473 = vst [vmem:[#allocation88_spill] sm:$0xff] %v7797_v7  ;;  %v2296_v25 = vadd.f32 %v7443_v51, %v7797_v7  ;;  %v7804_v18 = vpop.f32.mrf.mxu2  ;;  %v7821_v51 = vld [vmem:[#allocation3] sm:$0xff] }
 0x343   : > { %2908 = vmatpush.msrb.mxu2 %v2188_v11  ;;  %2824 = vmatpush.msra.mxu3 %v2203_v10 }
 0x344   : > { %2476 = vmatmul.f32.gmra.mxu1 %v10415_v26  ;;  %v7875_v10 = vpop.permute.xlu1 %2235 }
 0x345   : > { %2825 = vmatpush.msra.mxu3 %v2195_v6  ;;  %v2308_v6 = vadd.f32 %v7613_v12, %v7875_v10 }
 0x347   : > { %2826 = vmatpush.msra.mxu3 %v2187_v22 }
 0x348   : > { %2722 = vmatmul.f32.gmra.mxu0 %v10415_v26  ;;  %4383 = vmatmul.msk.f32.vlgmr.msrb.gmra.mxu3 %vm2253_vm15, %v7145_v44  ;;  %v7806_v26 = vpop.f32.mrf.mxu0 }
 0x349   : > { %4396 = vmatmul.msk.f32.gmra.mxu2 %vm2253_vm15, %v7340_v54  ;;  %v7799_v19 = vpop.f32.mrf.mxu3  ;;  %v7849_v3 = vpop.permute.xlu0 %2230 }
 0x34a   : > { %v2398_v38 = vpop.f32.mrf.mxu2  ;;  %v2305_v57 = vadd.f32 %v7571_v13, %v7849_v3  ;;  %v7879_v13 = vld [vmem:[#allocation3 + $0x30] sm:$0xff] }
 0x34c   : > { %2479 = vmatmul.f32.gmra.mxu1 %v7097_v43  ;;  %v7902_v12 = vpop.permute.xlu1 %2250 }
 0x34e   : > { %v2336_v55 = vpop.f32.mrf.mxu1 }
 0x34f   : > { %v2337_v20 = vadd.f32 %v2336_v55, %v2296_v25 }
 0x350   : > { %2725 = vmatmul.f32.gmra.mxu0 %v7097_v43  ;;  %4384 = vmatmul.msk.f32.gmra.mxu3 %vm2253_vm15, %v7191_v37  ;;  %v2299_v43 = vadd.f32 %v7482_v52, %v7815_v36  ;;  %v7835_v63 = vpop.f32.mrf.mxu0  ;;  %v7841_v52 = vld [vmem:[#allocation3 + $0x10] sm:$0xff] }
 0x351   : > { %v7811_v50 = vmax.f32 %v2337_v20, 0.0  ;;  %4397 = vmatmul.msk.f32.gmra.mxu2 %vm2253_vm15, %v7387_v61  ;;  %v7817_v16 = vpop.f32.mrf.mxu3 }
 0x353   : > { %10474 = vst [vmem:[#allocation10_spill] sm:$0xff] %v7811_v50  ;;  %2998 = vrot.lane.b32.xlu2 %v7811_v50, %s4682_s29 }
 0x354   : > { %2622 = vmatmul.f32.vlgmr.msra.gmra.mxu1 %v7821_v51 }
 0x356   : > { %v2339_v40 = vpop.f32.mrf.mxu1 }
 0x357   : > { %v2340_v17 = vadd.f32 %v2339_v40, %v2299_v43  ;;  %v7895_v43 = vpop.permute.xlu2 %2240  ;;  %v7897_v40 = vld [vmem:[#allocation3 + $0x40] sm:$0xff] }
 0x358   : > { %2868 = vmatmul.f32.vlgmr.msrb.gmra.mxu0 %v7821_v51  ;;  %4385 = vmatmul.msk.f32.gmra.mxu3 %vm2253_vm15, %v7220_v29  ;;  %v7859_v47 = vpop.f32.mrf.mxu0 }
 0x359   : > { %v7831_v1 = vmax.f32 %v2340_v17, 0.0  ;;  %4398 = vmatmul.msk.f32.gmra.mxu2 %vm2253_vm15, %v7415_v53  ;;  %v7904_v17 = vpop.permute.xlu0 %2245 }
 0x35a   : > { %v7837_v39 = vpop.f32.mrf.mxu3 }
 0x35b   : > { %10475 = vst [vmem:[#allocation69_spill] sm:$0xff] %v7831_v1  ;;  %3000 = vrot.lane.b32.xlu0 %v7831_v1, %s4682_s29 }
 0x35c   : > { %2625 = vmatmul.f32.gmra.mxu1 %v7841_v52 }
 0x35e   : > { %v2342_v32 = vpop.f32.mrf.mxu1 }
 0x35f   : > { %v2343_v9 = vadd.f32 %v2342_v32, %v2302_v31 }
 0x360   : > { %2871 = vmatmul.f32.gmra.mxu0 %v7841_v52  ;;  %4386 = vmatmul.msk.f32.gmra.mxu3 %vm2253_vm15, %v7271_v49  ;;  %v7882_v21 = vpop.f32.mrf.mxu0 }
 0x361   : > { %v7851_v27 = vmax.f32 %v2343_v9, 0.0  ;;  %4407 = vmatmul.msk.f32.vlgmr.msrb.gmra.mxu2 %vm2253_vm15, %v7145_v44  ;;  %v2399_v9 = vadd.f32 %v2398_v38, %v7902_v12  ;;  %v2378_v38 = vadd.f32 %v7578_v59, %v7797_v7 }
 0x362   : > { %v2430_v56 = vpop.f32.mrf.mxu3  ;;  %v7855_v58 = vpop.f32.mrf.mxu2 }
 0x363   : > { %3002 = vrot.lane.b32.xlu1 %v7851_v27, %s4682_s29  ;;  %v2419_v59 = vadd.f32 %v7780_v8, %v2378_v38 }
 0x364   : > { %2628 = vmatmul.f32.gmra.mxu1 %v7861_v0 }
 0x366   : > { %v2345_v5 = vpop.f32.mrf.mxu1 }
 0x367   : > { %v2346_v48 = vadd.f32 %v2345_v5, %v2305_v57  ;;  %v2396_v57 = vadd.f32 %v7804_v18, %v7904_v17 }
 0x368   : > { %2874 = vmatmul.f32.gmra.mxu0 %v7861_v0  ;;  %4387 = vmatmul.msk.f32.gmra.mxu3 %vm2253_vm15, %v7303_v28  ;;  %v7908_v31 = vpop.f32.mrf.mxu0 }
 0x369   : > { %v7869_v44 = vmax.f32 %v2346_v48, 0.0  ;;  %4408 = vmatmul.msk.f32.gmra.mxu2 %vm2253_vm15, %v7191_v37 }
 0x36a   : > { %v2433_v60 = vpop.f32.mrf.mxu3  ;;  %v7873_v11 = vpop.f32.mrf.mxu2 }
 0x36b   : > { %3004 = vrot.lane.b32.xlu2 %v7869_v44, %s4682_s29 }
 0x36c   : > { %2631 = vmatmul.f32.gmra.mxu1 %v7879_v13 }
 0x36e   : > { %v2348_v22 = vpop.f32.mrf.mxu1 }
 0x36f   : > { %v2349_v25 = vadd.f32 %v2348_v22, %v2308_v6 }
 0x370   : > { %2877 = vmatmul.f32.gmra.mxu0 %v7879_v13  ;;  %4388 = vmatmul.msk.f32.gmra.mxu3 %vm2253_vm15, %v7340_v54 }
 0x371   : > { %4409 = vmatmul.msk.f32.gmra.mxu2 %vm2253_vm15, %v7220_v29  ;;  %v7891_v37 = vmax.f32 %v2349_v25, 0.0  ;;  %v2311_v29 = vadd.f32 %v7644_v2, %v7895_v43  ;;  %v2393_v2 = vadd.f32 %v7790_v62, %v7895_v43 }
 0x372   : > { %v2436_v55 = vpop.f32.mrf.mxu3  ;;  %v7893_v20 = vpop.f32.mrf.mxu2 }
 0x373   : > { %3006 = vrot.lane.b32.xlu0 %v7891_v37, %s4682_s29  ;;  %v2437_v6 = vadd.f32 %v2436_v55, %v2396_v57  ;;  %v2434_v18 = vadd.f32 %v2433_v60, %v2393_v2  ;;  %v2314_v55 = vadd.f32 %v7691_v4, %v7904_v17  ;;  %v2387_v60 = vadd.f32 %v7694_v23, %v7849_v3  ;;  %v7951_v4 = vpop.f32.mrf.mxu0 }
 0x374   : > { %2634 = vmatmul.f32.gmra.mxu1 %v7897_v40  ;;  %v7961_v23 = vmax.f32 %v2419_v59, 0.0 }
 0x375   : > { %v7935_v62 = vmax.f32 %v2437_v6, 0.0  ;;  %v2381_v6 = vadd.f32 %v7617_v42, %v7815_v36 }
 0x376   : > { %v2351_v32 = vpop.f32.mrf.mxu1  ;;  %10476 = vst [vmem:[#allocation14_spill] sm:$0xff] %v7961_v23 }
 0x377   : > { %v2352_v5 = vadd.f32 %v2351_v32, %v2311_v29 }
 0x378   : > { %2880 = vmatmul.f32.gmra.mxu0 %v7897_v40  ;;  %4389 = vmatmul.msk.f32.gmra.mxu3 %vm2253_vm15, %v7387_v61 }
 0x379   : > { %4410 = vmatmul.msk.f32.gmra.mxu2 %vm2253_vm15, %v7271_v49  ;;  %v7920_v22 = vmax.f32 %v2352_v5, 0.0  ;;  %v2390_v49 = vadd.f32 %v7756_v14, %v7875_v10  ;;  %v7946_v14 = vmax.f32 %v2434_v18, 0.0  ;;  %v2428_v5 = vadd.f32 %v7837_v39, %v2387_v60 }
 0x37a   : > { %v2439_v48 = vpop.f32.mrf.mxu3  ;;  %v2422_v39 = vadd.f32 %v7799_v19, %v2381_v6  ;;  %v2317_v18 = vadd.f32 %v7745_v24, %v7902_v12 }
 0x37b   : > { %v2440_v25 = vadd.f32 %v2439_v48, %v2399_v9  ;;  %v7922_v41 = vpop.f32.mrf.mxu2  ;;  %3008 = vrot.lane.b32.xlu1 %v7920_v22, %s4682_s29  ;;  %v2431_v32 = vadd.f32 %v2430_v56, %v2390_v49  ;;  %v2384_v56 = vadd.f32 %v7646_v46, %v7829_v30  ;;  %v7979_v38 = vmax.f32 %v2428_v5, 0.0  ;;  %v7995_v24 = vpop.f32.mrf.mxu0 }
 0x37c   : > { %2637 = vmatmul.f32.gmra.mxu1 %v7926_v34  ;;  %v7990_v59 = vmax.f32 %v2422_v39, 0.0 }
 0x37d   : > { %v7929_v29 = vmax.f32 %v2440_v25, 0.0  ;;  %v7963_v48 = vmax.f32 %v2431_v32, 0.0  ;;  %v2425_v25 = vadd.f32 %v7817_v16, %v2384_v56  ;;  %v4567_v16 = vld [vmem:[#allocation3 + $0x8] sm:$0xff]  ;;  %v4569_v56 = vld [vmem:[#allocation3 + $0x18] sm:$0xff] }
 0x37e   : > { %v2354_v9 = vpop.f32.mrf.mxu1  ;;  %10478 = vst [vmem:[#allocation50_spill] sm:$0xff] %v7990_v59 }
 0x37f   : > { %3601 = vmatpush.msra.mxu0 %v7929_v29  ;;  %v2355_v57 = vadd.f32 %v2354_v9, %v2314_v55  ;;  %v7985_v49 = vmax.f32 %v2425_v25, 0.0  ;;  %v7997_v9 = vld [vmem:[#allocation3 + $0x70] sm:$0xff] }
 0x380   : > { %2883 = vmatmul.f32.gmra.mxu0 %v7926_v34  ;;  %4390 = vmatmul.msk.f32.gmra.mxu3 %vm2253_vm15, %v7415_v53 }
 0x381   : > { %4411 = vmatmul.msk.f32.gmra.mxu2 %vm2253_vm15, %v7303_v28  ;;  %3602 = vmatpush.msra.mxu0 %v7935_v62  ;;  %v7958_v2 = vmax.f32 %v2355_v57, 0.0  ;;  %v7965_v28 = vld [vmem:[#allocation3 + $0x60] sm:$0xff]  ;;  %10477 = vst [vmem:[#allocation104_spill] sm:$0xff] %v7985_v49 }
 0x382   : > { %v7953_v8 = vpop.f32.mrf.mxu3 }
 0x383   : > { %3603 = vmatpush.msra.mxu0 %v7946_v14  ;;  %v7971_v46 = vpop.f32.mrf.mxu2  ;;  %3014 = vrot.lane.b32.xlu1 %v7961_v23, %s4682_s29 }
 0x384   : > { %2640 = vmatmul.f32.gmra.mxu1 %v7965_v28  ;;  %3010 = vrot.lane.b32.xlu2 %v7958_v2, %s4682_s29 }
 0x385   : > { %3604 = vmatpush.msra.mxu0 %v7963_v48 }
 0x387   : > { %3605 = vmatpush.msra.mxu0 %v7979_v38 }
 0x388   : > { %v2357_v42 = vpop.f32.mrf.mxu1  ;;  %2886 = vmatmul.f32.gmra.mxu0 %v7965_v28  ;;  %4399 = vmatmul.msk.f32.vlgmr.msra.gmra.mxu3 %vm2253_vm15, %v4567_v16 }
 0x389   : > { %v2358_v55 = vadd.f32 %v2357_v42, %v2317_v18  ;;  %4412 = vmatmul.msk.f32.gmra.mxu2 %vm2253_vm15, %v7340_v54  ;;  %3606 = vmatpush.msra.mxu0 %v7985_v49  ;;  %v4570_v42 = vld [vmem:[#allocation3 + $0x28] sm:$0xff] }
 0x38a   : > { %v2503_v19 = vpop.f32.mrf.mxu3 }
 0x38b   : > { %v7992_v32 = vmax.f32 %v2358_v55, 0.0  ;;  %3607 = vmatpush.msra.mxu0 %v7990_v59  ;;  %3020 = vrot.lane.b32.xlu1 %v7979_v38, %s4682_s29  ;;  %v8006_v60 = vpop.f32.mrf.mxu2 }
 0x38c   : > { %2643 = vmatmul.f32.gmra.mxu1 %v7997_v9  ;;  %3016 = vrot.lane.b32.xlu2 %v7990_v59, %s4682_s29 }
 0x38d   : > { %3012 = vrot.lane.b32.xlu0 %v7992_v32, %s4682_s29  ;;  %3543 = vmatpush.msra.mxu1 %v7992_v32 }
 0x38e   : > { %3608 = vmatpush.msra.mxu0 %v7961_v23 }
 0x38f   : > { %3544 = vmatpush.msra.mxu1 %v7958_v2 }
 0x390   : > { %v2459_v57 = vpop.f32.mrf.mxu1  ;;  %2889 = vmatmul.f32.gmra.mxu0 %v7997_v9  ;;  %4400 = vmatmul.msk.f32.gmra.mxu3 %vm2253_vm15, %v4569_v56 }
 0x391   : > { %4413 = vmatmul.msk.f32.gmra.mxu2 %vm2253_vm15, %v7387_v61  ;;  %3545 = vmatpush.msra.mxu1 %v7920_v22  ;;  %v2460_v16 = vadd.f32 %v2459_v57, %v7797_v7 }
 0x392   : > { %v2506_v5 = vpop.f32.mrf.mxu3 }
 0x393   : > { %v8018_v6 = vpop.f32.mrf.mxu0  ;;  %3546 = vmatpush.msra.mxu1 %v7891_v37  ;;  %3026 = vrot.lane.b32.xlu1 %v7935_v62, %s4682_s29  ;;  %v8028_v39 = vpop.f32.mrf.mxu2 }
 0x394   : > { %2786 = vmatmul.f32.vlgmr.msrb.gmra.mxu1 %v7821_v51  ;;  %10479 = vst [vmem:[#allocation105_spill] sm:$0xff] %v8018_v6  ;;  %3022 = vrot.lane.b32.xlu2 %v7963_v48, %s4682_s29 }
 0x395   : > { %3018 = vrot.lane.b32.xlu0 %v7985_v49, %s4682_s29  ;;  %3547 = vmatpush.msra.mxu1 %v7869_v44 }
 0x397   : > { %3548 = vmatpush.msra.mxu1 %v7851_v27 }
 0x398   : > { %v2462_v25 = vpop.f32.mrf.mxu1  ;;  %4401 = vmatmul.msk.f32.gmra.mxu3 %vm2253_vm15, %v4570_v42  ;;  %v4571_v42 = vld [vmem:[#allocation3 + $0x38] sm:$0xff] }
 0x399   : > { %v2463_v51 = vadd.f32 %v2462_v25, %v7815_v36  ;;  %4414 = vmatmul.msk.f32.gmra.mxu2 %vm2253_vm15, %v7415_v53  ;;  %3549 = vmatpush.msra.mxu1 %v7831_v1  ;;  %v2501_v25 = vadd.f32 %v7953_v8, %v2460_v16 }
 0x39a   : > { %v2509_v18 = vpop.f32.mrf.mxu3 }
 0x39b   : > { %v2504_v55 = vadd.f32 %v2503_v19, %v2463_v51  ;;  %v8038_v56 = vpop.f32.mrf.mxu0  ;;  %3550 = vmatpush.msra.mxu1 %v7811_v50 }
 0x39c   : > { %2789 = vmatmul.f32.gmra.mxu1 %v7841_v52  ;;  %10480 = vst [vmem:[#allocation36_spill] sm:$0xff] %v8038_v56  ;;  %3028 = vrot.lane.b32.xlu2 %v7929_v29, %s4682_s29 }
 0x39d   : > { %v8040_v15 = vmax.f32 %v2504_v55, 0.0  ;;  %3024 = vrot.lane.b32.xlu0 %v7946_v14, %s4682_s29  ;;  %v8054_v55 = vmax.f32 %v2501_v25, 0.0 }
 0x39f   : > { %10481 = vst [vmem:[#allocation9_spill] sm:$0xff] %v8040_v15  ;;  %3032 = vrot.lane.b32.xlu1 %v8040_v15, %s4682_s29 }
 0x3a0   : > { %v2465_v19 = vpop.f32.mrf.mxu1  ;;  %4402 = vmatmul.msk.f32.gmra.mxu3 %vm2253_vm15, %v4571_v42  ;;  %10483 = vst [vmem:[#allocation35_spill] sm:$0xff] %v8054_v55  ;;  %v4572_v42 = vld [vmem:[#allocation3 + $0x48] sm:$0xff] }
 0x3a1   : > { %v2466_v52 = vadd.f32 %v2465_v19, %v7829_v30  ;;  %v8051_v57 = vpop.f32.mrf.mxu2 }
 0x3a2   : > { %10482 = vst [vmem:[#allocation62_spill] sm:$0xff] %v8051_v57  ;;  %v2512_v51 = vpop.f32.mrf.mxu3 }
 0x3a3   : > { %v2507_v45 = vadd.f32 %v2506_v5, %v2466_v52  ;;  %v8057_v8 = vpop.f32.mrf.mxu0 }
 0x3a4   : > { %2792 = vmatmul.f32.gmra.mxu1 %v7861_v0  ;;  %10484 = vst [vmem:[#allocation19_spill] sm:$0xff] %v8057_v8 }
 0x3a5   : > { %v8059_v16 = vmax.f32 %v2507_v45, 0.0  ;;  %3030 = vrot.lane.b32.xlu0 %v8054_v55, %s4682_s29 }
 0x3a7   : > { %10485 = vst [vmem:[#allocation28_spill] sm:$0xff] %v8059_v16  ;;  %3034 = vrot.lane.b32.xlu2 %v8059_v16, %s4682_s29 }
 0x3a8   : > { %v2468_v19 = vpop.f32.mrf.mxu1  ;;  %4403 = vmatmul.msk.f32.gmra.mxu3 %vm2253_vm15, %v4572_v42 }
 0x3a9   : > { %v2469_v23 = vadd.f32 %v2468_v19, %v7849_v3  ;;  %v8066_v57 = vpop.f32.mrf.mxu2 }
 0x3aa   : > { %10486 = vst [vmem:[#allocation74_spill] sm:$0xff] %v8066_v57  ;;  %v2515_v25 = vpop.f32.mrf.mxu3 }
 0x3ab   : > { %v2510_v0 = vadd.f32 %v2509_v18, %v2469_v23 }
 0x3ac   : > { %2795 = vmatmul.f32.gmra.mxu1 %v7879_v13  ;;  %v8070_v45 = vpop.f32.mrf.mxu0 }
 0x3ad   : > { %10487 = vst [vmem:[#allocation17_spill] sm:$0xff] %v8070_v45  ;;  %v8072_v5 = vmax.f32 %v2510_v0, 0.0 }
 0x3af   : > { %10488 = vst [vmem:[#allocation22_spill] sm:$0xff] %v8072_v5  ;;  %3036 = vrot.lane.b32.xlu0 %v8072_v5, %s4682_s29 }
 0x3b0   : > { %v2471_v52 = vpop.f32.mrf.mxu1  ;;  %4404 = vmatmul.msk.f32.gmra.mxu3 %vm2253_vm15, %v7340_v54 }
 0x3b1   : > { %v2472_v6 = vadd.f32 %v2471_v52, %v7875_v10 }
 0x3b2   : > { %v2518_v19 = vpop.f32.mrf.mxu3 }
 0x3b3   : > { %v2513_v57 = vadd.f32 %v2512_v51, %v2472_v6  ;;  %v8079_v59 = vpop.f32.mrf.mxu2  ;;  %v2542_v51 = vadd.f32 %v7788_v33, %v7797_v7 }
 0x3b4   : > { %10489 = vst [vmem:[#allocation37_spill] sm:$0xff] %v8079_v59  ;;  %2798 = vmatmul.f32.gmra.mxu1 %v7897_v40 }
 0x3b5   : > { %v8082_v13 = vmax.f32 %v2513_v57, 0.0  ;;  %v8084_v23 = vpop.f32.mrf.mxu0  ;;  %v2583_v52 = vadd.f32 %v7855_v58, %v2542_v51  ;;  %v2551_v58 = vadd.f32 %v7859_v47, %v7849_v3 }
 0x3b6   : > { %10490 = vst [vmem:[#allocation41_spill] sm:$0xff] %v8084_v23 }
 0x3b7   : > { %3038 = vrot.lane.b32.xlu1 %v8082_v13, %s4682_s29 }
 0x3b8   : > { %v2474_v18 = vpop.f32.mrf.mxu1  ;;  %4405 = vmatmul.msk.f32.gmra.mxu3 %vm2253_vm15, %v7387_v61 }
 0x3b9   : > { %v2475_v42 = vadd.f32 %v2474_v18, %v7895_v43 }
 0x3ba   : > { %v2521_v0 = vpop.f32.mrf.mxu3 }
 0x3bb   : > { %v2516_v54 = vadd.f32 %v2515_v25, %v2475_v42  ;;  %v8091_v6 = vpop.f32.mrf.mxu2 }
 0x3bc   : > { %10491 = vst [vmem:[#allocation80_spill] sm:$0xff] %v8091_v6  ;;  %2801 = vmatmul.f32.gmra.mxu1 %v7926_v34 }
 0x3bd   : > { %v8094_v40 = vmax.f32 %v2516_v54, 0.0  ;;  %v8096_v57 = vpop.f32.mrf.mxu0  ;;  %v8109_v54 = vmax.f32 %v2583_v52, 0.0 }
 0x3be   : > { %10492 = vst [vmem:[#allocation16_spill] sm:$0xff] %v8096_v57  ;;  %v10519_v57 = vld [vmem:[#allocation53_spill] sm:$0xff] }
 0x3bf   : > { %3040 = vrot.lane.b32.xlu2 %v8094_v40, %s4682_s29 }
 0x3c0   : > { %4406 = vmatmul.msk.f32.gmra.mxu3 %vm2253_vm15, %v7415_v53  ;;  %v2545_v53 = vadd.f32 %v7806_v26, %v7815_v36 }
 0x3c1   : > { %v2477_v18 = vpop.f32.mrf.mxu1 }
 0x3c2   : > { %v2478_v61 = vadd.f32 %v2477_v18, %v7904_v17  ;;  %v2603_v25 = vpop.f32.mrf.mxu3  ;;  %v2586_v51 = vadd.f32 %v7873_v11, %v2545_v53  ;;  %v2548_v11 = vadd.f32 %v7835_v63, %v7829_v30 }
 0x3c4   : > { %v2519_v34 = vadd.f32 %v2518_v19, %v2478_v61  ;;  %v8106_v42 = vpop.f32.mrf.mxu2  ;;  %2804 = vmatmul.f32.gmra.mxu1 %v7965_v28  ;;  %v2592_v28 = vadd.f32 %v7922_v41, %v2551_v58  ;;  %v8133_v26 = vmax.f32 %v2586_v51, 0.0  ;;  %v2560_v41 = vadd.f32 %v7951_v4, %v7904_v17  ;;  %v8150_v58 = vpop.permute.xlu2 %2998 }
 0x3c5   : > { %10493 = vst [vmem:[#allocation26_spill] sm:$0xff] %v8106_v42  ;;  %v8111_v33 = vpop.f32.mrf.mxu0  ;;  %v2589_v53 = vadd.f32 %v7893_v20, %v2548_v11  ;;  %v2563_v20 = vadd.f32 %v7995_v24, %v7902_v12 }
 0x3c6   : > { %10494 = vst [vmem:[#allocation66_spill] sm:$0xff] %v8111_v33  ;;  %v8113_v59 = vmax.f32 %v2519_v34, 0.0  ;;  %v8129_v47 = vmax.f32 %v2592_v28, 0.0 }
 0x3c7   : > { %3046 = vrot.lane.b32.xlu2 %v8109_v54, %s4682_s29 }
 0x3c8   : > { %3042 = vrot.lane.b32.xlu0 %v8113_v59, %s4682_s29 }
 0x3c9   : > { %v2480_v19 = vpop.f32.mrf.mxu1 }
 0x3ca   : > { %v2481_v52 = vadd.f32 %v2480_v19, %v7902_v12 }
 0x3cb   : > { %v2664_v18 = vpop.f32.mrf.mxu3 }
 0x3cc   : > { %v2522_v61 = vadd.f32 %v2521_v0, %v2481_v52  ;;  %v8126_v34 = vpop.f32.mrf.mxu2  ;;  %2807 = vmatmul.f32.gmra.mxu1 %v7997_v9  ;;  %v2554_v9 = vadd.f32 %v7882_v21, %v7875_v10  ;;  %v2601_v0 = vadd.f32 %v8028_v39, %v2560_v41  ;;  %v8160_v52 = vmax.f32 %v2589_v53, 0.0 }
 0x3cd   : > { %10495 = vst [vmem:[#allocation78_spill] sm:$0xff] %v8126_v34  ;;  %v8131_v56 = vpop.f32.mrf.mxu0  ;;  %v2557_v39 = vadd.f32 %v7908_v31, %v7895_v43 }
 0x3ce   : > { %10496 = vst [vmem:[#allocation100_spill] sm:$0xff] %v8131_v56  ;;  %v8135_v55 = vmax.f32 %v2522_v61, 0.0  ;;  %v2595_v28 = vadd.f32 %v7971_v46, %v2554_v9  ;;  %v8158_v21 = vmax.f32 %v2601_v0, 0.0  ;;  %v8174_v46 = vpop.permute.xlu2 %3004  ;;  %v2604_v9 = vadd.f32 %v2603_v25, %v2563_v20 }
 0x3cf   : > { %3052 = vrot.lane.b32.xlu2 %v8129_v47, %s4682_s29  ;;  %10500 = vst [vmem:[#allocation103_spill] sm:$0xff] %v8174_v46  ;;  %v2598_v11 = vadd.f32 %v8006_v60, %v2557_v39 }
 0x3d0   : > { %10497 = vst [vmem:[#allocation24_spill] sm:$0xff] %v8135_v55  ;;  %3048 = vrot.lane.b32.xlu0 %v8133_v26, %s4682_s29  ;;  %3044 = vrot.lane.b32.xlu1 %v8135_v55, %s4682_s29  ;;  %v8162_v61 = vmax.f32 %v2595_v28, 0.0  ;;  %v8185_v24 = vmax.f32 %v2604_v9, 0.0 }
 0x3d1   : > { %v2623_v4 = vpop.f32.mrf.mxu1  ;;  %v8183_v28 = vmax.f32 %v2598_v11, 0.0 }
 0x3d3   : > { %v8154_v19 = vpop.f32.mrf.mxu3 }
 0x3d4   : > { %10498 = vst [vmem:[#allocation117_spill] sm:$0xff] %v8154_v19  ;;  %v8156_v63 = vpop.f32.mrf.mxu2  ;;  %v2624_v19 = vadd.f32 %v2623_v4, %v7797_v7 }
 0x3d5   : > { %10499 = vst [vmem:[#allocation18_spill] sm:$0xff] %v8156_v63  ;;  %v2869_v51 = vpop.f32.mrf.mxu0  ;;  %v8205_v6 = vpop.permute.xlu1 %3002 }
 0x3d6   : > { %v2665_v25 = vadd.f32 %v2664_v18, %v2624_v19  ;;  %v2870_v39 = vadd.f32 %v2869_v51, %v7797_v7 }
 0x3d7   : > { %3058 = vrot.lane.b32.xlu2 %v8158_v21, %s4682_s29 }
 0x3d8   : > { %3054 = vrot.lane.b32.xlu0 %v8162_v61, %s4682_s29  ;;  %3050 = vrot.lane.b32.xlu1 %v8160_v52, %s4682_s29 }
 0x3d9   : > { %v8176_v41 = vpop.f32.mrf.mxu1 }
 0x3da   : > { %10501 = vst [vmem:[#allocation89_spill] sm:$0xff] %v8176_v41 }
 0x3db   : > { %v8179_v0 = vpop.f32.mrf.mxu3 }
 0x3dc   : > { %10502 = vst [vmem:[#allocation63_spill] sm:$0xff] %v8179_v0  ;;  %v8181_v53 = vpop.f32.mrf.mxu2  ;;  %v8201_v0 = vmax.f32 %v2665_v25, 0.0 }
 0x3dd   : > { %10503 = vst [vmem:[#allocation64_spill] sm:$0xff] %v8181_v53  ;;  %v2872_v31 = vpop.f32.mrf.mxu0 }
 0x3de   : > { %v8192_v41 = vpop.permute.xlu2 %3010  ;;  %10507 = vst [vmem:[#allocation54_spill] sm:$0xff] %v8201_v0  ;;  %v2873_v18 = vadd.f32 %v2872_v31, %v7815_v36 }
 0x3df   : > { %10504 = vst [vmem:[#allocation86_spill] sm:$0xff] %v8192_v41 }
 0x3e0   : > { %3060 = vrot.lane.b32.xlu0 %v8185_v24, %s4682_s29  ;;  %3056 = vrot.lane.b32.xlu1 %v8183_v28, %s4682_s29 }
 0x3e1   : > { %v8194_v60 = vpop.f32.mrf.mxu1 }
 0x3e2   : > { %10505 = vst [vmem:[#allocation72_spill] sm:$0xff] %v8194_v60 }
 0x3e3   : > { %v8197_v20 = vpop.f32.mrf.mxu3 }
 0x3e4   : > { %10506 = vst [vmem:[#allocation61_spill] sm:$0xff] %v8197_v20  ;;  %v2910_v11 = vpop.f32.mrf.mxu2 }
 0x3e5   : > { %v8199_v9 = vadd.f32 %v2910_v11, %v2870_v39  ;;  %v8203_v4 = vpop.f32.mrf.mxu0  ;;  %v8216_v39 = vpop.permute.xlu0 %3000 }
 0x3e6   : > { %v3017_v19 = vpop.permute.xlu2 %3016 }
 0x3e8   : > { %3062 = vrot.lane.b32.xlu1 %v8201_v0, %s4682_s29 }
 0x3e9   : > { %v8209_v8 = vpop.f32.mrf.mxu1 }
 0x3ea   : > { %10508 = vst [vmem:[#allocation94_spill] sm:$0xff] %v8209_v8 }
 0x3eb   : > { %v8212_v51 = vpop.f32.mrf.mxu3 }
 0x3ec   : > { %10509 = vst [vmem:[#allocation76_spill] sm:$0xff] %v8212_v51  ;;  %v2913_v60 = vpop.f32.mrf.mxu2 }
 0x3ed   : > { %v8214_v20 = vadd.f32 %v2913_v60, %v2873_v18  ;;  %v8218_v25 = vpop.permute.xlu1 %3008  ;;  %v8220_v11 = vpop.f32.mrf.mxu0 }
 0x3ee   : > { %10511 = vst [vmem:[#allocation60_spill] sm:$0xff] %v8218_v25  ;;  %v8228_v8 = vpop.permute.xlu2 %3022  ;;  %v8230_v31 = vpop.permute.xlu0 %3006 }
 0x3ef   : > { %10510 = vst [vmem:[#allocation11_spill] sm:$0xff] %v8214_v20 }
 0x3f0   : > { %10514 = vst [vmem:[#allocation68_spill] sm:$0xff] %v8230_v31 }
 0x3f1   : > { %v8222_v7 = vpop.f32.mrf.mxu1 }
 0x3f2   : > { %10512 = vst [vmem:[#allocation25_spill] sm:$0xff] %v8222_v7 }
 0x3f3   : > { %v8224_v42 = vpop.f32.mrf.mxu3 }
 0x3f4   : > { %10513 = vst [vmem:[#allocation77_spill] sm:$0xff] %v8224_v42  ;;  %v8226_v0 = vpop.f32.mrf.mxu2 }
 0x3f5   : > { %v3015_v51 = vpop.permute.xlu1 %3014  ;;  %v8234_v60 = vpop.f32.mrf.mxu0 }
 0x3f6   : > { %v8240_v23 = vpop.permute.xlu2 %3028 }
 0x3f7   : > { %10517 = vst [vmem:[#allocation91_spill] sm:$0xff] %v8240_v23 }
 0x3f9   : > { %v8232_v45 = vpop.f32.mrf.mxu1 }
 0x3fa   : > { %10515 = vst [vmem:[#allocation96_spill] sm:$0xff] %v8232_v45 }
 0x3fb   : > { %v8236_v18 = vpop.f32.mrf.mxu3 }
 0x3fc   : > { %10516 = vst [vmem:[#allocation12_spill] sm:$0xff] %v8236_v18  ;;  %v8238_v34 = vpop.f32.mrf.mxu2 }
 0x3fd   : > { %v8244_v42 = vpop.permute.xlu1 %3020  ;;  %v2884_v18 = vpop.f32.mrf.mxu0 }
 0x3ff   : > { %v8242_v7 = vpop.permute.xlu0 %3012 }
 0x400   : > { %10518 = vst [vmem:[#allocation108_spill] sm:$0xff] %v8242_v7  ;;  %v3181_v49 = vsel %vm1069_vm5, %v8242_v7, %v8240_v23 }
 0x401   : > { %v3247_v15 = vmul.f32 %v10519_v57, %v3181_v49  ;;  %v8251_v45 = vpop.f32.mrf.mxu1  ;;  %v8277_v20 = vpop.permute.xlu2 %3034 }
 0x402   : > { %10520 = vst [vmem:[#allocation33_spill] sm:$0xff] %v8251_v45 }
 0x403   : > { %3609 = vmatpush.msra.mxu0 %v3247_v15  ;;  %v8253_v63 = vpop.f32.mrf.mxu3  ;;  %v2885_v15 = vadd.f32 %v2884_v18, %v7895_v43 }
 0x404   : > { %10521 = vst [vmem:[#allocation71_spill] sm:$0xff] %v8253_v63  ;;  %v8255_v53 = vpop.f32.mrf.mxu2 }
 0x405   : > { %v8259_v56 = vpop.permute.xlu1 %3026  ;;  %v2887_v16 = vpop.f32.mrf.mxu0 }
 0x406   : > { %v3180_v5 = vsel %vm1069_vm5, %v8192_v41, %v8259_v56  ;;  %v3178_v41 = vsel %vm1069_vm5, %v8230_v31, %v8228_v8 }
 0x407   : > { %v8257_v33 = vpop.permute.xlu0 %3018  ;;  %v3239_v49 = vmul.f32 %v10519_v57, %v3180_v5 }
 0x408   : > { %10522 = vst [vmem:[#allocation90_spill] sm:$0xff] %v8257_v33 }
 0x409   : > { %v8265_v23 = vpop.f32.mrf.mxu1  ;;  %3610 = vmatpush.msra.mxu0 %v3239_v49 }
 0x40a   : > { %10523 = vst [vmem:[#allocation97_spill] sm:$0xff] %v8265_v23 }
 0x40b   : > { %v8269_v7 = vpop.f32.mrf.mxu3 }
 0x40c   : > { %10524 = vst [vmem:[#allocation95_spill] sm:$0xff] %v8269_v7  ;;  %v2925_v63 = vpop.f32.mrf.mxu2 }
 0x40d   : > { %v2926_v45 = vadd.f32 %v2925_v63, %v2885_v15  ;;  %v3177_v63 = vsel %vm1069_vm5, %v8174_v46, %v8244_v42  ;;  %v3223_v15 = vmul.f32 %v10519_v57, %v3178_v41 }
 0x40f   : > { %v8271_v50 = vmax.f32 %v2926_v45, 0.0  ;;  %v3025_v1 = vpop.permute.xlu0 %3024 }
 0x410   : > { %v3179_v5 = vsel %vm1069_vm5, %v8218_v25, %v3025_v1  ;;  %v3176_v25 = vsel %vm1069_vm5, %v8205_v6, %v8257_v33 }
 0x411   : > { %10525 = vst [vmem:[#allocation13_spill] sm:$0xff] %v8271_v50  ;;  %v3231_v18 = vmul.f32 %v10519_v57, %v3179_v5  ;;  %v8283_v7 = vpop.f32.mrf.mxu1  ;;  %3120 = vrot.lane.b32.xlu1 %v8271_v50, %s4682_s29  ;;  %v8287_v45 = vpop.permute.xlu1 %3032  ;;  %v2888_v5 = vadd.f32 %v2887_v16, %v7904_v17  ;;  %v3215_v50 = vmul.f32 %v10519_v57, %v3177_v63 }
 0x412   : > { %10526 = vst [vmem:[#allocation70_spill] sm:$0xff] %v8283_v7  ;;  %v8296_v49 = vsel %vm1069_vm5, %v3017_v19, %v8287_v45  ;;  %v3207_v41 = vmul.f32 %v10519_v57, %v3176_v25 }
 0x413   : > { %10527 = vst [vmem:[#allocation107_spill] sm:$0xff] %v8296_v49  ;;  %3611 = vmatpush.msra.mxu0 %v3231_v18  ;;  %v2831_v31 = vpop.f32.mrf.mxu3  ;;  %v3175_v49 = vsel %vm1069_vm5, %v8216_v39, %v3017_v19  ;;  %v2890_v18 = vpop.f32.mrf.mxu0 }
 0x414   : > { %v2928_v7 = vpop.f32.mrf.mxu2 }
 0x415   : > { %v2929_v46 = vadd.f32 %v2928_v7, %v2888_v5  ;;  %3612 = vmatpush.msra.mxu0 %v3223_v15  ;;  %v3174_v7 = vsel %vm1069_vm5, %v8150_v58, %v3015_v51 }
 0x416   : > { %v3191_v5 = vmul.f32 %v10519_v57, %v3174_v7 }
 0x417   : > { %v8308_v23 = vmax.f32 %v2929_v46, 0.0  ;;  %3613 = vmatpush.msra.mxu0 %v3215_v50  ;;  %v8310_v16 = vpop.permute.xlu0 %3030  ;;  %v3199_v46 = vmul.f32 %v10519_v57, %v3175_v49 }
 0x418   : > { %v8316_v63 = vsel %vm1069_vm5, %v3015_v51, %v8310_v16  ;;  %v2891_v51 = vadd.f32 %v2890_v18, %v7902_v12 }
 0x419   : > { %10528 = vst [vmem:[#allocation43_spill] sm:$0xff] %v8308_v23  ;;  %v2790_v15 = vpop.f32.mrf.mxu1  ;;  %3122 = vrot.lane.b32.xlu0 %v8308_v23, %s4682_s29  ;;  %3300 = vrot.lane.b32.xlu1 %v8135_v55, %s4685_s15  ;;  %v8325_v50 = vpop.permute.xlu2 %3040 }
 0x41a   : > { %10529 = vst [vmem:[#allocation34_spill] sm:$0xff] %v8316_v63  ;;  %v2791_v19 = vadd.f32 %v2790_v15, %v7815_v36  ;;  %v8332_v25 = vsel %vm1069_vm5, %v3025_v1, %v8325_v50  ;;  %3614 = vmatpush.msra.mxu0 %v3207_v41  ;;  %v2879_v41 = vadd.f32 %v8220_v11, %v7849_v3 }
 0x41b   : > { %v2834_v55 = vpop.f32.mrf.mxu3 }
 0x41c   : > { %v8336_v23 = vadd.f32 %v2831_v31, %v2791_v19  ;;  %v2931_v63 = vpop.f32.mrf.mxu2  ;;  %3615 = vmatpush.msra.mxu0 %v3199_v46 }
 0x41d   : > { %v2932_v33 = vadd.f32 %v2931_v63, %v2891_v51 }
 0x41e   : > { %3616 = vmatpush.msra.mxu0 %v3191_v5  ;;  %v10540_v5 = vld [vmem:[#allocation11_spill] sm:$0xff] }
 0x41f   : > { %v8338_v49 = vmax.f32 %v2932_v33, 0.0 }
 0x420   : > { %3717 = vmatpush.msrb.mxu0 %v8185_v24 }
 0x421   : > { %10530 = vst [vmem:[#allocation20_spill] sm:$0xff] %v8338_v49  ;;  %v2793_v15 = vpop.f32.mrf.mxu1  ;;  %3284 = vrot.lane.b32.xlu0 %v7929_v29, %s4685_s15  ;;  %3282 = vrot.lane.b32.xlu1 %v7935_v62, %s4685_s15  ;;  %v8349_v57 = vpop.permute.xlu0 %3036  ;;  %v2876_v62 = vadd.f32 %v8203_v4, %v7829_v30 }
 0x422   : > { %v2794_v1 = vadd.f32 %v2793_v15, %v7829_v30  ;;  %3124 = vrot.lane.b32.xlu2 %v8338_v49, %s4682_s29  ;;  %3718 = vmatpush.msrb.mxu0 %v8158_v21  ;;  %v8355_v33 = vsel %vm1069_vm5, %v8244_v42, %v8349_v57  ;;  %v2882_v42 = vadd.f32 %v8234_v60, %v7875_v10  ;;  %v8445_v15 = vmax.f32 %v10540_v5, 0.0  ;;  %v10549_v5 = vld [vmem:[#allocation22_spill] sm:$0xff] }
 0x423   : > { %v2837_v29 = vpop.f32.mrf.mxu3 }
 0x424   : > { %v8357_v31 = vadd.f32 %v2834_v55, %v2794_v1  ;;  %3719 = vmatpush.msrb.mxu0 %v8183_v28  ;;  %v2923_v11 = vadd.f32 %v8255_v53, %v2882_v42  ;;  %10541 = vst [vmem:[#allocation101_spill] sm:$0xff] %v8445_v15 }
 0x426   : > { %3720 = vmatpush.msrb.mxu0 %v8162_v61  ;;  %v8392_v46 = vmax.f32 %v2923_v11, 0.0  ;;  %v10547_v11 = vld [vmem:[#allocation10_spill] sm:$0xff] }
 0x428   : > { %3721 = vmatpush.msrb.mxu0 %v8129_v47  ;;  %10533 = vst [vmem:[#allocation67_spill] sm:$0xff] %v8392_v46 }
 0x429   : > { %v2796_v18 = vpop.f32.mrf.mxu1  ;;  %3264 = vrot.lane.b32.xlu1 %v7920_v22, %s4685_s15  ;;  %3266 = vrot.lane.b32.xlu0 %v7958_v2, %s4685_s15  ;;  %v3039_v55 = vpop.permute.xlu1 %3038  ;;  %v2917_v22 = vadd.f32 %v8226_v0, %v2876_v62  ;;  %v2920_v2 = vadd.f32 %v8238_v34, %v2879_v41  ;;  %v10546_v62 = vld [vmem:[#allocation45_spill] sm:$0xff] }
 0x42a   : > { %v2797_v63 = vadd.f32 %v2796_v18, %v7849_v3  ;;  %3268 = vrot.lane.b32.xlu2 %v7992_v32, %s4685_s15  ;;  %3722 = vmatpush.msrb.mxu0 %v8160_v52  ;;  %v8379_v4 = vsel %vm1069_vm5, %v8228_v8, %v3039_v55  ;;  %v8411_v0 = vpop.permute.xlu2 %3046 }
 0x42b   : > { %v8388_v32 = vmax.f32 %v2917_v22, 0.0  ;;  %v8390_v60 = vmax.f32 %v2920_v2, 0.0  ;;  %10534 = vst [vmem:[#allocation52_spill] sm:$0xff] %v8411_v0 }
 0x42c   : > { %v8384_v7 = vadd.f32 %v2837_v29, %v2797_v63  ;;  %3723 = vmatpush.msrb.mxu0 %v8133_v26 }
 0x42d   : > { %10531 = vst [vmem:[#allocation99_spill] sm:$0xff] %v8388_v32 }
 0x42e   : > { %3724 = vmatpush.msrb.mxu0 %v8109_v54  ;;  %10532 = vst [vmem:[#allocation111_spill] sm:$0xff] %v8390_v60 }
 0x431   : > { %3114 = vrot.lane.b32.xlu1 %v8388_v32, %s4682_s29  ;;  %3116 = vrot.lane.b32.xlu0 %v8390_v60, %s4682_s29  ;;  %v10595_v32 = vld [vmem:[#allocation68_spill] sm:$0xff] }
 0x432   : > { %3118 = vrot.lane.b32.xlu2 %v8392_v46, %s4682_s29  ;;  %v8429_v51 = vpop.permute.xlu2 %3052 }
 0x433   : > { %10536 = vst [vmem:[#allocation73_spill] sm:$0xff] %v8429_v51  ;;  %v3161_v2 = vsel %vm1069_vm5, %v8349_v57, %v8429_v51  ;;  %v10550_v57 = vld [vmem:[#allocation100_spill] sm:$0xff]  ;;  %v10572_v51 = vld [vmem:[#allocation62_spill] sm:$0xff] }
 0x439   : > { %3294 = vrot.lane.b32.xlu1 %v8082_v13, %s4685_s15  ;;  %3296 = vrot.lane.b32.xlu0 %v8094_v40, %s4685_s15 }
 0x43a   : > { %3298 = vrot.lane.b32.xlu2 %v8113_v59, %s4685_s15  ;;  %v3043_v8 = vpop.permute.xlu0 %3042  ;;  %v8447_v1 = vpop.permute.xlu2 %3058 }
 0x43b   : > { %v8409_v34 = vsel %vm1069_vm5, %v8259_v56, %v3043_v8  ;;  %v8426_v56 = vld [vmem:[%s9757_s5] sm:$0xff]  ;;  %10542 = vst [vmem:[#allocation65_spill] sm:$0xff] %v8447_v1 }
 0x43c   : > { %3617 = vmatmul.f32.vlgmr.msra.gmra.mxu0 %v8426_v56 }
 0x441   : > { %3276 = vrot.lane.b32.xlu1 %v7979_v38, %s4685_s15  ;;  %3278 = vrot.lane.b32.xlu0 %v7963_v48, %s4685_s15  ;;  %v8442_v38 = vmax.f32 %v8199_v9, 0.0  ;;  %v3164_v9 = vsel %vm1069_vm5, %v3043_v8, %v8447_v1 }
 0x442   : > { %3280 = vrot.lane.b32.xlu2 %v7946_v14, %s4685_s15  ;;  %v8419_v53 = vpop.permute.xlu1 %3044  ;;  %v8421_v19 = vpop.permute.xlu0 %3048  ;;  %v3241_v42 = vmul.f32 %v10546_v62, %v3164_v9  ;;  %v2727_v9 = vadd.f32 %v10550_v57, %v7902_v12 }
 0x443   : > { %10535 = vst [vmem:[#allocation92_spill] sm:$0xff] %v8421_v19 }
 0x444   : > { %10539 = vst [vmem:[#allocation85_spill] sm:$0xff] %v8442_v38 }
 0x449   : > { %3258 = vrot.lane.b32.xlu1 %v7851_v27, %s4685_s15  ;;  %3260 = vrot.lane.b32.xlu0 %v7869_v44, %s4685_s15  ;;  %v10543_v27 = vld [vmem:[#allocation69_spill] sm:$0xff] }
 0x44a   : > { %3262 = vrot.lane.b32.xlu2 %v7891_v37, %s4685_s15  ;;  %v8437_v14 = vpop.permute.xlu1 %3050  ;;  %v8439_v48 = vpop.permute.xlu0 %3054 }
 0x44b   : > { %10537 = vst [vmem:[#allocation87_spill] sm:$0xff] %v8437_v14  ;;  %v3162_v63 = vsel %vm1069_vm5, %v3039_v55, %v8439_v48  ;;  %v3160_v55 = vsel %vm1069_vm5, %v8277_v20, %v8437_v14 }
 0x44c   : > { %10538 = vst [vmem:[#allocation102_spill] sm:$0xff] %v8439_v48  ;;  %v3225_v8 = vmul.f32 %v10546_v62, %v3162_v63  ;;  %v10552_v63 = vld [vmem:[#allocation64_spill] sm:$0xff] }
 0x451   : > { %3256 = vrot.lane.b32.xlu1 %v10543_v27, %s4685_s15  ;;  %3110 = vrot.lane.b32.xlu0 %v8442_v38, %s4682_s29  ;;  %v3217_v27 = vmul.f32 %v10546_v62, %v3161_v2 }
 0x452   : > { %3112 = vrot.lane.b32.xlu2 %v8445_v15, %s4682_s29  ;;  %v8455_v44 = vpop.permute.xlu1 %3056  ;;  %v8457_v37 = vpop.permute.xlu0 %3060 }
 0x453   : > { %10544 = vst [vmem:[#allocation32_spill] sm:$0xff] %v8455_v44  ;;  %v3165_v29 = vsel %vm1069_vm5, %v8419_v53, %v8457_v37  ;;  %v3163_v18 = vsel %vm1069_vm5, %v8325_v50, %v8455_v44  ;;  %v10548_v50 = vld [vmem:[#allocation28_spill] sm:$0xff] }
 0x454   : > { %10545 = vst [vmem:[#allocation113_spill] sm:$0xff] %v8457_v37  ;;  %v3249_v41 = vmul.f32 %v10546_v62, %v3165_v29  ;;  %v3233_v22 = vmul.f32 %v10546_v62, %v3163_v18  ;;  %v3159_v29 = vsel %vm1069_vm5, %v8287_v45, %v8421_v19  ;;  %v10551_v18 = vld [vmem:[#allocation66_spill] sm:$0xff] }
 0x455   : > { %v3201_v57 = vmul.f32 %v10546_v62, %v3159_v29  ;;  %v10554_v45 = vld [vmem:[#allocation18_spill] sm:$0xff]  ;;  %v10558_v29 = vld [vmem:[#allocation12_spill] sm:$0xff] }
 0x456   : > { %3725 = vmatpush.msrb.mxu0 %v3249_v41  ;;  %v3209_v41 = vmul.f32 %v10546_v62, %v3160_v55  ;;  %v10555_v55 = vld [vmem:[#allocation9_spill] sm:$0xff] }
 0x458   : > { %3726 = vmatpush.msrb.mxu0 %v3241_v42  ;;  %v2724_v42 = vadd.f32 %v10551_v18, %v7904_v17 }
 0x459   : > { %3254 = vrot.lane.b32.xlu1 %v10547_v11, %s4685_s15  ;;  %3290 = vrot.lane.b32.xlu0 %v10548_v50, %s4685_s15  ;;  %v10553_v11 = vld [vmem:[#allocation33_spill] sm:$0xff] }
 0x45a   : > { %3292 = vrot.lane.b32.xlu2 %v10549_v5, %s4685_s15  ;;  %3727 = vmatpush.msrb.mxu0 %v3233_v22  ;;  %v2768_v22 = vadd.f32 %v10552_v63, %v2727_v9  ;;  %v2642_v2 = vadd.f32 %v10553_v11, %v7904_v17  ;;  %v2765_v19 = vadd.f32 %v10554_v45, %v2724_v42  ;;  %v10557_v63 = vld [vmem:[#allocation104_spill] sm:$0xff]  ;;  %v10559_v42 = vld [vmem:[#allocation41_spill] sm:$0xff] }
 0x45b   : > { %v2718_v11 = vadd.f32 %v10559_v42, %v7875_v10 }
 0x45c   : > { %3728 = vmatpush.msrb.mxu0 %v3225_v8  ;;  %v3158_v8 = vsel %vm1069_vm5, %v8310_v16, %v8411_v0  ;;  %v8519_v16 = vmax.f32 %v2768_v22, 0.0  ;;  %v8525_v0 = vmax.f32 %v2765_v19, 0.0  ;;  %v10563_v22 = vld [vmem:[#allocation19_spill] sm:$0xff] }
 0x45d   : > { %v3193_v18 = vmul.f32 %v10546_v62, %v3158_v8  ;;  %v10561_v62 = vld [vmem:[#allocation17_spill] sm:$0xff]  ;;  %v10565_v19 = vld [vmem:[#allocation35_spill] sm:$0xff] }
 0x45e   : > { %3729 = vmatpush.msrb.mxu0 %v3217_v27  ;;  %v10556_v27 = vld [vmem:[#allocation16_spill] sm:$0xff]  ;;  %v2715_v8 = vadd.f32 %v10561_v62, %v7849_v3 }
 0x45f   : > { %v2721_v9 = vadd.f32 %v10556_v27, %v7895_v43  ;;  %v10562_v27 = vld [vmem:[#allocation26_spill] sm:$0xff] }
 0x460   : > { %3730 = vmatpush.msrb.mxu0 %v3209_v41  ;;  %v2683_v41 = vadd.f32 %v10558_v29, %v2642_v2  ;;  %v2712_v2 = vadd.f32 %v10563_v22, %v7829_v30  ;;  %v10564_v29 = vld [vmem:[#allocation80_spill] sm:$0xff] }
 0x461   : > { %3316 = vrot.lane.b32.xlu1 %v8185_v24, %s4685_s15  ;;  %3288 = vrot.lane.b32.xlu0 %v10555_v55, %s4685_s15  ;;  %v10560_v24 = vld [vmem:[#allocation78_spill] sm:$0xff]  ;;  %v2756_v42 = vadd.f32 %v10564_v29, %v2715_v8  ;;  %v10570_v8 = vld [vmem:[#allocation105_spill] sm:$0xff] }
 0x462   : > { %3274 = vrot.lane.b32.xlu2 %v10557_v63, %s4685_s15  ;;  %3731 = vmatpush.msrb.mxu0 %v3201_v57  ;;  %v2762_v45 = vadd.f32 %v10560_v24, %v2721_v9  ;;  %v2759_v63 = vadd.f32 %v10562_v27, %v2718_v11  ;;  %v8531_v57 = vmax.f32 %v2683_v41, 0.0  ;;  %v10567_v41 = vld [vmem:[#allocation37_spill] sm:$0xff]  ;;  %v10568_v27 = vld [vmem:[#allocation50_spill] sm:$0xff] }
 0x463   : > { %v2753_v24 = vadd.f32 %v10567_v41, %v2712_v2  ;;  %v10571_v29 = vld [vmem:[#allocation74_spill] sm:$0xff]  ;;  %v8554_v15 = vmax.f32 %v2756_v42, 0.0  ;;  %v10574_v41 = vld [vmem:[#allocation96_spill] sm:$0xff] }
 0x464   : > { %3732 = vmatpush.msrb.mxu0 %v3193_v18  ;;  %v8537_v9 = vmax.f32 %v2762_v45, 0.0  ;;  %v10566_v18 = vld [vmem:[#allocation36_spill] sm:$0xff]  ;;  %v8546_v62 = vmax.f32 %v2759_v63, 0.0  ;;  %v10573_v63 = vld [vmem:[#allocation94_spill] sm:$0xff] }
 0x465   : > { %v2709_v11 = vadd.f32 %v10566_v18, %v7815_v36  ;;  %v10569_v45 = vld [vmem:[#allocation88_spill] sm:$0xff]  ;;  %v8558_v60 = vmax.f32 %v2753_v24, 0.0  ;;  %v2633_v2 = vadd.f32 %v10573_v63, %v7849_v3  ;;  %v10577_v3 = vld [vmem:[#allocation14_spill] sm:$0xff] }
 0x466   : > { %3833 = vmatpush.msra.mxu0 %v8519_v16  ;;  %v2706_v22 = vadd.f32 %v10570_v8, %v10569_v45  ;;  %v10579_v8 = vld [vmem:[#allocation77_spill] sm:$0xff] }
 0x467   : > { %v2750_v14 = vadd.f32 %v10571_v29, %v2709_v11  ;;  %v10575_v11 = vld [vmem:[#allocation97_spill] sm:$0xff]  ;;  %v10580_v29 = vld [vmem:[#allocation71_spill] sm:$0xff] }
 0x468   : > { %3834 = vmatpush.msra.mxu0 %v8525_v0  ;;  %v2747_v18 = vadd.f32 %v10572_v51, %v2706_v22  ;;  %v2645_v42 = vadd.f32 %v10575_v11, %v7902_v12 }
 0x469   : > { %3330 = vrot.lane.b32.xlu1 %v8531_v57, %s4685_s15  ;;  %3286 = vrot.lane.b32.xlu0 %v10565_v19, %s4685_s15  ;;  %v8565_v38 = vmax.f32 %v2750_v14, 0.0  ;;  %v10578_v14 = vld [vmem:[#allocation61_spill] sm:$0xff] }
 0x46a   : > { %3272 = vrot.lane.b32.xlu2 %v10568_v27, %s4685_s15  ;;  %3835 = vmatpush.msra.mxu0 %v8537_v9  ;;  %v2639_v27 = vadd.f32 %v10574_v41, %v7895_v43  ;;  %v8574_v51 = vmax.f32 %v2747_v18, 0.0  ;;  %v2674_v24 = vadd.f32 %v10578_v14, %v2633_v2  ;;  %v2686_v63 = vadd.f32 %v10580_v29, %v2645_v42  ;;  %v8583_v41 = vpop.f32.mrf.mxu1  ;;  %v8595_v2 = vpop.f32.mrf.mxu3  ;;  %v10583_v42 = vld [vmem:[#allocation108_spill] sm:$0xff]  ;;  %v10586_v29 = vld [vmem:[#allocation25_spill] sm:$0xff] }
 0x46b   : > { %v10584_v14 = vld [vmem:[#allocation84_spill] sm:$0xff] }
 0x46c   : > { %3836 = vmatpush.msra.mxu0 %v8546_v62  ;;  %10576 = vst [vmem:[#allocation30_spill] sm:$0xff] %v8574_v51  ;;  %v2680_v22 = vadd.f32 %v10579_v8, %v2639_v27  ;;  %v8589_v18 = vmax.f32 %v2686_v63, 0.0  ;;  %v8599_v27 = vpop.permute.xlu1 %3062  ;;  %v10585_v8 = vld [vmem:[#allocation72_spill] sm:$0xff]  ;;  %v2636_v63 = vadd.f32 %v10586_v29, %v7875_v10 }
 0x46d   : > { %10581 = vst [vmem:[#allocation109_spill] sm:$0xff] %v8599_v27 }
 0x46e   : > { %3837 = vmatpush.msra.mxu0 %v8554_v15 }
 0x470   : > { %3838 = vmatpush.msra.mxu0 %v8558_v60 }
 0x471   : > { %3310 = vrot.lane.b32.xlu1 %v8162_v61, %s4685_s15  ;;  %3314 = vrot.lane.b32.xlu0 %v8158_v21, %s4685_s15  ;;  %v8585_v61 = vmax.f32 %v2674_v24, 0.0  ;;  %v8587_v21 = vmax.f32 %v2680_v22, 0.0  ;;  %v2630_v22 = vadd.f32 %v10585_v8, %v7829_v30  ;;  %v10589_v30 = vld [vmem:[#allocation76_spill] sm:$0xff] }
 0x472   : > { %3270 = vrot.lane.b32.xlu2 %v10577_v3, %s4685_s15  ;;  %3839 = vmatpush.msra.mxu0 %v8565_v38  ;;  %v8612_v48 = vpop.f32.mrf.mxu1  ;;  %v2677_v8 = vadd.f32 %v10589_v30, %v2636_v63  ;;  %v8624_v27 = vpop.f32.mrf.mxu3  ;;  %v10594_v30 = vld [vmem:[#allocation60_spill] sm:$0xff] }
 0x474   : > { %3840 = vmatpush.msra.mxu0 %v8574_v51  ;;  %v8630_v44 = vmax.f32 %v2677_v8, 0.0 }
 0x479   : > { %3324 = vrot.lane.b32.xlu1 %v8585_v61, %s4685_s15  ;;  %3328 = vrot.lane.b32.xlu0 %v8587_v21, %s4685_s15 }
 0x47a   : > { %3332 = vrot.lane.b32.xlu2 %v8589_v18, %s4685_s15  ;;  %v2846_v46 = vpop.f32.mrf.mxu3 }
 0x47c   : > { %v8601_v11 = vpop.permute.xlu2 %3124 }
 0x47d   : > { %10582 = vst [vmem:[#allocation21_spill] sm:$0xff] %v8601_v11  ;;  %v3189_v3 = vsel %vm1069_vm5, %v8601_v11, %v10583_v42  ;;  %v10587_v42 = vld [vmem:[#allocation63_spill] sm:$0xff] }
 0x47e   : > { %v3246_v24 = vmul.f32 %v10584_v14, %v3189_v3  ;;  %v2671_v3 = vadd.f32 %v10587_v42, %v2630_v22  ;;  %v10593_v42 = vld [vmem:[#allocation86_spill] sm:$0xff] }
 0x480   : > { %3551 = vmatpush.msra.mxu1 %v3246_v24  ;;  %v8628_v24 = vmax.f32 %v2671_v3, 0.0 }
 0x481   : > { %3304 = vrot.lane.b32.xlu1 %v8133_v26, %s4685_s15  ;;  %3308 = vrot.lane.b32.xlu0 %v8129_v47, %s4685_s15  ;;  %v10590_v26 = vld [vmem:[#allocation54_spill] sm:$0xff]  ;;  %v2805_v47 = vpop.f32.mrf.mxu1 }
 0x482   : > { %3312 = vrot.lane.b32.xlu2 %v8183_v28, %s4685_s15 }
 0x483   : > { %v8621_v11 = vpop.permute.xlu1 %3120 }
 0x484   : > { %10588 = vst [vmem:[#allocation81_spill] sm:$0xff] %v8621_v11  ;;  %v8626_v29 = vpop.permute.xlu2 %3268  ;;  %v3187_v8 = vsel %vm1069_vm5, %v8621_v11, %v10594_v30  ;;  %v2849_v11 = vpop.f32.mrf.mxu3 }
 0x485   : > { %v3230_v51 = vmul.f32 %v10584_v14, %v3187_v8  ;;  %v10599_v8 = vld [vmem:[#allocation55_spill] sm:$0xff] }
 0x489   : > { %3318 = vrot.lane.b32.xlu1 %v10590_v26, %s4685_s15  ;;  %3322 = vrot.lane.b32.xlu0 %v8628_v24, %s4685_s15  ;;  %v10596_v26 = vld [vmem:[#allocation89_spill] sm:$0xff] }
 0x48a   : > { %3326 = vrot.lane.b32.xlu2 %v8630_v44, %s4685_s15  ;;  %v2627_v49 = vadd.f32 %v10596_v26, %v7815_v36 }
 0x48b   : > { %v8638_v28 = vpop.permute.xlu1 %3300  ;;  %v8640_v22 = vpop.permute.xlu0 %3122 }
 0x48c   : > { %10591 = vst [vmem:[#allocation15_spill] sm:$0xff] %v8640_v22  ;;  %v8642_v63 = vpop.permute.xlu2 %3118  ;;  %v3188_v3 = vsel %vm1069_vm5, %v8640_v22, %v10593_v42 }
 0x48d   : > { %10592 = vst [vmem:[#allocation27_spill] sm:$0xff] %v8642_v63  ;;  %v3238_v1 = vmul.f32 %v10584_v14, %v3188_v3  ;;  %v3186_v37 = vsel %vm1069_vm5, %v8642_v63, %v10595_v32  ;;  %v2808_v63 = vpop.f32.mrf.mxu1 }
 0x48e   : > { %v3222_v42 = vmul.f32 %v10584_v14, %v3186_v37  ;;  %v10598_v37 = vld [vmem:[#allocation83_spill] sm:$0xff] }
 0x48f   : > { %3552 = vmatpush.msra.mxu1 %v3238_v1  ;;  %v10597_v1 = vld [vmem:[#allocation117_spill] sm:$0xff] }
 0x490   : > { %v2668_v30 = vadd.f32 %v10597_v1, %v2627_v49  ;;  %v2809_v1 = vadd.f32 %v2808_v63, %v7902_v12 }
 0x491   : > { %3072 = vrot.lane.b32.xlu1 %v8587_v21, %s4682_s29  ;;  %3302 = vrot.lane.b32.xlu0 %v8109_v54, %s4685_s15 }
 0x492   : > { %3306 = vrot.lane.b32.xlu2 %v8160_v52, %s4685_s15  ;;  %3553 = vmatpush.msra.mxu1 %v3230_v51 }
 0x493   : > { %v3283_v3 = vpop.permute.xlu1 %3282  ;;  %v3285_v32 = vpop.permute.xlu0 %3284 }
 0x494   : > { %v8668_v36 = vpop.permute.xlu2 %3298  ;;  %3554 = vmatpush.msra.mxu1 %v3222_v42  ;;  %v3429_v26 = vsel %vm1270_vm2, %v3285_v32, %v8638_v28  ;;  %v3437_v54 = vsel %vm1270_vm2, %v8626_v29, %v3285_v32  ;;  %v8682_v42 = vmax.f32 %v2668_v30, 0.0  ;;  %v2850_v32 = vadd.f32 %v2849_v11, %v2809_v1 }
 0x495   : > { %v3428_v52 = vsel %vm1270_vm2, %v3283_v3, %v8668_v36  ;;  %v3502_v51 = vmul.f32 %v10598_v37, %v3437_v54  ;;  %v3503_v49 = vmul.f32 %v10599_v8, %v3429_v26 }
 0x496   : > { %v3495_v22 = vmul.f32 %v10599_v8, %v3428_v52 }
 0x497   : > { %3580 = vmatpush.msrb.mxu3 %v3502_v51  ;;  %3638 = vmatpush.msra.mxu2 %v3503_v49  ;;  %v2806_v51 = vadd.f32 %v2805_v47, %v7904_v17  ;;  %v8703_v49 = vmax.f32 %v2850_v32, 0.0  ;;  %v10600_v47 = vld [vmem:[#allocation103_spill] sm:$0xff] }
 0x499   : > { %3070 = vrot.lane.b32.xlu1 %v8630_v44, %s4682_s29  ;;  %3074 = vrot.lane.b32.xlu0 %v8531_v57, %s4682_s29 }
 0x49a   : > { %3320 = vrot.lane.b32.xlu2 %v8682_v42, %s4685_s15  ;;  %3639 = vmatpush.msra.mxu2 %v3495_v22  ;;  %v2847_v22 = vadd.f32 %v2846_v46, %v2806_v51  ;;  %v2803_v46 = vadd.f32 %v8612_v48, %v7895_v43 }
 0x49b   : > { %v8691_v26 = vpop.permute.xlu1 %3264  ;;  %v8693_v12 = vpop.permute.xlu0 %3266 }
 0x49c   : > { %v3281_v63 = vpop.permute.xlu2 %3280  ;;  %v3436_v30 = vsel %vm1270_vm2, %v8693_v12, %v3283_v3 }
 0x49d   : > { %v3435_v54 = vsel %vm1270_vm2, %v8691_v26, %v3281_v63  ;;  %v3494_v52 = vmul.f32 %v10598_v37, %v3436_v30 }
 0x49e   : > { %v3486_v11 = vmul.f32 %v10598_v37, %v3435_v54 }
 0x49f   : > { %3581 = vmatpush.msrb.mxu3 %v3494_v52  ;;  %v8729_v52 = vmax.f32 %v2847_v22, 0.0 }
 0x4a1   : > { %3068 = vrot.lane.b32.xlu1 %v8585_v61, %s4682_s29  ;;  %3364 = vrot.lane.b32.xlu0 %v8703_v49, %s4685_s15 }
 0x4a2   : > { %3076 = vrot.lane.b32.xlu2 %v8589_v18, %s4682_s29  ;;  %3582 = vmatpush.msrb.mxu3 %v3486_v11 }
 0x4a3   : > { %v8712_v3 = vpop.permute.xlu1 %3114  ;;  %v8714_v1 = vpop.permute.xlu0 %3116 }
 0x4a4   : > { %v8716_v17 = vpop.permute.xlu2 %3262  ;;  %v3185_v32 = vsel %vm1069_vm5, %v8714_v1, %v10600_v47  ;;  %v3184_v30 = vsel %vm1069_vm5, %v8712_v3, %v8205_v6  ;;  %v2844_v6 = vadd.f32 %v8624_v27, %v2803_v46  ;;  %v2800_v27 = vadd.f32 %v8583_v41, %v7875_v10 }
 0x4a5   : > { %v3214_v54 = vmul.f32 %v10584_v14, %v3185_v32  ;;  %v3206_v51 = vmul.f32 %v10584_v14, %v3184_v30 }
 0x4a7   : > { %3555 = vmatpush.msra.mxu1 %v3214_v54  ;;  %v8756_v54 = vmax.f32 %v2844_v6, 0.0 }
 0x4a9   : > { %3066 = vrot.lane.b32.xlu1 %v8628_v24, %s4682_s29  ;;  %3362 = vrot.lane.b32.xlu0 %v8729_v52, %s4685_s15 }
 0x4aa   : > { %3348 = vrot.lane.b32.xlu2 %v8519_v16, %s4685_s15  ;;  %3556 = vmatpush.msra.mxu1 %v3206_v51 }
 0x4ab   : > { %v8739_v11 = vpop.permute.xlu1 %3294  ;;  %v8741_v43 = vpop.permute.xlu0 %3296 }
 0x4ac   : > { %v8743_v48 = vpop.permute.xlu2 %3112  ;;  %v3427_v22 = vsel %vm1270_vm2, %v3281_v63, %v8741_v43 }
 0x4ad   : > { %10601 = vst [vmem:[#allocation114_spill] sm:$0xff] %v8743_v48  ;;  %v3183_v47 = vsel %vm1069_vm5, %v8743_v48, %v8216_v39  ;;  %v3487_v32 = vmul.f32 %v10599_v8, %v3427_v22  ;;  %v2841_v39 = vadd.f32 %v8595_v2, %v2800_v27  ;;  %v8840_v48 = vld [vmem:[%s9757_s5 + $0x30] sm:$0xff] }
 0x4ae   : > { %v3198_v30 = vmul.f32 %v10584_v14, %v3183_v47  ;;  %v8781_v47 = vld [vmem:[%s9757_s5 + $0x10] sm:$0xff] }
 0x4af   : > { %3640 = vmatpush.msra.mxu2 %v3487_v32  ;;  %v8783_v32 = vmax.f32 %v2841_v39, 0.0  ;;  %3620 = vmatmul.f32.gmra.mxu0 %v8781_v47 }
 0x4b0   : > { %3557 = vmatpush.msra.mxu1 %v3198_v30 }
 0x4b1   : > { %3064 = vrot.lane.b32.xlu1 %v8682_v42, %s4682_s29  ;;  %3360 = vrot.lane.b32.xlu0 %v8756_v54, %s4685_s15 }
 0x4b2   : > { %3346 = vrot.lane.b32.xlu2 %v8525_v0, %s4685_s15 }
 0x4b3   : > { %v3277_v63 = vpop.permute.xlu1 %3276  ;;  %v3279_v46 = vpop.permute.xlu0 %3278 }
 0x4b4   : > { %v8765_v51 = vpop.permute.xlu2 %3292  ;;  %v3426_v10 = vsel %vm1270_vm2, %v3279_v46, %v8739_v11  ;;  %v3434_v41 = vsel %vm1270_vm2, %v8716_v17, %v3279_v46 }
 0x4b5   : > { %v3425_v6 = vsel %vm1270_vm2, %v3277_v63, %v8765_v51  ;;  %v3478_v22 = vmul.f32 %v10598_v37, %v3434_v41  ;;  %v3479_v2 = vmul.f32 %v10599_v8, %v3426_v10 }
 0x4b6   : > { %v3471_v30 = vmul.f32 %v10599_v8, %v3425_v6  ;;  %v8807_v6 = vld [vmem:[%s9757_s5 + $0x20] sm:$0xff] }
 0x4b7   : > { %3583 = vmatpush.msrb.mxu3 %v3478_v22  ;;  %3641 = vmatpush.msra.mxu2 %v3479_v2  ;;  %v8810_v22 = vmax.f32 %v8384_v7, 0.0 }
 0x4b8   : > { %3623 = vmatmul.f32.gmra.mxu0 %v8807_v6 }
 0x4b9   : > { %3092 = vrot.lane.b32.xlu1 %v8519_v16, %s4682_s29  ;;  %3358 = vrot.lane.b32.xlu0 %v8783_v32, %s4685_s15 }
 0x4ba   : > { %3344 = vrot.lane.b32.xlu2 %v8537_v9, %s4685_s15  ;;  %3642 = vmatpush.msra.mxu2 %v3471_v30 }
 0x4bb   : > { %v8793_v27 = vpop.permute.xlu1 %3258  ;;  %v8795_v39 = vpop.permute.xlu0 %3260 }
 0x4bc   : > { %10602 = vst [vmem:[#allocation116_spill] sm:$0xff] %v8793_v27  ;;  %v3275_v46 = vpop.permute.xlu2 %3274  ;;  %v3433_v10 = vsel %vm1270_vm2, %v8795_v39, %v3277_v63 }
 0x4bd   : > { %v3432_v16 = vsel %vm1270_vm2, %v8793_v27, %v3275_v46  ;;  %v3470_v41 = vmul.f32 %v10598_v37, %v3433_v10  ;;  %v10604_v27 = vld [vmem:[#allocation24_spill] sm:$0xff] }
 0x4be   : > { %v3462_v2 = vmul.f32 %v10598_v37, %v3432_v16 }
 0x4bf   : > { %3584 = vmatpush.msrb.mxu3 %v3470_v41 }
 0x4c0   : > { %3626 = vmatmul.f32.gmra.mxu0 %v8840_v48 }
 0x4c1   : > { %3090 = vrot.lane.b32.xlu1 %v8525_v0, %s4682_s29  ;;  %3356 = vrot.lane.b32.xlu0 %v8810_v22, %s4685_s15 }
 0x4c2   : > { %3342 = vrot.lane.b32.xlu2 %v8546_v62, %s4685_s15  ;;  %3585 = vmatpush.msrb.mxu3 %v3462_v2  ;;  %v8834_v2 = vmax.f32 %v8357_v31, 0.0 }
 0x4c3   : > { %v8820_v63 = vpop.permute.xlu1 %3256  ;;  %v8822_v30 = vpop.permute.xlu0 %3110 }
 0x4c4   : > { %10603 = vst [vmem:[#allocation42_spill] sm:$0xff] %v8822_v30  ;;  %v3273_v7 = vpop.permute.xlu2 %3272  ;;  %v3182_v10 = vsel %vm1069_vm5, %v8822_v30, %v8150_v58  ;;  %v392_v30 = vld [vmem:[%s9759_s7] sm:$0xff] }
 0x4c5   : > { %v3431_v0 = vsel %vm1270_vm2, %v8820_v63, %v3273_v7  ;;  %v3190_v16 = vmul.f32 %v10584_v14, %v3182_v10 }
 0x4c6   : > { %v3454_v41 = vmul.f32 %v10598_v37, %v3431_v0  ;;  %v10606_v0 = vld [vmem:[#allocation70_spill] sm:$0xff] }
 0x4c7   : > { %3558 = vmatpush.msra.mxu1 %v3190_v16  ;;  %v2788_v16 = vadd.f32 %v10606_v0, %v10569_v45 }
 0x4c8   : > { %3586 = vmatpush.msrb.mxu3 %v3454_v41  ;;  %3559 = vmatmul.f32.vlgmr.msra.gmra.mxu1 %v8426_v56  ;;  %v8868_v41 = vmax.f32 %v8336_v23, 0.0 }
 0x4c9   : > { %3659 = vmatpush.msrb.mxu1 %v10604_v27  ;;  %3088 = vrot.lane.b32.xlu1 %v8537_v9, %s4682_s29 }
 0x4ca   : > { %3354 = vrot.lane.b32.xlu0 %v8834_v2, %s4685_s15  ;;  %3340 = vrot.lane.b32.xlu2 %v8554_v15, %s4685_s15 }
 0x4cb   : > { %3660 = vmatpush.msrb.mxu1 %v8113_v59  ;;  %v8849_v58 = vpop.permute.xlu1 %3254  ;;  %v8851_v31 = vpop.permute.xlu0 %3290  ;;  %3733 = vmatmul.f32.vlgmr.msrb.gmra.mxu0 %v8426_v56 }
 0x4cc   : > { %10605 = vst [vmem:[#allocation112_spill] sm:$0xff] %v8849_v58  ;;  %v3271_v14 = vpop.permute.xlu2 %3270  ;;  %v3424_v9 = vsel %vm1270_vm2, %v3275_v46, %v8851_v31 }
 0x4cd   : > { %3661 = vmatpush.msrb.mxu1 %v8094_v40  ;;  %v3430_v27 = vsel %vm1270_vm2, %v8849_v58, %v3271_v14  ;;  %v3463_v59 = vmul.f32 %v10599_v8, %v3424_v9  ;;  %v8874_v40 = vld [vmem:[%s9757_s5 + $0x8] sm:$0xff] }
 0x4ce   : > { %v3446_v10 = vmul.f32 %v10598_v37, %v3430_v27 }
 0x4cf   : > { %3662 = vmatpush.msrb.mxu1 %v8082_v13  ;;  %3643 = vmatpush.msra.mxu2 %v3463_v59  ;;  %v10607_v13 = vld [vmem:[#allocation95_spill] sm:$0xff] }
 0x4d0   : > { %3587 = vmatpush.msrb.mxu3 %v3446_v10  ;;  %v2829_v23 = vadd.f32 %v10607_v13, %v2788_v16  ;;  %3562 = vmatmul.f32.gmra.mxu1 %v8781_v47  ;;  %v10610_v10 = vld [vmem:[#allocation49_spill] sm:$0xff] }
 0x4d1   : > { %3663 = vmatpush.msrb.mxu1 %v10549_v5  ;;  %3086 = vrot.lane.b32.xlu1 %v8546_v62, %s4682_s29  ;;  %v10608_v5 = vld [vmem:[#allocation91_spill] sm:$0xff] }
 0x4d2   : > { %3352 = vrot.lane.b32.xlu0 %v8868_v41, %s4685_s15  ;;  %3338 = vrot.lane.b32.xlu2 %v8558_v60, %s4685_s15  ;;  %v3173_v45 = vsel %vm1069_vm5, %v10608_v5, %v8419_v53  ;;  %v10609_v53 = vld [vmem:[#allocation56_spill] sm:$0xff]  ;;  %v8907_v16 = vmax.f32 %v2829_v23, 0.0  ;;  %v10611_v5 = vld [vmem:[#allocation90_spill] sm:$0xff] }
 0x4d3   : > { %3664 = vmatpush.msrb.mxu1 %v10548_v50  ;;  %v3317_v37 = vpop.permute.xlu1 %3316  ;;  %v8888_v46 = vpop.permute.xlu0 %3288  ;;  %4415 = vmatmul.msk.f32.vlgmr.msrb.gmra.mxu3 %vm3530_vm1, %v8874_v40  ;;  %v3248_v0 = vmul.f32 %v10610_v10, %v3173_v45  ;;  %v3168_v45 = vsel %vm1069_vm5, %v10611_v5, %v8277_v20  ;;  %v8956_v20 = vld [vmem:[%s9757_s5 + $0x28] sm:$0xff] }
 0x4d4   : > { %v3421_v62 = vsel %vm1270_vm2, %v8638_v28, %v3317_v37  ;;  %v8896_v50 = vpop.permute.xlu2 %3332  ;;  %v3423_v9 = vsel %vm1270_vm2, %v3273_v7, %v8888_v46  ;;  %v3240_v28 = vmul.f32 %v10610_v10, %v8409_v34  ;;  %3736 = vmatmul.f32.gmra.mxu0 %v8781_v47 }
 0x4d5   : > { %3665 = vmatpush.msrb.mxu1 %v10555_v55  ;;  %v3504_v27 = vmul.f32 %v10609_v53, %v3421_v62  ;;  %v3455_v59 = vmul.f32 %v10599_v8, %v3423_v9  ;;  %v8914_v55 = vld [vmem:[%s9757_s5 + $0x18] sm:$0xff]  ;;  %v3413_v34 = vsel %vm1270_vm2, %v3317_v37, %v8896_v50  ;;  %v3216_v62 = vmul.f32 %v10610_v10, %v8355_v33  ;;  %v10612_v9 = vld [vmem:[#allocation47_spill] sm:$0xff] }
 0x4d6   : > { %v10613_v33 = vld [vmem:[#allocation107_spill] sm:$0xff] }
 0x4d7   : > { %3666 = vmatpush.msrb.mxu1 %v10565_v19  ;;  %3644 = vmatpush.msra.mxu2 %v3455_v59  ;;  %v3232_v19 = vmul.f32 %v10610_v10, %v8332_v25  ;;  %v3224_v25 = vmul.f32 %v10610_v10, %v8379_v4  ;;  %v3505_v4 = vmul.f32 %v10612_v9, %v3413_v34 }
 0x4d8   : > { %3696 = vmatpush.msra.mxu3 %v3504_v27  ;;  %3565 = vmatmul.f32.gmra.mxu1 %v8807_v6  ;;  %v3208_v27 = vmul.f32 %v10610_v10, %v3168_v45 }
 0x4d9   : > { %3667 = vmatpush.msrb.mxu1 %v3248_v0  ;;  %3080 = vrot.lane.b32.xlu1 %v8565_v38, %s4682_s29 }
 0x4da   : > { %3350 = vrot.lane.b32.xlu0 %v8907_v16, %s4685_s15  ;;  %3336 = vrot.lane.b32.xlu2 %v8565_v38, %s4685_s15 }
 0x4db   : > { %3668 = vmatpush.msrb.mxu1 %v3240_v28  ;;  %v8927_v7 = vpop.permute.xlu1 %3330  ;;  %v8929_v13 = vpop.permute.xlu0 %3286  ;;  %4416 = vmatmul.msk.f32.gmra.mxu3 %vm3530_vm1, %v8914_v55 }
 0x4dc   : > { %v3313_v23 = vpop.permute.xlu2 %3312  ;;  %v3422_v38 = vsel %vm1270_vm2, %v3271_v14, %v8929_v13  ;;  %v10614_v14 = vld [vmem:[#allocation30_spill] sm:$0xff]  ;;  %3739 = vmatmul.f32.gmra.mxu0 %v8807_v6 }
 0x4dd   : > { %3669 = vmatpush.msrb.mxu1 %v3232_v19  ;;  %v3447_v37 = vmul.f32 %v10599_v8, %v3422_v38  ;;  %v3200_v8 = vmul.f32 %v10610_v10, %v10613_v33  ;;  %v3419_v38 = vsel %vm1270_vm2, %v8741_v43, %v3313_v23 }
 0x4df   : > { %3670 = vmatpush.msrb.mxu1 %v3224_v25  ;;  %3645 = vmatpush.msra.mxu2 %v3447_v37 }
 0x4e0   : > { %3568 = vmatmul.f32.gmra.mxu1 %v8840_v48  ;;  %4419 = vmatmul.msk.f32.vlgmr.msra.gmra.mxu2 %vm3530_vm1, %v8874_v40 }
 0x4e1   : > { %3671 = vmatpush.msrb.mxu1 %v3216_v62  ;;  %3754 = vmatpush.msrb.mxu2 %v3505_v4 }
 0x4e2   : > { %3106 = vrot.lane.b32.xlu1 %v8729_v52, %s4682_s29  ;;  %3082 = vrot.lane.b32.xlu0 %v8558_v60, %s4682_s29  ;;  %v10615_v60 = vld [vmem:[#allocation34_spill] sm:$0xff] }
 0x4e3   : > { %3334 = vrot.lane.b32.xlu2 %v10614_v14, %s4685_s15  ;;  %3672 = vmatpush.msrb.mxu1 %v3208_v27  ;;  %v3311_v59 = vpop.permute.xlu1 %3310  ;;  %v3315_v0 = vpop.permute.xlu0 %3314  ;;  %v3192_v28 = vmul.f32 %v10610_v10, %v10615_v60  ;;  %v10617_v27 = vld [vmem:[#allocation20_spill] sm:$0xff] }
 0x4e4   : > { %v8967_v19 = vpop.permute.xlu2 %3326  ;;  %v3412_v34 = vsel %vm1270_vm2, %v3315_v0, %v8927_v7  ;;  %v3420_v25 = vsel %vm1270_vm2, %v8668_v36, %v3315_v0  ;;  %4417 = vmatmul.msk.f32.gmra.mxu3 %vm3530_vm1, %v8956_v20  ;;  %v3418_v45 = vsel %vm1270_vm2, %v8739_v11, %v3311_v59  ;;  %v3488_v36 = vmul.f32 %v10609_v53, %v3419_v38  ;;  %v8998_v11 = vld [vmem:[%s9757_s5 + $0x38] sm:$0xff] }
 0x4e5   : > { %3673 = vmatpush.msrb.mxu1 %v3200_v8  ;;  %v3496_v10 = vmul.f32 %v10609_v53, %v3420_v25  ;;  %v3497_v5 = vmul.f32 %v10612_v9, %v3412_v34  ;;  %v3480_v43 = vmul.f32 %v10609_v53, %v3418_v45  ;;  %3742 = vmatmul.f32.gmra.mxu0 %v8840_v48 }
 0x4e7   : > { %3674 = vmatpush.msrb.mxu1 %v3192_v28  ;;  %3697 = vmatpush.msra.mxu3 %v3496_v10  ;;  %v10618_v28 = vld [vmem:[#allocation54_spill] sm:$0xff]  ;;  %v10619_v10 = vld [vmem:[#allocation113_spill] sm:$0xff] }
 0x4e8   : > { %3755 = vmatpush.msrb.mxu2 %v3497_v5  ;;  %3675 = vmatmul.f32.vlgmr.msrb.gmra.mxu1 %v8426_v56 }
 0x4e9   : > { %3775 = vmatpush.msra.mxu1 %v8589_v18  ;;  %3698 = vmatpush.msra.mxu3 %v3488_v36  ;;  %v10620_v36 = vld [vmem:[#allocation46_spill] sm:$0xff] }
 0x4ea   : > { %3102 = vrot.lane.b32.xlu1 %v8783_v32, %s4682_s29  ;;  %3108 = vrot.lane.b32.xlu0 %v8703_v49, %s4682_s29 }
 0x4eb   : > { %3084 = vrot.lane.b32.xlu2 %v8554_v15, %s4682_s29  ;;  %3776 = vmatpush.msra.mxu1 %v8531_v57  ;;  %v9001_v18 = vpop.permute.xlu1 %3324  ;;  %v9003_v37 = vpop.permute.xlu0 %3328  ;;  %v3410_v57 = vsel %vm1270_vm2, %v3311_v59, %v8967_v19 }
 0x4ec   : > { %4420 = vmatmul.msk.f32.gmra.mxu2 %vm3530_vm1, %v8914_v55  ;;  %v3307_v62 = vpop.permute.xlu2 %3306  ;;  %3699 = vmatpush.msra.mxu3 %v3480_v43  ;;  %v3411_v15 = vsel %vm1270_vm2, %v3313_v23, %v9003_v37  ;;  %v3481_v23 = vmul.f32 %v10612_v9, %v3410_v57  ;;  %v10623_v57 = vld [vmem:[#allocation43_spill] sm:$0xff] }
 0x4ed   : > { %3777 = vmatpush.msra.mxu1 %v8587_v21  ;;  %v3489_v4 = vmul.f32 %v10612_v9, %v3411_v15  ;;  %4418 = vmatmul.msk.f32.gmra.mxu3 %vm3530_vm1, %v8998_v11  ;;  %v10616_v21 = vld [vmem:[#allocation13_spill] sm:$0xff] }
 0x4ef   : > { %3778 = vmatpush.msra.mxu1 %v8630_v44  ;;  %3756 = vmatpush.msrb.mxu2 %v3489_v4  ;;  %v3416_v44 = vsel %vm1270_vm2, %v8851_v31, %v3307_v62  ;;  %v10622_v4 = vld [vmem:[#allocation67_spill] sm:$0xff] }
 0x4f0   : > { %3678 = vmatmul.f32.gmra.mxu1 %v8781_v47  ;;  %v3464_v60 = vmul.f32 %v10609_v53, %v3416_v44 }
 0x4f1   : > { %3779 = vmatpush.msra.mxu1 %v8585_v61  ;;  %3757 = vmatpush.msrb.mxu2 %v3481_v23 }
 0x4f2   : > { %3376 = vrot.lane.b32.xlu1 %v10616_v21, %s4685_s15  ;;  %3380 = vrot.lane.b32.xlu0 %v10617_v27, %s4685_s15 }
 0x4f3   : > { %3078 = vrot.lane.b32.xlu2 %v10614_v14, %s4682_s29  ;;  %3780 = vmatpush.msra.mxu1 %v8628_v24  ;;  %v3305_v33 = vpop.permute.xlu1 %3304  ;;  %v3309_v8 = vpop.permute.xlu0 %3308 }
 0x4f4   : > { %v9032_v59 = vpop.permute.xlu2 %3320  ;;  %v3409_v61 = vsel %vm1270_vm2, %v3309_v8, %v9001_v18  ;;  %v3417_v0 = vsel %vm1270_vm2, %v8765_v51, %v3309_v8  ;;  %4421 = vmatmul.msk.f32.gmra.mxu2 %vm3530_vm1, %v8956_v20  ;;  %v3415_v14 = vsel %vm1270_vm2, %v8888_v46, %v3305_v33 }
 0x4f5   : > { %3781 = vmatpush.msra.mxu1 %v8682_v42  ;;  %v3472_v24 = vmul.f32 %v10609_v53, %v3417_v0  ;;  %v3473_v31 = vmul.f32 %v10612_v9, %v3409_v61  ;;  %v3456_v51 = vmul.f32 %v10609_v53, %v3415_v14  ;;  %v3407_v34 = vsel %vm1270_vm2, %v3305_v33, %v9032_v59  ;;  %v10624_v14 = vld [vmem:[#allocation48_spill] sm:$0xff] }
 0x4f6   : > { %v3457_v15 = vmul.f32 %v10612_v9, %v3407_v34 }
 0x4f7   : > { %3782 = vmatpush.msra.mxu1 %v10618_v28  ;;  %3700 = vmatpush.msra.mxu3 %v3472_v24  ;;  %v388_v28 = vld [vmem:[%s9758_s6] sm:$0xff] }
 0x4f8   : > { %3758 = vmatpush.msrb.mxu2 %v3473_v31  ;;  %3681 = vmatmul.f32.gmra.mxu1 %v8807_v6 }
 0x4f9   : > { %3701 = vmatpush.msra.mxu3 %v3464_v60 }
 0x4fa   : > { %3096 = vrot.lane.b32.xlu1 %v8868_v41, %s4682_s29  ;;  %3100 = vrot.lane.b32.xlu0 %v8810_v22, %s4682_s29 }
 0x4fb   : > { %3104 = vrot.lane.b32.xlu2 %v8756_v54, %s4682_s29  ;;  %v9058_v42 = vpop.permute.xlu1 %3318  ;;  %3702 = vmatpush.msra.mxu3 %v3456_v51  ;;  %v9060_v46 = vpop.permute.xlu0 %3322 }
 0x4fc   : > { %v9065_v25 = vpop.permute.xlu2 %3076  ;;  %v3408_v38 = vsel %vm1270_vm2, %v3307_v62, %v9060_v46  ;;  %4422 = vmatmul.msk.f32.gmra.mxu2 %vm3530_vm1, %v8998_v11  ;;  %v10621_v62 = vld [vmem:[#allocation99_spill] sm:$0xff] }
 0x4fd   : > { %v3157_v5 = vsel %vm1069_vm5, %v10619_v10, %v9065_v25  ;;  %v3465_v45 = vmul.f32 %v10612_v9, %v3408_v38  ;;  %v10626_v10 = vld [vmem:[#allocation32_spill] sm:$0xff] }
 0x4fe   : > { %v3250_v43 = vmul.f32 %v10620_v36, %v3157_v5 }
 0x4ff   : > { %3759 = vmatpush.msrb.mxu2 %v3465_v45 }
 0x500   : > { %3783 = vmatpush.msra.mxu1 %v3250_v43  ;;  %v391_v43 = vld [vmem:[%s9758_s6 + $0x18] sm:$0xff] }
 0x501   : > { %3760 = vmatpush.msrb.mxu2 %v3457_v15  ;;  %3684 = vmatmul.f32.gmra.mxu1 %v8840_v48  ;;  %v10627_v15 = vld [vmem:[#allocation102_spill] sm:$0xff] }
 0x502   : > { %3370 = vrot.lane.b32.xlu1 %v10621_v62, %s4685_s15  ;;  %3374 = vrot.lane.b32.xlu0 %v10622_v4, %s4685_s15 }
 0x503   : > { %3378 = vrot.lane.b32.xlu2 %v10623_v57, %s4685_s15  ;;  %v9086_v23 = vpop.permute.xlu1 %3072  ;;  %v3303_v33 = vpop.permute.xlu0 %3302 }
 0x504   : > { %v3349_v8 = vpop.permute.xlu2 %3348  ;;  %v3406_v44 = vsel %vm1270_vm2, %v3303_v33, %v9058_v42  ;;  %v3414_v61 = vsel %vm1270_vm2, %v8929_v13, %v3303_v33  ;;  %v3155_v5 = vsel %vm1069_vm5, %v10626_v10, %v9086_v23  ;;  %v10631_v10 = vld [vmem:[#allocation40_spill] sm:$0xff] }
 0x505   : > { %v3405_v0 = vsel %vm1270_vm2, %v8896_v50, %v3349_v8  ;;  %v3448_v24 = vmul.f32 %v10609_v53, %v3414_v61  ;;  %v3449_v31 = vmul.f32 %v10612_v9, %v3406_v44  ;;  %v10625_v9 = vld [vmem:[#allocation65_spill] sm:$0xff]  ;;  %v10629_v61 = vld [vmem:[#allocation111_spill] sm:$0xff] }
 0x506   : > { %v3506_v60 = vmul.f32 %v10624_v14, %v3405_v0  ;;  %v10628_v44 = vld [vmem:[#allocation85_spill] sm:$0xff] }
 0x507   : > { %3703 = vmatpush.msra.mxu3 %v3448_v24  ;;  %3761 = vmatpush.msrb.mxu2 %v3449_v31 }
 0x508   : > { %4423 = vmatmul.msk.f32.vlgmr.msra.gmra.mxu3 %vm3530_vm1, %v8874_v40  ;;  %4427 = vmatmul.msk.f32.vlgmr.msrb.gmra.mxu2 %vm3530_vm1, %v8874_v40 }
 0x509   : > { %3812 = vmatpush.msrb.mxu3 %v3506_v60  ;;  %v10630_v60 = vld [vmem:[#allocation73_spill] sm:$0xff] }
 0x50a   : > { %3512 = vperm.xlu1 %4559, %v388_v28   ;;  %3094 = vrot.lane.b32.xlu0 %v8907_v16, %s4682_s29 }
 0x50b   : > { %3098 = vrot.lane.b32.xlu2 %v8834_v2, %s4682_s29  ;;  %v9112_v50 = vpop.permute.xlu1 %3070  ;;  %v9114_v53 = vpop.permute.xlu0 %3074 }
 0x50c   : > { %v3347_v13 = vpop.permute.xlu2 %3346  ;;  %v3156_v51 = vsel %vm1069_vm5, %v10625_v9, %v9114_v53  ;;  %v3154_v33 = vsel %vm1069_vm5, %v10627_v15, %v9112_v50 }
 0x50d   : > { %v3404_v34 = vsel %vm1270_vm2, %v8927_v7, %v3347_v13  ;;  %v3242_v38 = vmul.f32 %v10620_v36, %v3156_v51  ;;  %v3234_v7 = vmul.f32 %v10620_v36, %v3155_v5  ;;  %v3226_v0 = vmul.f32 %v10620_v36, %v3154_v33 }
 0x50e   : > { %v3498_v45 = vmul.f32 %v10624_v14, %v3404_v34 }
 0x50f   : > { %3784 = vmatpush.msra.mxu1 %v3242_v38 }
 0x510   : > { %3813 = vmatpush.msrb.mxu3 %v3498_v45  ;;  %4428 = vmatmul.msk.f32.gmra.mxu2 %vm3530_vm1, %v8914_v55 }
 0x511   : > { %4424 = vmatmul.msk.f32.gmra.mxu3 %vm3530_vm1, %v8914_v55  ;;  %3785 = vmatpush.msra.mxu1 %v3234_v7  ;;  %v10633_v7 = vld [vmem:[#allocation87_spill] sm:$0xff] }
 0x512   : > { %3527 = vperm.xlu1 %4559, %v391_v43   ;;  %3366 = vrot.lane.b32.xlu0 %v10628_v44, %s4685_s15  ;;  %v394_v43 = vld [vmem:[%s9759_s7 + $0x10] sm:$0xff] }
 0x513   : > { %3372 = vrot.lane.b32.xlu2 %v10629_v61, %s4685_s15  ;;  %v9146_v24 = vpop.permute.xlu1 %3068  ;;  %v9148_v31 = vpop.permute.xlu0 %3364  ;;  %3786 = vmatpush.msra.mxu1 %v3226_v0 }
 0x514   : > { %v3153_v28 = vsel %vm1069_vm5, %v10630_v60, %v9146_v24  ;;  %v3345_v9 = vpop.permute.xlu2 %3344  ;;  %v3397_v51 = vsel %vm1270_vm2, %v3349_v8, %v9148_v31  ;;  %v390_v8 = vld [vmem:[%s9758_s6 + $0x10] sm:$0xff] }
 0x515   : > { %v3218_v34 = vmul.f32 %v10620_v36, %v3153_v28  ;;  %v3403_v38 = vsel %vm1270_vm2, %v9003_v37, %v3345_v9  ;;  %v3507_v5 = vmul.f32 %v10631_v10, %v3397_v51  ;;  %v10632_v37 = vld [vmem:[#allocation101_spill] sm:$0xff] }
 0x516   : > { %v3490_v45 = vmul.f32 %v10624_v14, %v3403_v38 }
 0x517   : > { %3787 = vmatpush.msra.mxu1 %v3218_v34  ;;  %3870 = vmatpush.msra.mxu2 %v3507_v5 }
 0x518   : > { %3814 = vmatpush.msrb.mxu3 %v3490_v45  ;;  %4429 = vmatmul.msk.f32.gmra.mxu2 %vm3530_vm1, %v8956_v20  ;;  %v393_v45 = vld [vmem:[%s9759_s7 + $0x8] sm:$0xff] }
 0x519   : > { %4425 = vmatmul.msk.f32.gmra.mxu3 %vm3530_vm1, %v8956_v20 }
 0x51a   : > { %4051 = vperm.xlu1 %4559, %v394_v43   ;;  %3522 = vperm.xlu0 %4555, %v390_v8   ;;  %v10634_v8 = vld [vmem:[#allocation109_spill] sm:$0xff] }
 0x51b   : > { %3368 = vrot.lane.b32.xlu2 %v10632_v37, %s4685_s15  ;;  %v9175_v15 = vpop.permute.xlu1 %3066  ;;  %v9177_v33 = vpop.permute.xlu0 %3362  ;;  %s4623_s15 = scalar_lea.hbm %s4622_s24, 8 }
 0x51c   : > { %v3152_v0 = vsel %vm1069_vm5, %v10633_v7, %v9175_v15  ;;  %v3343_v60 = vpop.permute.xlu2 %3342  ;;  %v3396_v28 = vsel %vm1270_vm2, %v3347_v13, %v9177_v33  ;;  %v389_v13 = vld [vmem:[%s9758_s6 + $0x8] sm:$0xff]  ;;  %p4624_p0 = scmp.ne.s32.totalorder %s4622_s24, %s4623_s15  ;;  %p4629_p4 = scmp.lt.s32.totalorder %s4627_s30, %s4623_s15 }
 0x51d   : > { %v3210_v51 = vmul.f32 %v10620_v36, %v3152_v0  ;;  %v3402_v34 = vsel %vm1270_vm2, %v8967_v19, %v3343_v60  ;;  %v3499_v38 = vmul.f32 %v10631_v10, %v3396_v28  ;;  %v10635_v7 = vld [vmem:[#allocation52_spill] sm:$0xff] }
 0x51e   : > { %v3482_v5 = vmul.f32 %v10624_v14, %v3402_v34  ;;  %v3150_v0 = vsel %vm1069_vm5, %v10635_v7, %v10634_v8  ;;  %v10636_v28 = vld [vmem:[#allocation92_spill] sm:$0xff]  ;;  %p4625_p1 = pnand %p4624_p0, %p4783_p5  ;;  %p4630_p7 = por %p4629_p4, %p4628_p3 }
 0x51f   : > { %3788 = vmatpush.msra.mxu1 %v3210_v51  ;;  %3871 = vmatpush.msra.mxu2 %v3499_v38  ;;  %v3194_v58 = vmul.f32 %v10620_v36, %v3150_v0 }
 0x520   : > { %3815 = vmatpush.msrb.mxu3 %v3482_v5  ;;  %4430 = vmatmul.msk.f32.gmra.mxu2 %vm3530_vm1, %v8998_v11  ;;  %p4626_p2 = pneg %p4625_p1 }
 0x521   : > { %4426 = vmatmul.msk.f32.gmra.mxu3 %vm3530_vm1, %v8998_v11 }
 0x522   : > { %4046 = vperm.xlu0 %4555, %v393_v45   ;;  %p4631_p8 = pnand %p4630_p7, %p4626_p2 }
 0x523   : > { %3517 = vperm.xlu2 %4558, %v389_v13   ;;  %v9202_v19 = vpop.permute.xlu1 %3064  ;;  %v9204_v43 = vpop.permute.xlu0 %3360 }
 0x524   : > { %v3151_v51 = vsel %vm1069_vm5, %v10636_v28, %v9202_v19  ;;  %v3341_v34 = vpop.permute.xlu2 %3340  ;;  %v3395_v38 = vsel %vm1270_vm2, %v3345_v9, %v9204_v43  ;;  %v396_v28 = vld [vmem:[#allocation2] sm:$0x1] }
 0x525   : > { %v3202_v5 = vmul.f32 %v10620_v36, %v3151_v51  ;;  %v3401_v45 = vsel %vm1270_vm2, %v9001_v18, %v3341_v34  ;;  %v3491_v13 = vmul.f32 %v10631_v10, %v3395_v38  ;;  %v10637_v51 = vld [vmem:[#allocation39_spill] sm:$0xff] }
 0x526   : > { %v3474_v7 = vmul.f32 %v10624_v14, %v3401_v45 }
 0x527   : > { %3789 = vmatpush.msra.mxu1 %v3202_v5  ;;  %3872 = vmatpush.msra.mxu2 %v3491_v13 }
 0x528   : > { %3816 = vmatpush.msrb.mxu3 %v3474_v7 }
 0x529   : > { %3790 = vmatpush.msra.mxu1 %v3194_v58 }
 0x52a   : > { %4165 = vperm.xlu0 %4555, %v396_v28   ;;  %3791 = vmatmul.f32.vlgmr.msra.gmra.mxu1 %v8426_v56 }
 0x52b   : > { %4041 = vperm.xlu2 %4558, %v392_v30   ;;  %v9228_v18 = vpop.permute.xlu1 %3092  ;;  %v9230_v9 = vpop.permute.xlu0 %3358  ;;  %3891 = vmatpush.msrb.mxu1 %v8703_v49 }
 0x52c   : > { %v3149_v36 = vsel %vm1069_vm5, %v9065_v25, %v9228_v18  ;;  %v3339_v0 = vpop.permute.xlu2 %3338  ;;  %v3394_v58 = vsel %vm1270_vm2, %v3343_v60, %v9230_v9  ;;  %v395_v25 = vld [vmem:[%s9759_s7 + $0x18] sm:$0xff] }
 0x52d   : > { %v3251_v30 = vmul.f32 %v10637_v51, %v3149_v36  ;;  %v3400_v56 = vsel %vm1270_vm2, %v9060_v46, %v3339_v0  ;;  %v3483_v38 = vmul.f32 %v10631_v10, %v3394_v58  ;;  %3892 = vmatpush.msrb.mxu1 %v8729_v52 }
 0x52e   : > { %v3466_v49 = vmul.f32 %v10624_v14, %v3400_v56 }
 0x52f   : > { %3841 = vmatpush.msra.mxu0 %v3251_v30  ;;  %3873 = vmatpush.msra.mxu2 %v3483_v38 }
 0x530   : > { %3893 = vmatpush.msrb.mxu1 %v8756_v54  ;;  %3817 = vmatpush.msrb.mxu3 %v3466_v49 }
 0x532   : > { %3894 = vmatpush.msrb.mxu1 %v8783_v32 }
 0x533   : > { %4056 = vperm.xlu2 %4558, %v395_v25   ;;  %3794 = vmatmul.f32.gmra.mxu1 %v8781_v47  ;;  %v9253_v46 = vpop.permute.xlu1 %3090  ;;  %v9255_v60 = vpop.permute.xlu0 %3356 }
 0x534   : > { %3895 = vmatpush.msrb.mxu1 %v8810_v22  ;;  %v3148_v52 = vsel %vm1069_vm5, %v9114_v53, %v9253_v46  ;;  %v3337_v5 = vpop.permute.xlu2 %3336  ;;  %v3393_v54 = vsel %vm1270_vm2, %v3341_v34, %v9255_v60 }
 0x535   : > { %v3243_v32 = vmul.f32 %v10637_v51, %v3148_v52  ;;  %v3399_v45 = vsel %vm1270_vm2, %v9032_v59, %v3337_v5  ;;  %v3475_v13 = vmul.f32 %v10631_v10, %v3393_v54 }
 0x536   : > { %v3458_v22 = vmul.f32 %v10624_v14, %v3399_v45  ;;  %3896 = vmatpush.msrb.mxu1 %v8834_v2 }
 0x537   : > { %3842 = vmatpush.msra.mxu0 %v3243_v32  ;;  %3874 = vmatpush.msra.mxu2 %v3475_v13 }
 0x538   : > { %3897 = vmatpush.msrb.mxu1 %v8868_v41  ;;  %3818 = vmatpush.msrb.mxu3 %v3458_v22 }
 0x53a   : > { %3898 = vmatpush.msrb.mxu1 %v8907_v16 }
 0x53b   : > { %3797 = vmatmul.f32.gmra.mxu1 %v8807_v6  ;;  %v3089_v53 = vpop.permute.xlu1 %3088 }
 0x53c   : > { %v9275_v34 = vpop.permute.xlu0 %3354  ;;  %v3147_v59 = vsel %vm1069_vm5, %v9086_v23, %v3089_v53 }
 0x53d   : > { %v3335_v7 = vpop.permute.xlu2 %3334  ;;  %v3392_v2 = vsel %vm1270_vm2, %v3339_v0, %v9275_v34  ;;  %v3235_v28 = vmul.f32 %v10637_v51, %v3147_v59 }
 0x53e   : > { %v3398_v41 = vsel %vm1270_vm2, %v9058_v42, %v3335_v7  ;;  %v3467_v16 = vmul.f32 %v10631_v10, %v3392_v2 }
 0x53f   : > { %v3450_v36 = vmul.f32 %v10624_v14, %v3398_v41  ;;  %3843 = vmatpush.msra.mxu0 %v3235_v28  ;;  %v9347_v28 = vpop.f32.mrf.mxu0 }
 0x540   : > { %3875 = vmatpush.msra.mxu2 %v3467_v16 }
 0x541   : > { %3819 = vmatpush.msrb.mxu3 %v3450_v36 }
 0x542   : > { %4431 = vmatmul.msk.f32.vlgmr.msrb.gmra.mxu3 %vm3530_vm1, %v8874_v40 }
 0x543   : > { %3800 = vmatmul.f32.gmra.mxu1 %v8840_v48  ;;  %v3087_v23 = vpop.permute.xlu1 %3086 }
 0x544   : > { %v9292_v0 = vpop.permute.xlu0 %3352  ;;  %v3146_v58 = vsel %vm1069_vm5, %v9112_v50, %v3087_v23 }
 0x545   : > { %v9297_v42 = vpop.permute.xlu2 %3084  ;;  %v3391_v14 = vsel %vm1270_vm2, %v3337_v5, %v9292_v0  ;;  %v3227_v30 = vmul.f32 %v10637_v51, %v3146_v58  ;;  %v9345_v2 = vpop.f32.mrf.mxu1  ;;  %v9366_v58 = vld [vmem:[%s9757_s5] sm:$0xff] }
 0x546   : > { %v3145_v56 = vsel %vm1069_vm5, %v9146_v24, %v9297_v42  ;;  %v3459_v38 = vmul.f32 %v10631_v10, %v3391_v14 }
 0x547   : > { %v3219_v49 = vmul.f32 %v10637_v51, %v3145_v56  ;;  %3844 = vmatpush.msra.mxu0 %v3227_v30 }
 0x548   : > { %3876 = vmatpush.msra.mxu2 %v3459_v38  ;;  %v9381_v38 = vpop.f32.mrf.mxu0 }
 0x549   : > { %3845 = vmatpush.msra.mxu0 %v3219_v49 }
 0x54a   : > { %4432 = vmatmul.msk.f32.gmra.mxu3 %vm3530_vm1, %v8914_v55 }
 0x54b   : > { %v9311_v50 = vpop.permute.xlu1 %3080 }
 0x54c   : > { %v9313_v25 = vpop.permute.xlu0 %3350 }
 0x54d   : > { %v9315_v52 = vpop.permute.xlu2 %3078  ;;  %v3390_v24 = vsel %vm1270_vm2, %v3335_v7, %v9313_v25  ;;  %v9379_v56 = vpop.f32.mrf.mxu1 }
 0x54e   : > { %v3451_v5 = vmul.f32 %v10631_v10, %v3390_v24  ;;  %v3143_v10 = vsel %vm1069_vm5, %v9202_v19, %v9311_v50  ;;  %v3142_v59 = vsel %vm1069_vm5, %v10634_v8, %v9315_v52 }
 0x54f   : > { %v3203_v7 = vmul.f32 %v10637_v51, %v3143_v10 }
 0x550   : > { %3877 = vmatpush.msra.mxu2 %v3451_v5 }
 0x551   : > { %4435 = vmatmul.msk.f32.vlgmr.msra.gmra.mxu2 %vm3530_vm1, %v8874_v40 }
 0x552   : > { %4433 = vmatmul.msk.f32.gmra.mxu3 %vm3530_vm1, %v8956_v20 }
 0x554   : > { %v9325_v54 = vpop.permute.xlu1 %3106  ;;  %v9327_v32 = vpop.permute.xlu0 %3082 }
 0x555   : > { %v9329_v45 = vpop.permute.xlu2 %3104  ;;  %v3144_v13 = vsel %vm1069_vm5, %v9175_v15, %v9327_v32  ;;  %v3195_v15 = vmul.f32 %v10637_v51, %v3142_v59  ;;  %v3140_v36 = vsel %vm1069_vm5, %v9253_v46, %v9325_v54 }
 0x556   : > { %v3211_v22 = vmul.f32 %v10637_v51, %v3144_v13  ;;  %v10638_v51 = vld [vmem:[#allocation29_spill] sm:$0xff]  ;;  %v9387_v24 = vpop.f32.mrf.mxu3 }
 0x557   : > { %v3244_v30 = vmul.f32 %v10638_v51, %v3140_v36  ;;  %v10640_v36 = vld [vmem:[#allocation59_spill] sm:$0xff] }
 0x558   : > { %3846 = vmatpush.msra.mxu0 %v3211_v22 }
 0x559   : > { %4436 = vmatmul.msk.f32.gmra.mxu2 %vm3530_vm1, %v8914_v55 }
 0x55a   : > { %4434 = vmatmul.msk.f32.gmra.mxu3 %vm3530_vm1, %v8998_v11  ;;  %3847 = vmatpush.msra.mxu0 %v3203_v7 }
 0x55c   : > { %v9354_v19 = vpop.permute.xlu1 %3102  ;;  %v3109_v41 = vpop.permute.xlu0 %3108  ;;  %3848 = vmatpush.msra.mxu0 %v3195_v15 }
 0x55d   : > { %v3379_v8 = vpop.permute.xlu2 %3378  ;;  %v3141_v16 = vsel %vm1069_vm5, %v9228_v18, %v3109_v41  ;;  %3849 = vmatmul.f32.vlgmr.msra.gmra.mxu0 %v9366_v58  ;;  %v3139_v18 = vsel %vm1069_vm5, %v3089_v53, %v9329_v45  ;;  %v3138_v49 = vsel %vm1069_vm5, %v3087_v23, %v9354_v19 }
 0x55e   : > { %v3252_v14 = vmul.f32 %v10638_v51, %v3141_v16  ;;  %3949 = vmatpush.msrb.mxu0 %v10617_v27  ;;  %v3236_v46 = vmul.f32 %v10638_v51, %v3139_v18  ;;  %v3228_v10 = vmul.f32 %v10638_v51, %v3138_v49  ;;  %v3388_v22 = vsel %vm1270_vm2, %v9177_v33, %v3379_v8 }
 0x55f   : > { %v3444_v23 = vsel %vm1270_vm2, %v3379_v8, %v8693_v12 }
 0x560   : > { %3950 = vmatpush.msrb.mxu0 %v10623_v57  ;;  %3899 = vmatpush.msrb.mxu1 %v3252_v14  ;;  %v3501_v8 = vmul.f32 %v10640_v36, %v3444_v23  ;;  %v10641_v14 = vld [vmem:[#allocation21_spill] sm:$0xff] }
 0x561   : > { %4437 = vmatmul.msk.f32.gmra.mxu2 %vm3530_vm1, %v8956_v20  ;;  %v10643_v23 = vld [vmem:[#allocation57_spill] sm:$0xff] }
 0x562   : > { %3951 = vmatpush.msrb.mxu0 %v10616_v21  ;;  %3900 = vmatpush.msrb.mxu1 %v3244_v30 }
 0x563   : > { %v9405_v15 = vpop.f32.mrf.mxu2 }
 0x564   : > { %v3377_v53 = vpop.permute.xlu1 %3376  ;;  %3952 = vmatpush.msrb.mxu0 %v10622_v4  ;;  %3901 = vmatpush.msrb.mxu1 %v3236_v46  ;;  %v3381_v13 = vpop.permute.xlu0 %3380 }
 0x565   : > { %v3099_v5 = vpop.permute.xlu2 %3098  ;;  %3852 = vmatmul.f32.gmra.mxu0 %v8781_v47  ;;  %v3389_v59 = vsel %vm1270_vm2, %v9148_v31, %v3381_v13  ;;  %v3445_v7 = vsel %vm1270_vm2, %v3381_v13, %v8626_v29  ;;  %v10639_v47 = vld [vmem:[#allocation58_spill] sm:$0xff]  ;;  %v3387_v12 = vsel %vm1270_vm2, %v9204_v43, %v3377_v53  ;;  %v3443_v29 = vsel %vm1270_vm2, %v3377_v53, %v8691_v26  ;;  %v10642_v53 = vld [vmem:[#allocation15_spill] sm:$0xff] }
 0x566   : > { %3953 = vmatpush.msrb.mxu0 %v10629_v61  ;;  %v3508_v16 = vmul.f32 %v10639_v47, %v3389_v59  ;;  %v3509_v33 = vmul.f32 %v10640_v36, %v3445_v7  ;;  %3902 = vmatpush.msrb.mxu1 %v3228_v10  ;;  %v3500_v31 = vmul.f32 %v10639_v47, %v3388_v22  ;;  %v9431_v10 = vpop.f32.mrf.mxu0  ;;  %v9435_v22 = vpop.f32.mrf.mxu1 }
 0x567   : > { %v3133_v43 = vsel %vm1069_vm5, %v3109_v41, %v10641_v14  ;;  %v3492_v18 = vmul.f32 %v10639_v47, %v3387_v12  ;;  %v3493_v46 = vmul.f32 %v10640_v36, %v3443_v29  ;;  %v3132_v13 = vsel %vm1069_vm5, %v9325_v54, %v10642_v53  ;;  %v9433_v41 = vpop.f32.mrf.mxu3 }
 0x568   : > { %3954 = vmatpush.msrb.mxu0 %v10621_v62  ;;  %3928 = vmatpush.msra.mxu3 %v3508_v16  ;;  %v9438_v59 = vmul.f32 %v10643_v23, %v3133_v43  ;;  %v3136_v7 = vsel %vm1069_vm5, %v9327_v32, %v3099_v5  ;;  %v3128_v53 = vsel %vm1069_vm5, %v3099_v5, %v8712_v3 }
 0x569   : > { %3986 = vmatpush.msrb.mxu2 %v3509_v33  ;;  %v10644_v33 = vld [vmem:[#allocation81_spill] sm:$0xff] }
 0x56a   : > { %3955 = vmatpush.msrb.mxu0 %v10632_v37  ;;  %4438 = vmatmul.msk.f32.gmra.mxu2 %vm3530_vm1, %v8998_v11  ;;  %v3131_v12 = vsel %vm1069_vm5, %v9329_v45, %v10644_v33  ;;  %v3212_v45 = vmul.f32 %v10638_v51, %v3136_v7 }
 0x56b   : > { %3929 = vmatpush.msra.mxu3 %v3500_v31  ;;  %3987 = vmatpush.msrb.mxu2 %v3501_v8  ;;  %v9455_v8 = vmul.f32 %v10643_v23, %v3132_v13  ;;  %v9467_v14 = vmul.f32 %v10643_v23, %v3131_v12  ;;  %v9506_v12 = vmul.f32 %v10643_v23, %v3128_v53 }
 0x56c   : > { %v3097_v30 = vpop.permute.xlu1 %3096  ;;  %3956 = vmatpush.msrb.mxu0 %v10628_v44  ;;  %v3101_v49 = vpop.permute.xlu0 %3100 }
 0x56d   : > { %v3373_v26 = vpop.permute.xlu2 %3372  ;;  %3930 = vmatpush.msra.mxu3 %v3492_v18  ;;  %3988 = vmatpush.msrb.mxu2 %v3493_v46  ;;  %v3137_v16 = vsel %vm1069_vm5, %v9297_v42, %v3101_v49  ;;  %v3135_v32 = vsel %vm1069_vm5, %v9311_v50, %v3097_v30  ;;  %v10645_v42 = vld [vmem:[#allocation27_spill] sm:$0xff]  ;;  %v3129_v50 = vsel %vm1069_vm5, %v3101_v49, %v8714_v1 }
 0x56e   : > { %v3220_v31 = vmul.f32 %v10638_v51, %v3137_v16  ;;  %3855 = vmatmul.f32.gmra.mxu0 %v8807_v6  ;;  %v3130_v29 = vsel %vm1069_vm5, %v9354_v19, %v10645_v42  ;;  %v3204_v6 = vmul.f32 %v10638_v51, %v3135_v32  ;;  %v3385_v13 = vsel %vm1270_vm2, %v9255_v60, %v3373_v26  ;;  %v3627_v5 = vpop.f32.mrf.mxu0  ;;  %v10646_v60 = vld [vmem:[#allocation114_spill] sm:$0xff]  ;;  %v10647_v32 = vld [vmem:[#allocation116_spill] sm:$0xff] }
 0x56f   : > { %v9446_v54 = vpop.f32.mrf.mxu2  ;;  %3957 = vmatpush.msrb.mxu0 %v9438_v59  ;;  %v9475_v18 = vmul.f32 %v10643_v23, %v3130_v29  ;;  %v3441_v1 = vsel %vm1270_vm2, %v3373_v26, %v8795_v39  ;;  %v9488_v49 = vmul.f32 %v10643_v23, %v3129_v50  ;;  %v3127_v16 = vsel %vm1069_vm5, %v3097_v30, %v10646_v60  ;;  %v9503_v33 = vpop.f32.mrf.mxu3 }
 0x570   : > { %3903 = vmatpush.msrb.mxu1 %v3220_v31  ;;  %v3476_v31 = vmul.f32 %v10639_v47, %v3385_v13 }
 0x571   : > { %3958 = vmatpush.msrb.mxu0 %v9455_v8 }
 0x572   : > { %3904 = vmatpush.msrb.mxu1 %v3212_v45 }
 0x573   : > { %3959 = vmatpush.msrb.mxu0 %v9467_v14 }
 0x574   : > { %v3371_v43 = vpop.permute.xlu1 %3370  ;;  %v3375_v46 = vpop.permute.xlu0 %3374  ;;  %3905 = vmatpush.msrb.mxu1 %v3204_v6 }
 0x575   : > { %v3369_v19 = vpop.permute.xlu2 %3368  ;;  %3960 = vmatpush.msrb.mxu0 %v9475_v18  ;;  %v3386_v7 = vsel %vm1270_vm2, %v9230_v9, %v3375_v46  ;;  %v3442_v3 = vsel %vm1270_vm2, %v3375_v46, %v8716_v17  ;;  %v3569_v9 = vpop.f32.mrf.mxu1  ;;  %v3384_v17 = vsel %vm1270_vm2, %v9275_v34, %v3371_v43  ;;  %v3440_v30 = vsel %vm1270_vm2, %v3371_v43, %v10647_v32  ;;  %v10649_v32 = vld [vmem:[#allocation112_spill] sm:$0xff] }
 0x576   : > { %v3484_v39 = vmul.f32 %v10639_v47, %v3386_v7  ;;  %v3485_v26 = vmul.f32 %v10640_v36, %v3442_v3  ;;  %3858 = vmatmul.f32.gmra.mxu0 %v8840_v48  ;;  %v3477_v48 = vmul.f32 %v10640_v36, %v3441_v1  ;;  %v3383_v29 = vsel %vm1270_vm2, %v9292_v0, %v3369_v19  ;;  %v10648_v7 = vld [vmem:[#allocation42_spill] sm:$0xff] }
 0x577   : > { %3961 = vmatpush.msrb.mxu0 %v9488_v49  ;;  %v9516_v42 = vpop.f32.mrf.mxu2  ;;  %v3439_v45 = vsel %vm1270_vm2, %v3369_v19, %v8820_v63  ;;  %v9526_v34 = vmul.f32 %v10643_v23, %v3127_v16  ;;  %v3468_v6 = vmul.f32 %v10639_v47, %v3384_v17  ;;  %v3469_v50 = vmul.f32 %v10640_v36, %v3440_v30 }
 0x578   : > { %3931 = vmatpush.msra.mxu3 %v3484_v39  ;;  %3989 = vmatpush.msrb.mxu2 %v3485_v26  ;;  %v3460_v0 = vmul.f32 %v10639_v47, %v3383_v29  ;;  %v3461_v46 = vmul.f32 %v10640_v36, %v3439_v45 }
 0x579   : > { %3962 = vmatpush.msrb.mxu0 %v9506_v12 }
 0x57a   : > { %3932 = vmatpush.msra.mxu3 %v3476_v31  ;;  %3990 = vmatpush.msrb.mxu2 %v3477_v48 }
 0x57b   : > { %3963 = vmatpush.msrb.mxu0 %v9526_v34 }
 0x57c   : > { %v9531_v43 = vpop.permute.xlu1 %3512  ;;  %v3095_v53 = vpop.permute.xlu0 %3094  ;;  %3933 = vmatpush.msra.mxu3 %v3468_v6  ;;  %3991 = vmatpush.msrb.mxu2 %v3469_v50 }
 0x57d   : > { %v3561_v63 = vadd.f32 %v9345_v2, %v9531_v43  ;;  %v9538_v19 = vpop.permute.xlu2 %3517  ;;  %v3126_v3 = vsel %vm1069_vm5, %v3095_v53, %v10648_v7  ;;  %v3134_v2 = vsel %vm1069_vm5, %v9315_v52, %v3095_v53  ;;  %v3598_v52 = vpop.f32.mrf.mxu3  ;;  %v3619_v35 = vadd.f32 %v9347_v28, %v9531_v43 }
 0x57e   : > { %v3564_v13 = vadd.f32 %v9379_v56, %v9538_v19  ;;  %v3622_v1 = vadd.f32 %v9381_v38, %v9538_v19  ;;  %v9554_v16 = vmul.f32 %v10643_v23, %v3126_v3  ;;  %v3196_v39 = vmul.f32 %v10638_v51, %v3134_v2  ;;  %3934 = vmatpush.msra.mxu3 %v3460_v0  ;;  %v3676_v26 = vpop.f32.mrf.mxu1 }
 0x57f   : > { %v9548_v60 = vadd.f32 %v9387_v24, %v3561_v63  ;;  %3992 = vmatpush.msrb.mxu2 %v3461_v46  ;;  %v3734_v24 = vpop.f32.mrf.mxu0  ;;  %v3656_v23 = vpop.f32.mrf.mxu2  ;;  %v3648_v50 = vadd.f32 %v9405_v15, %v3619_v35  ;;  %vm4192_vm5 = vcmask 1040384  }
 0x580   : > { %v9557_v56 = vadd.f32 %v9433_v41, %v3564_v13  ;;  %v9560_v38 = vadd.f32 %v9446_v54, %v3622_v1  ;;  %3964 = vmatpush.msrb.mxu0 %v9554_v16  ;;  %3906 = vmatpush.msrb.mxu1 %v3196_v39 }
 0x581   : > { %3965 = vmatmul.f32.vlgmr.msrb.gmra.mxu0 %v9366_v58  ;;  %3907 = vmatmul.f32.vlgmr.msrb.gmra.mxu1 %v9366_v58  ;;  %v4008_v15 = vmax.f32 %v3648_v50, 0.0 }
 0x582   : > { %4455 = vmatpush.msra.mxu1 %v10617_v27  ;;  %v4016_v3 = vmax.f32 %v9560_v38, 0.0 }
 0x584   : > { %v9567_v41 = vpop.permute.xlu1 %3527  ;;  %v3367_v31 = vpop.permute.xlu0 %3366  ;;  %4456 = vmatpush.msra.mxu1 %v10623_v57 }
 0x585   : > { %v3570_v54 = vadd.f32 %v3569_v9, %v9567_v41  ;;  %v3628_v51 = vadd.f32 %v3627_v5, %v9567_v41  ;;  %v3382_v17 = vsel %vm1270_vm2, %v9313_v25, %v3367_v31  ;;  %v3438_v58 = vsel %vm1270_vm2, %v3367_v31, %v10649_v32  ;;  %v9585_v57 = vpop.permute.xlu2 %4041  ;;  %v4574_v25 = vld [vmem:[%s9757_s5 + $0x10] sm:$0xff] }
 0x586   : > { %v3452_v48 = vmul.f32 %v10639_v47, %v3382_v17  ;;  %v3453_v9 = vmul.f32 %v10640_v36, %v3438_v58  ;;  %4457 = vmatpush.msra.mxu1 %v10616_v21  ;;  %v3677_v21 = vadd.f32 %v3676_v26, %v9531_v43  ;;  %v3735_v36 = vadd.f32 %v3734_v24, %v9531_v43  ;;  %v3679_v5 = vpop.f32.mrf.mxu1 }
 0x587   : > { %v9578_v30 = vadd.f32 %v3598_v52, %v3570_v54  ;;  %v9580_v27 = vadd.f32 %v3656_v23, %v3628_v51  ;;  %v3737_v47 = vpop.f32.mrf.mxu0  ;;  %vm4194_vm2 = vcmask 1042434  }
 0x588   : > { %3935 = vmatpush.msra.mxu3 %v3452_v48  ;;  %3993 = vmatpush.msrb.mxu2 %v3453_v9 }
 0x589   : > { %4458 = vmatpush.msra.mxu1 %v10622_v4  ;;  %4439 = vmatmul.msk.f32.vlgmr.msra.gmra.mxu3 %vm3530_vm1, %v8874_v40  ;;  %v4032_v26 = vmax.f32 %v9580_v27, 0.0 }
 0x58a   : > { %3910 = vmatmul.f32.gmra.mxu1 %v4574_v25  ;;  %3968 = vmatmul.f32.gmra.mxu0 %v4574_v25 }
 0x58b   : > { %4459 = vmatpush.msra.mxu1 %v10629_v61  ;;  %4443 = vmatmul.msk.f32.vlgmr.msrb.gmra.mxu2 %vm3530_vm1, %v8874_v40  ;;  %v3705_v4 = vpop.f32.mrf.mxu3  ;;  %v3763_v28 = vpop.f32.mrf.mxu2 }
 0x58c   : > { %v3706_v29 = vadd.f32 %v3705_v4, %v3677_v21  ;;  %v3764_v45 = vadd.f32 %v3763_v28, %v3735_v36  ;;  %v9601_v6 = vpop.permute.xlu0 %3522  ;;  %v9636_v38 = vpop.permute.xlu1 %4051 }
 0x58d   : > { %4460 = vmatpush.msra.mxu1 %v10621_v62  ;;  %v3567_v0 = vadd.f32 %v9435_v22, %v9601_v6  ;;  %v3625_v61 = vadd.f32 %v9431_v10, %v9601_v6  ;;  %v4007_v62 = vmax.f32 %v9548_v60, 0.0  ;;  %v4575_v22 = vld [vmem:[%s9757_s5 + $0x20] sm:$0xff]  ;;  %v9618_v10 = vpop.permute.xlu2 %4056  ;;  %v4031_v60 = vmax.f32 %v9578_v30, 0.0 }
 0x58e   : > { %v3682_v24 = vpop.f32.mrf.mxu1  ;;  %v4084_v25 = vmul.f32 %v9618_v10, %v4032_v26 }
 0x58f   : > { %4461 = vmatpush.msra.mxu1 %v10632_v37  ;;  %v3596_v40 = vadd.f32 %v9503_v33, %v3567_v0  ;;  %v3654_v46 = vadd.f32 %v9516_v42, %v3625_v61  ;;  %v4009_v37 = vmax.f32 %v3706_v29, 0.0  ;;  %v3738_v33 = vadd.f32 %v3737_v47, %v9538_v19  ;;  %v3740_v52 = vpop.f32.mrf.mxu0  ;;  %v4576_v47 = vld [vmem:[%s9757_s5 + $0x30] sm:$0xff] }
 0x590   : > { %v4015_v42 = vmax.f32 %v9557_v56, 0.0  ;;  %v4059_v63 = vmul.f32 %v9585_v57, %v4007_v62  ;;  %v4060_v56 = vmul.f32 %v9585_v57, %v4008_v15  ;;  %v4083_v51 = vmul.f32 %v9618_v10, %v4031_v60 }
 0x591   : > { %4462 = vmatpush.msra.mxu1 %v10628_v44  ;;  %4440 = vmatmul.msk.f32.gmra.mxu3 %vm3530_vm1, %v8914_v55  ;;  %v3680_v44 = vadd.f32 %v3679_v5, %v9538_v19  ;;  %v4023_v53 = vmax.f32 %v3596_v40, 0.0  ;;  %v4024_v13 = vmax.f32 %v3654_v46, 0.0  ;;  %v3683_v4 = vadd.f32 %v3682_v24, %v9601_v6 }
 0x592   : > { %3913 = vmatmul.f32.gmra.mxu1 %v4575_v22  ;;  %3971 = vmatmul.f32.gmra.mxu0 %v4575_v22  ;;  %v3741_v36 = vadd.f32 %v3740_v52, %v9601_v6 }
 0x593   : > { %4463 = vmatpush.msra.mxu1 %v9438_v59  ;;  %4444 = vmatmul.msk.f32.gmra.mxu2 %vm3530_vm1, %v8914_v55  ;;  %v3766_v7 = vpop.f32.mrf.mxu2  ;;  %v4010_v59 = vmax.f32 %v3764_v45, 0.0  ;;  %v4075_v32 = vmul.f32 %v9636_v38, %v4023_v53  ;;  %v4076_v58 = vmul.f32 %v9636_v38, %v4024_v13 }
 0x594   : > { %v3708_v1 = vpop.f32.mrf.mxu3  ;;  %v3767_v2 = vadd.f32 %v3766_v7, %v3738_v33  ;;  %v9630_v39 = vpop.permute.xlu0 %4046 }
 0x595   : > { %4464 = vmatpush.msra.mxu1 %v9455_v8  ;;  %v3709_v55 = vadd.f32 %v3708_v1, %v3680_v44  ;;  %v4067_v23 = vmul.f32 %v9630_v39, %v4015_v42  ;;  %v4068_v54 = vmul.f32 %v9630_v39, %v4016_v3  ;;  %v4061_v8 = vmul.f32 %v9585_v57, %v4009_v37 }
 0x596   : > { %v4018_v17 = vmax.f32 %v3767_v2, 0.0  ;;  %v4062_v48 = vmul.f32 %v9585_v57, %v4010_v59 }
 0x597   : > { %v4017_v31 = vmax.f32 %v3709_v55, 0.0  ;;  %4465 = vmatpush.msra.mxu1 %v9467_v14  ;;  %v4091_v30 = vadd.f32 %v4067_v23, %v4059_v63  ;;  %v4100_v27 = vadd.f32 %v4068_v54, %v4060_v56 }
 0x598   : > { %v4070_v35 = vmul.f32 %v9630_v39, %v4018_v17 }
 0x599   : > { %4466 = vmatpush.msra.mxu1 %v9475_v18  ;;  %4441 = vmatmul.msk.f32.gmra.mxu3 %vm3530_vm1, %v8956_v20  ;;  %v4069_v9 = vmul.f32 %v9630_v39, %v4017_v31  ;;  %v4092_v14 = vadd.f32 %v4091_v30, %v4075_v32  ;;  %v4101_v21 = vadd.f32 %v4100_v27, %v4076_v58 }
 0x59a   : > { %3916 = vmatmul.f32.gmra.mxu1 %v4576_v47  ;;  %v4118_v5 = vadd.f32 %v4070_v35, %v4062_v48 }
 0x59b   : > { %4467 = vmatpush.msra.mxu1 %v9488_v49  ;;  %4445 = vmatmul.msk.f32.gmra.mxu2 %vm3530_vm1, %v8956_v20  ;;  %v4109_v18 = vadd.f32 %v4069_v9, %v4061_v8  ;;  %v3769_v28 = vpop.f32.mrf.mxu2  ;;  %v4093_v45 = vadd.f32 %v4092_v14, %v4083_v51  ;;  %v4102_v50 = vadd.f32 %v4101_v21, %v4084_v25  ;;  %v3685_v49 = vpop.f32.mrf.mxu1 }
 0x59c   : > { %v3711_v29 = vpop.f32.mrf.mxu3  ;;  %v3770_v61 = vadd.f32 %v3769_v28, %v3741_v36  ;;  %v3743_v20 = vpop.f32.mrf.mxu0  ;;  %v3686_v63 = vadd.f32 %v3685_v49, %v9567_v41 }
 0x59d   : > { %4468 = vmatpush.msra.mxu1 %v9506_v12  ;;  %v3712_v0 = vadd.f32 %v3711_v29, %v3683_v4  ;;  %v4094_v40 = vrot.slane %v4093_v45, 4  ;;  %v4103_v46 = vrot.slane %v4102_v50, 4 }
 0x59e   : > { %v4026_v15 = vmax.f32 %v3770_v61, 0.0 }
 0x59f   : > { %v4025_v62 = vmax.f32 %v3712_v0, 0.0  ;;  %4469 = vmatpush.msra.mxu1 %v9526_v34  ;;  %v4095_v22 = vadd.f32 %v4094_v40, %v4093_v45  ;;  %v4104_v37 = vadd.f32 %v4103_v46, %v4102_v50  ;;  %v3744_v34 = vadd.f32 %v3743_v20, %v9567_v41 }
 0x5a0   : > { %v4078_v33 = vmul.f32 %v9636_v38, %v4026_v15 }
 0x5a1   : > { %v4077_v44 = vmul.f32 %v9636_v38, %v4025_v62  ;;  %4470 = vmatpush.msra.mxu1 %v9554_v16  ;;  %4442 = vmatmul.msk.f32.gmra.mxu3 %vm3530_vm1, %v8998_v11  ;;  %v4096_v12 = vrot.slane %v4095_v22, 2  ;;  %v4105_v42 = vrot.slane %v4104_v37, 2  ;;  %v4166_v16 = vpop.permute.xlu0 %4165 }
 0x5a2   : > { %3974 = vmatmul.f32.vlgmr.msra.gmra.mxu1 %v4576_v47  ;;  %v4119_v13 = vadd.f32 %v4118_v5, %v4078_v33  ;;  %v9669_v26 = vperm.slane %v4166_v16, 0 }
 0x5a3   : > { %v4110_v53 = vadd.f32 %v4109_v18, %v4077_v44  ;;  %4446 = vmatmul.msk.f32.gmra.mxu2 %vm3530_vm1, %v8998_v11  ;;  %v3772_v7 = vpop.f32.mrf.mxu2  ;;  %v4097_v3 = vadd.f32 %v4096_v12, %v4095_v22  ;;  %v4106_v60 = vadd.f32 %v4105_v42, %v4104_v37 }
 0x5a4   : > { %v3714_v1 = vpop.f32.mrf.mxu3  ;;  %v3773_v55 = vadd.f32 %v3772_v7, %v3744_v34 }
 0x5a5   : > { %v3715_v59 = vadd.f32 %v3714_v1, %v3686_v63  ;;  %v4098_v2 = vrot.slane %v4097_v3, 1  ;;  %v4107_v24 = vrot.slane %v4106_v60, 1 }
 0x5a6   : > { %v4034_v56 = vmax.f32 %v3773_v55, 0.0 }
 0x5a7   : > { %v4033_v52 = vmax.f32 %v3715_v59, 0.0  ;;  %v4099_v23 = vadd.f32 %v4098_v2, %v4097_v3  ;;  %v4108_v54 = vadd.f32 %v4107_v24, %v4106_v60  ;;  %v3792_v40 = vpop.f32.mrf.mxu1 }
 0x5a8   : > { %v4086_v8 = vmul.f32 %v9618_v10, %v4034_v56 }
 0x5a9   : > { %v4085_v51 = vmul.f32 %v9618_v10, %v4033_v52  ;;  %v4170_v11 = vadd.f32 %v9669_v26, %v4108_v54  ;;  %v4169_v32 = vadd.f32 %v9669_v26, %v4099_v23  ;;  %v3793_v52 = vadd.f32 %v3792_v40, %v9531_v43 }
 0x5aa   : > { %v4120_v17 = vadd.f32 %v4119_v13, %v4086_v8 }
 0x5ab   : > { %v4111_v31 = vadd.f32 %v4110_v53, %v4085_v51  ;;  %v4185_v58 = vrot.slane %v4170_v11, 7 }
 0x5ac   : > { %v4121_v27 = vrot.slane %v4120_v17, 4 }
 0x5ad   : > { %v4112_v30 = vrot.slane %v4111_v31, 4  ;;  %v4193_v48 = vsel %vm4192_vm5, %v4169_v32, %v4185_v58 }
 0x5ae   : > { %v4122_v35 = vadd.f32 %v4121_v27, %v4120_v17 }
 0x5af   : > { %v4113_v9 = vadd.f32 %v4112_v30, %v4111_v31 }
 0x5b0   : > { %v4123_v14 = vrot.slane %v4122_v35, 2  ;;  %v3795_v62 = vpop.f32.mrf.mxu1 }
 0x5b1   : > { %v4114_v25 = vrot.slane %v4113_v9, 2  ;;  %v3796_v55 = vadd.f32 %v3795_v62, %v9538_v19 }
 0x5b2   : > { %v4124_v47 = vadd.f32 %v4123_v14, %v4122_v35 }
 0x5b3   : > { %v4115_v21 = vadd.f32 %v4114_v25, %v4113_v9 }
 0x5b4   : > { %v4125_v18 = vrot.slane %v4124_v47, 1 }
 0x5b5   : > { %v4116_v4 = vrot.slane %v4115_v21, 1 }
 0x5b6   : > { %v4126_v5 = vadd.f32 %v4125_v18, %v4124_v47 }
 0x5b7   : > { %v4117_v36 = vadd.f32 %v4116_v4, %v4115_v21 }
 0x5b8   : > { %v4172_v28 = vadd.f32 %v9669_v26, %v4126_v5  ;;  %v3798_v22 = vpop.f32.mrf.mxu1 }
 0x5b9   : > { %v4171_v29 = vadd.f32 %v9669_v26, %v4117_v36  ;;  %v3799_v56 = vadd.f32 %v3798_v22, %v9601_v6 }
 0x5ba   : > { %v4187_v50 = vrot.slane %v4172_v28, 5 }
 0x5bb   : > { %v4186_v45 = vrot.slane %v4171_v29, 6 }
 0x5bd   : > { %v4195_v0 = vsel %vm4194_vm2, %v4186_v45, %v4187_v50 }
 0x5be   : > { %v9677_v61 = vsel %vm4196_vm10, %v4193_v48, %v4195_v0 }
 0x5c0   : > { %v3801_v12 = vpop.f32.mrf.mxu1 }
 0x5c1   : > { %v3802_v11 = vadd.f32 %v3801_v12, %v9567_v41 }
 0x5c5   : > { %v3821_v15 = vpop.f32.mrf.mxu3 }
 0x5c6   : > { %v3822_v31 = vadd.f32 %v3821_v15, %v3793_v52 }
 0x5c8   : > { %v4011_v21 = vmax.f32 %v3822_v31, 0.0 }
 0x5ca   : > { %v4063_v50 = vmul.f32 %v9585_v57, %v4011_v21 }
 0x5cd   : > { %v3824_v37 = vpop.f32.mrf.mxu3 }
 0x5ce   : > { %v3825_v23 = vadd.f32 %v3824_v37, %v3796_v55 }
 0x5d0   : > { %v4019_v48 = vmax.f32 %v3825_v23, 0.0 }
 0x5d2   : > { %v4071_v36 = vmul.f32 %v9630_v39, %v4019_v48 }
 0x5d4   : > { %v3879_v49 = vpop.f32.mrf.mxu2  ;;  %v4127_v15 = vadd.f32 %v4071_v36, %v4063_v50 }
 0x5d5   : > { %v3827_v42 = vpop.f32.mrf.mxu3 }
 0x5d6   : > { %v3828_v17 = vadd.f32 %v3827_v42, %v3799_v56 }
 0x5d8   : > { %v4027_v47 = vmax.f32 %v3828_v17, 0.0 }
 0x5da   : > { %v3850_v46 = vpop.f32.mrf.mxu0  ;;  %v4079_v0 = vmul.f32 %v9636_v38, %v4027_v47 }
 0x5db   : > { %v3851_v16 = vadd.f32 %v3850_v46, %v9531_v43 }
 0x5dc   : > { %v3882_v44 = vpop.f32.mrf.mxu2 }
 0x5dd   : > { %v3830_v13 = vpop.f32.mrf.mxu3  ;;  %v3880_v54 = vadd.f32 %v3879_v49, %v3851_v16 }
 0x5de   : > { %v3831_v9 = vadd.f32 %v3830_v13, %v3802_v11 }
 0x5df   : > { %v4012_v35 = vmax.f32 %v3880_v54, 0.0 }
 0x5e0   : > { %v4035_v5 = vmax.f32 %v3831_v9, 0.0 }
 0x5e1   : > { %v4064_v29 = vmul.f32 %v9585_v57, %v4012_v35 }
 0x5e2   : > { %v3853_v20 = vpop.f32.mrf.mxu0  ;;  %v4087_v49 = vmul.f32 %v9618_v10, %v4035_v5 }
 0x5e3   : > { %v3854_v1 = vadd.f32 %v3853_v20, %v9538_v19 }
 0x5e4   : > { %v3885_v63 = vpop.f32.mrf.mxu2 }
 0x5e5   : > { %v3883_v2 = vadd.f32 %v3882_v44, %v3854_v1  ;;  %v4128_v44 = vadd.f32 %v4127_v15, %v4079_v0 }
 0x5e7   : > { %v4020_v32 = vmax.f32 %v3883_v2, 0.0  ;;  %v4129_v1 = vadd.f32 %v4128_v44, %v4087_v49 }
 0x5e9   : > { %v4072_v4 = vmul.f32 %v9630_v39, %v4020_v32  ;;  %v4130_v54 = vrot.slane %v4129_v1, 4 }
 0x5eb   : > { %v3856_v33 = vpop.f32.mrf.mxu0  ;;  %v4136_v40 = vadd.f32 %v4072_v4, %v4064_v29 }
 0x5ec   : > { %v3857_v59 = vadd.f32 %v3856_v33, %v9601_v6 }
 0x5ed   : > { %v3888_v7 = vpop.f32.mrf.mxu2 }
 0x5ee   : > { %v3886_v51 = vadd.f32 %v3885_v63, %v3857_v59 }
 0x5f0   : > { %v4028_v25 = vmax.f32 %v3886_v51, 0.0 }
 0x5f2   : > { %v4080_v28 = vmul.f32 %v9636_v38, %v4028_v25 }
 0x5f3   : > { %v3859_v34 = vpop.f32.mrf.mxu0 }
 0x5f4   : > { %v3860_v24 = vadd.f32 %v3859_v34, %v9567_v41  ;;  %v4137_v20 = vadd.f32 %v4136_v40, %v4080_v28 }
 0x5f6   : > { %v3889_v58 = vadd.f32 %v3888_v7, %v3860_v24 }
 0x5f8   : > { %v4036_v18 = vmax.f32 %v3889_v58, 0.0 }
 0x5fa   : > { %v4088_v46 = vmul.f32 %v9618_v10, %v4036_v18 }
 0x5fc   : > { %v4138_v33 = vadd.f32 %v4137_v20, %v4088_v46 }
 0x5fe   : > { %v3908_v53 = vpop.f32.mrf.mxu1  ;;  %v3966_v3 = vpop.f32.mrf.mxu0 }
 0x5ff   : > { %v3909_v12 = vadd.f32 %v3908_v53, %v9531_v43  ;;  %v3967_v7 = vadd.f32 %v3966_v3, %v9531_v43 }
 0x607   : > { %v3911_v60 = vpop.f32.mrf.mxu1  ;;  %v3969_v14 = vpop.f32.mrf.mxu0 }
 0x608   : > { %v3912_v37 = vadd.f32 %v3911_v60, %v9538_v19  ;;  %v3970_v63 = vadd.f32 %v3969_v14, %v9538_v19  ;;  %v4139_v60 = vrot.slane %v4138_v33, 4 }
 0x60a   : > { %v4140_v31 = vadd.f32 %v4139_v60, %v4138_v33 }
 0x60c   : > { %v3937_v8 = vpop.f32.mrf.mxu3  ;;  %v4141_v25 = vrot.slane %v4140_v31, 2 }
 0x60d   : > { %v3938_v16 = vadd.f32 %v3937_v8, %v3909_v12 }
 0x60e   : > { %v3995_v30 = vpop.f32.mrf.mxu2  ;;  %v4142_v50 = vadd.f32 %v4141_v25, %v4140_v31 }
 0x60f   : > { %v3914_v27 = vpop.f32.mrf.mxu1  ;;  %v3972_v42 = vpop.f32.mrf.mxu0  ;;  %v3996_v52 = vadd.f32 %v3995_v30, %v3967_v7  ;;  %v4013_v51 = vmax.f32 %v3938_v16, 0.0 }
 0x610   : > { %v3915_v34 = vadd.f32 %v3914_v27, %v9601_v6  ;;  %v3973_v55 = vadd.f32 %v3972_v42, %v9601_v6  ;;  %v4131_v6 = vadd.f32 %v4130_v54, %v4129_v1  ;;  %v4143_v15 = vrot.slane %v4142_v50, 1 }
 0x611   : > { %v4014_v17 = vmax.f32 %v3996_v52, 0.0  ;;  %v4065_v58 = vmul.f32 %v9585_v57, %v4013_v51 }
 0x612   : > { %v4132_v5 = vrot.slane %v4131_v6, 2  ;;  %v4144_v44 = vadd.f32 %v4143_v15, %v4142_v50 }
 0x613   : > { %v4066_v14 = vmul.f32 %v9585_v57, %v4014_v17 }
 0x614   : > { %v3940_v45 = vpop.f32.mrf.mxu3  ;;  %v4133_v46 = vadd.f32 %v4132_v5, %v4131_v6 }
 0x615   : > { %v3941_v13 = vadd.f32 %v3940_v45, %v3912_v37 }
 0x616   : > { %v3998_v62 = vpop.f32.mrf.mxu2  ;;  %v4134_v20 = vrot.slane %v4133_v46, 1 }
 0x617   : > { %v3917_v22 = vpop.f32.mrf.mxu1  ;;  %v3999_v2 = vadd.f32 %v3998_v62, %v3970_v63  ;;  %v4021_v23 = vmax.f32 %v3941_v13, 0.0 }
 0x618   : > { %v3918_v3 = vadd.f32 %v3917_v22, %v9567_v41  ;;  %v4135_v42 = vadd.f32 %v4134_v20, %v4133_v46 }
 0x619   : > { %v4022_v19 = vmax.f32 %v3999_v2, 0.0  ;;  %v4073_v43 = vmul.f32 %v9630_v39, %v4021_v23 }
 0x61a   : > { %v4173_v7 = vadd.f32 %v9669_v26, %v4135_v42 }
 0x61b   : > { %v4074_v30 = vmul.f32 %v9630_v39, %v4022_v19  ;;  %v4145_v47 = vadd.f32 %v4073_v43, %v4065_v58 }
 0x61c   : > { %v3943_v59 = vpop.f32.mrf.mxu3  ;;  %v4188_v60 = vrot.slane %v4173_v7, 4 }
 0x61d   : > { %v3944_v24 = vadd.f32 %v3943_v59, %v3915_v34  ;;  %v4154_v29 = vadd.f32 %v4074_v30, %v4066_v14 }
 0x61e   : > { %v4001_v56 = vpop.f32.mrf.mxu2 }
 0x61f   : > { %v4002_v53 = vadd.f32 %v4001_v56, %v3973_v55  ;;  %v4029_v11 = vmax.f32 %v3944_v24, 0.0  ;;  %v3975_v32 = vpop.f32.mrf.mxu1 }
 0x620   : > { %v3976_v9 = vadd.f32 %v3975_v32, %v9567_v41 }
 0x621   : > { %v4030_v8 = vmax.f32 %v4002_v53, 0.0  ;;  %v4081_v48 = vmul.f32 %v9636_v38, %v4029_v11 }
 0x623   : > { %v4082_v4 = vmul.f32 %v9636_v38, %v4030_v8  ;;  %v4146_v28 = vadd.f32 %v4145_v47, %v4081_v48 }
 0x624   : > { %v3946_v27 = vpop.f32.mrf.mxu3 }
 0x625   : > { %v3947_v35 = vadd.f32 %v3946_v27, %v3918_v3  ;;  %v4155_v0 = vadd.f32 %v4154_v29, %v4082_v4 }
 0x626   : > { %v4004_v21 = vpop.f32.mrf.mxu2 }
 0x627   : > { %v4037_v18 = vmax.f32 %v3947_v35, 0.0  ;;  %v4005_v36 = vadd.f32 %v4004_v21, %v3976_v9 }
 0x629   : > { %v4089_v45 = vmul.f32 %v9618_v10, %v4037_v18  ;;  %v4038_v39 = vmax.f32 %v4005_v36, 0.0 }
 0x62b   : > { %v4147_v41 = vadd.f32 %v4146_v28, %v4089_v45  ;;  %v4090_v40 = vmul.f32 %v9618_v10, %v4038_v39  ;;  %v4174_v10 = vadd.f32 %v9669_v26, %v4144_v44 }
 0x62d   : > { %v4148_v57 = vrot.slane %v4147_v41, 4  ;;  %v4156_v62 = vadd.f32 %v4155_v0, %v4090_v40  ;;  %v4189_v55 = vrot.slane %v4174_v10, 3 }
 0x62f   : > { %v4149_v38 = vadd.f32 %v4148_v57, %v4147_v41  ;;  %v4157_v49 = vrot.slane %v4156_v62, 4  ;;  %v4199_v56 = vsel %vm4198_vm0, %v4188_v60, %v4189_v55 }
 0x631   : > { %v4150_v22 = vrot.slane %v4149_v38, 2  ;;  %v4158_v37 = vadd.f32 %v4157_v49, %v4156_v62 }
 0x633   : > { %v4151_v33 = vadd.f32 %v4150_v22, %v4149_v38  ;;  %v4159_v12 = vrot.slane %v4158_v37, 2 }
 0x635   : > { %v4152_v63 = vrot.slane %v4151_v33, 1  ;;  %v4160_v34 = vadd.f32 %v4159_v12, %v4158_v37 }
 0x637   : > { %v4153_v13 = vadd.f32 %v4152_v63, %v4151_v33  ;;  %v4161_v1 = vrot.slane %v4160_v34, 1 }
 0x639   : > { %v4175_v16 = vadd.f32 %v9669_v26, %v4153_v13  ;;  %v4162_v59 = vadd.f32 %v4161_v1, %v4160_v34 }
 0x63b   : > { %v4190_v2 = vrot.slane %v4175_v16, 2  ;;  %v4176_v24 = vadd.f32 %v9669_v26, %v4162_v59 }
 0x63d   : > { %v4191_v52 = vrot.slane %v4176_v24, 1 }
 0x63f   : > { %v4201_v23 = vsel %vm4200_vm4, %v4190_v2, %v4191_v52 }
 0x640   : > { %v4203_v53 = vsel %vm4202_vm3, %v4199_v56, %v4201_v23 }
 0x641   : > { %v4205_v54 = vsel %vm4204_vm6, %v9677_v61, %v4203_v53 }
 0x642   : > { %4207 = vst [vmem:[%s342_s8] sm:$0xff] %v4205_v54 }
 0x643   : > { %4634 = shalt.err (!%p4631_p8)
}
 0x644   : > { %4475 = dma.vmem_to_hbm [thread:$0]  (%p4783_p5), %s4222_s22, 128, %s4224_s23, %s4209_s17  }
 0x645 PF: > { %p4487_p9 = scmp.ge.s32.totalorder %s4673_s14, 2  ;;  %s4235_s27 = sand.u32 1, %s4661_s11  }
 0x646   : > { %s4236_s29 = scalar_lea.sflag [#allocation5], %s4235_s27 }
 0x647   : > { %p4482_p10 = pnand %p4487_p9, %p4787_p6 }
 0x649   : > { %p4483_p11 = pneg %p4482_p10 }
 0x64b   : > { %4656 = dma.done.wait (%p4483_p11), %s4236_s29, 128  }
 0x64c   : > { %4658 = vsyncadd (%p4483_p11), %s4236_s29, 4294967168  ;;  %p22_p12 = scmp.ge.s32.totalorder %s4770_s16, 4   ;;  %s10650_s11 = smov %s4665_s12 }
 0x64d   : > { %s10651_s12 = smov %s4669_s13  ;;  %s10652_s13 = smov %s4781_s19 }
 0x64e   : > { %s10653_s14 = smov %s4770_s16  ;;  %24 = sbr.rel (!%p22_p12) target bundleno = 7 (0x7), region = 96 }
 0x653   :  { %4242 = vsyncpa [#allocation4], 1 }
 0x654   :  { %4244 = vsyncpa [#allocation4 + $0x1], 1 }
 0x655   :  { %4245 = vsyncpa [#allocation5], 1 }
 0x656   :  { %4247 = vsyncpa [#allocation5 + $0x1], 1 }

</bundles_post_ra>
